<compile_context>
chip_gen: v7x
topology: tpu7x:2x2x1
jax: 0.10.0
libtpu: 0.0.40
codegen_flags: <defaults>
</compile_context>

<pallas_src>
import functools
import math

import jax
import jax.numpy as jnp
from jax.experimental import pallas as pl
from jax.experimental.pallas import tpu as pltpu


def _blocks_kernel(q_ref, k_ref, v_ref,
                   wq_ref, bq_ref, wk_ref, bk_ref, wv_ref, bv_ref,
                   woh_ref, bo_ref,
                   g1_ref, be1_ref,
                   w1_ref, b1_ref, w2_ref, b2_ref,
                   g2_ref, be2_ref,
                   o_ref,
                   *, num_heads, head_dim, compute_dtype):
    Bt, S, E = q_ref.shape
    M = Bt * S
    cast = jnp.dtype(compute_dtype) != jnp.dtype(jnp.float32)

    def to_cd(x):
        return x.astype(compute_dtype) if cast else x

    def mm(x, w):
        # Weights are stored pre-transposed (in, out): plain x @ w, no .T in-kernel.
        return jnp.dot(to_cd(x), to_cd(w), preferred_element_type=jnp.float32)

    def layer_norm(x, g_ref, b_ref, eps=1e-5):
        mu = jnp.mean(x, axis=-1, keepdims=True)
        var = jnp.mean((x - mu) ** 2, axis=-1, keepdims=True)
        return (x - mu) * jax.lax.rsqrt(var + eps) * g_ref[...] + b_ref[...]

    q2 = q_ref[...].reshape(M, E)
    k2 = k_ref[...].reshape(M, E)
    v2 = v_ref[...].reshape(M, E)

    # ---- MHA in-projections (1/sqrt(Dh) already folded into Wq / bq) ----
    Qp = mm(q2, wq_ref[...]) + bq_ref[...]
    Kp = mm(k2, wk_ref[...]) + bk_ref[...]
    Vp = mm(v2, wv_ref[...]) + bv_ref[...]

    # Causal mask built once per grid step (strictly-upper triangle masked).
    row = jax.lax.broadcasted_iota(jnp.int32, (S, S), 0)
    col = jax.lax.broadcasted_iota(jnp.int32, (S, S), 1)
    masked = (col > row)[None, :, :]            # (1, S, S) -> broadcasts over Bt

    # ---- attention: per-head, batched over the Bt rows; out-proj accumulated ----
    attn_acc = jnp.zeros((M, E), jnp.float32)
    for h in range(num_heads):                   # static, small head count
        lo = h * head_dim
        Qh = Qp[:, lo:lo + head_dim].reshape(Bt, S, head_dim)
        Kh = Kp[:, lo:lo + head_dim].reshape(Bt, S, head_dim)
        Vh = Vp[:, lo:lo + head_dim].reshape(Bt, S, head_dim)

        s = jnp.einsum('bqd,bkd->bqk', to_cd(Qh), to_cd(Kh),
                       preferred_element_type=jnp.float32)        # (Bt, S, S)
        s = jnp.where(masked, -jnp.inf, s)
        m = jnp.max(s, axis=-1, keepdims=True)                    # diag unmasked -> finite
        p = jnp.exp(s - m)
        p = p * pl.reciprocal(jnp.sum(p, axis=-1, keepdims=True), approx=True)

        o_h = jnp.einsum('bqk,bkd->bqd', to_cd(p), to_cd(Vh),
                         preferred_element_type=jnp.float32)      # (Bt, S, Dh)
        # Per-head slice of the out-projection (woh_ref: (H, Dh, E)) -> no concat.
        attn_acc = attn_acc + mm(o_h.reshape(M, head_dim), woh_ref[h])

    attn_out = attn_acc + bo_ref[...]

    # ---- residual + LayerNorm ----
    y1 = layer_norm(q2 + attn_out, g1_ref, be1_ref)

    # ---- FFN: Linear -> ReLU -> Linear ----
    h1 = jnp.maximum(mm(y1, w1_ref[...]) + b1_ref[...], 0.0)
    ffn = mm(h1, w2_ref[...]) + b2_ref[...]

    # ---- residual + LayerNorm ----
    out = layer_norm(y1 + ffn, g2_ref, be2_ref)

    o_ref[...] = out.reshape(Bt, S, E).astype(o_ref.dtype)


def _pick_batch_tile(B, S, E, vmem_budget_bytes=8 * 1024 * 1024):
    """Largest divisor of B whose working set fits a conservative VMEM budget."""
    # Per batch row (f32): 4 pipelined activation tiles (double-buffered) plus
    # in-kernel projections/temps (~8 * S*E) and one head's (S,S) score/prob pair.
    per_row = ((4 * 2 + 8) * S * E + 2 * S * S) * 4
    bt = max(1, min(B, vmem_budget_bytes // max(per_row, 1)))
    while B % bt:
        bt -= 1
    return bt


def blocks_forward(q, k, v, params, *, num_heads,
                   compute_dtype=jnp.float32, batch_tile=None):
    B, S, E = q.shape
    head_dim = E // num_heads
    scale = 1.0 / math.sqrt(head_dim)

    # ---- trace-time weight preprocessing (no in-kernel transposes) ----
    wq_t = (params["wq"] * scale).T                 # (E, E), attention scale folded in
    bq_s = params["bq"] * scale                     # (1, E)
    wk_t = params["wk"].T
    wv_t = params["wv"].T
    wo_h = params["wo"].T.reshape(num_heads, head_dim, E)   # per-head out-proj blocks
    w1_t = params["w1"].T
    w2_t = params["w2"].T

    Bt = _pick_batch_tile(B, S, E) if batch_tile is None else batch_tile
    assert B % Bt == 0, "batch_tile must divide the batch size"

    act_spec = pl.BlockSpec((Bt, S, E), lambda b: (b, 0, 0))
    mat_spec = pl.BlockSpec((E, E), lambda b: (0, 0))
    vec_spec = pl.BlockSpec((1, E), lambda b: (0, 0))
    woh_spec = pl.BlockSpec((num_heads, head_dim, E), lambda b: (0, 0, 0))

    kernel = functools.partial(_blocks_kernel,
                               num_heads=num_heads, head_dim=head_dim,
                               compute_dtype=compute_dtype)

    return pl.pallas_call(
        kernel,
        out_shape=jax.ShapeDtypeStruct((B, S, E), jnp.float32),
        grid_spec=pltpu.PrefetchScalarGridSpec(
            num_scalar_prefetch=0,
            grid=(B // Bt,),
            in_specs=[
                act_spec, act_spec, act_spec,        # q, k, v
                mat_spec, vec_spec,                  # Wq^T (scaled), bq (scaled)
                mat_spec, vec_spec,                  # Wk^T, bk
                mat_spec, vec_spec,                  # Wv^T, bv
                woh_spec, vec_spec,                  # Wo^T as (H, Dh, E), bo
                vec_spec, vec_spec,                  # ln1 gamma, beta
                mat_spec, vec_spec,                  # FFN W1^T, b1
                mat_spec, vec_spec,                  # FFN W2^T, b2
                vec_spec, vec_spec,                  # ln2 gamma, beta
            ],
            out_specs=act_spec,
        ),
        compiler_params=pltpu.CompilerParams(
            dimension_semantics=("parallel",)),
    )(q, k, v,
      wq_t, bq_s, wk_t, params["bk"], wv_t, params["bv"],
      wo_h, params["bo"],
      params["g1"], params["be1"],
      w1_t, params["b1"], w2_t, params["b2"],
      params["g2"], params["be2"])


# ---------------- pure-JAX reference (for a sanity check) ----------------
def blocks_reference(q, k, v, params, *, num_heads):
    B, S, E = q.shape
    Dh = E // num_heads

    def lin(x, w, b):
        return x @ w.T + b[0]

    def ln(x, g, b, eps=1e-5):
        mu = x.mean(-1, keepdims=True)
        var = ((x - mu) ** 2).mean(-1, keepdims=True)
        return (x - mu) / jnp.sqrt(var + eps) * g[0] + b[0]

    Qp = lin(q, params["wq"], params["bq"]).reshape(B, S, num_heads, Dh)
    Kp = lin(k, params["wk"], params["bk"]).reshape(B, S, num_heads, Dh)
    Vp = lin(v, params["wv"], params["bv"]).reshape(B, S, num_heads, Dh)
    s = jnp.einsum("bqhd,bkhd->bhqk", Qp, Kp) / math.sqrt(Dh)
    mask = jnp.triu(jnp.ones((S, S), bool), k=1)
    s = jnp.where(mask, -jnp.inf, s)
    p = jax.nn.softmax(s, axis=-1)
    o = jnp.einsum("bhqk,bkhd->bqhd", p, Vp).reshape(B, S, E)
    attn_out = lin(o, params["wo"], params["bo"])
    y1 = ln(q + attn_out, params["g1"], params["be1"])
    ffn = lin(jnp.maximum(lin(y1, params["w1"], params["b1"]), 0.0),
              params["w2"], params["b2"])
    return ln(y1 + ffn, params["g2"], params["be2"])


def init_params(key, emb_size):
    keys = jax.random.split(key, 16)
    scale = 1.0 / math.sqrt(emb_size)

    def mat(k):
        return jax.random.uniform(k, (emb_size, emb_size), jnp.float32,
                                  -scale, scale)

    def vec(k):
        return jax.random.uniform(k, (1, emb_size), jnp.float32,
                                  -scale, scale)

    return {
        "wq": mat(keys[0]), "bq": vec(keys[1]),
        "wk": mat(keys[2]), "bk": vec(keys[3]),
        "wv": mat(keys[4]), "bv": vec(keys[5]),
        "wo": mat(keys[6]), "bo": vec(keys[7]),
        "g1": jnp.ones((1, emb_size), jnp.float32),
        "be1": jnp.zeros((1, emb_size), jnp.float32),
        "w1": mat(keys[8]), "b1": vec(keys[9]),
        "w2": mat(keys[10]), "b2": vec(keys[11]),
        "g2": jnp.ones((1, emb_size), jnp.float32),
        "be2": jnp.zeros((1, emb_size), jnp.float32),
    }


if __name__ == "__main__":
    B, S, E, H = 4, 16, 64, 4
    key = jax.random.PRNGKey(0)
    kq, kk, kv, kp = jax.random.split(key, 4)
    q = jax.random.normal(kq, (B, S, E), jnp.float32)
    k = jax.random.normal(kk, (B, S, E), jnp.float32)
    v = jax.random.normal(kv, (B, S, E), jnp.float32)
    params = init_params(kp, E)

    ref = blocks_reference(q, k, v, params, num_heads=H)

    # Default: whole batch in one grid step (f32 operands).
    out = jax.block_until_ready(blocks_forward(q, k, v, params, num_heads=H))
    assert out.shape == (B, S, E)
    assert jnp.allclose(out, ref, atol=2e-3, rtol=2e-3)

    # Multi-step grid path (2 batch rows per grid step).
    out2 = jax.block_until_ready(
        blocks_forward(q, k, v, params, num_heads=H, batch_tile=2))
    assert jnp.allclose(out2, ref, atol=2e-3, rtol=2e-3)

    # bf16 MXU-operand path (v6e/v7x recommendation); f32 accumulation/LayerNorm.
    out_bf16 = jax.block_until_ready(
        blocks_forward(q, k, v, params, num_heads=H,
                       compute_dtype=jnp.bfloat16))
    assert jnp.allclose(out_bf16, ref, atol=5e-2, rtol=5e-2)

    print("KERNEL_OK")
</pallas_src>

<mosaic_0001>
module attributes {stable_mosaic.version = 11 : i64} {
  func.func @_blocks_kernel(%arg0: i32, %arg1: memref<4x16x64xf32, #tpu.memory_space<vmem>>, %arg2: memref<4x16x64xf32, #tpu.memory_space<vmem>>, %arg3: memref<4x16x64xf32, #tpu.memory_space<vmem>>, %arg4: memref<64x64xf32, #tpu.memory_space<vmem>>, %arg5: memref<1x64xf32, #tpu.memory_space<vmem>>, %arg6: memref<64x64xf32, #tpu.memory_space<vmem>>, %arg7: memref<1x64xf32, #tpu.memory_space<vmem>>, %arg8: memref<64x64xf32, #tpu.memory_space<vmem>>, %arg9: memref<1x64xf32, #tpu.memory_space<vmem>>, %arg10: memref<4x16x64xf32, #tpu.memory_space<vmem>>, %arg11: memref<1x64xf32, #tpu.memory_space<vmem>>, %arg12: memref<1x64xf32, #tpu.memory_space<vmem>>, %arg13: memref<1x64xf32, #tpu.memory_space<vmem>>, %arg14: memref<64x64xf32, #tpu.memory_space<vmem>>, %arg15: memref<1x64xf32, #tpu.memory_space<vmem>>, %arg16: memref<64x64xf32, #tpu.memory_space<vmem>>, %arg17: memref<1x64xf32, #tpu.memory_space<vmem>>, %arg18: memref<1x64xf32, #tpu.memory_space<vmem>>, %arg19: memref<1x64xf32, #tpu.memory_space<vmem>>, %arg20: memref<4x16x64xf32, #tpu.memory_space<vmem>>) attributes {dimension_semantics = [#tpu.dimension_semantics<parallel>], iteration_bounds = array<i64: 1>, scalar_prefetch = 0 : i64, scratch_operands = 0 : i64, tpu.core_type = #tpu.core_type<tc>, window_params = [{transform_indices = @transform_0, window_bounds = array<i64: 4, 16, 64>}, {transform_indices = @transform_1, window_bounds = array<i64: 4, 16, 64>}, {transform_indices = @transform_2, window_bounds = array<i64: 4, 16, 64>}, {pipeline_mode = #tpu.pipeline_mode<synchronous>, transform_indices = @transform_3, window_bounds = array<i64: 64, 64>}, {pipeline_mode = #tpu.pipeline_mode<synchronous>, transform_indices = @transform_4, window_bounds = array<i64: 1, 64>}, {pipeline_mode = #tpu.pipeline_mode<synchronous>, transform_indices = @transform_5, window_bounds = array<i64: 64, 64>}, {pipeline_mode = #tpu.pipeline_mode<synchronous>, transform_indices = @transform_6, window_bounds = array<i64: 1, 64>}, {pipeline_mode = #tpu.pipeline_mode<synchronous>, transform_indices = @transform_7, window_bounds = array<i64: 64, 64>}, {pipeline_mode = #tpu.pipeline_mode<synchronous>, transform_indices = @transform_8, window_bounds = array<i64: 1, 64>}, {pipeline_mode = #tpu.pipeline_mode<synchronous>, transform_indices = @transform_9, window_bounds = array<i64: 4, 16, 64>}, {pipeline_mode = #tpu.pipeline_mode<synchronous>, transform_indices = @transform_10, window_bounds = array<i64: 1, 64>}, {pipeline_mode = #tpu.pipeline_mode<synchronous>, transform_indices = @transform_11, window_bounds = array<i64: 1, 64>}, {pipeline_mode = #tpu.pipeline_mode<synchronous>, transform_indices = @transform_12, window_bounds = array<i64: 1, 64>}, {pipeline_mode = #tpu.pipeline_mode<synchronous>, transform_indices = @transform_13, window_bounds = array<i64: 64, 64>}, {pipeline_mode = #tpu.pipeline_mode<synchronous>, transform_indices = @transform_14, window_bounds = array<i64: 1, 64>}, {pipeline_mode = #tpu.pipeline_mode<synchronous>, transform_indices = @transform_15, window_bounds = array<i64: 64, 64>}, {pipeline_mode = #tpu.pipeline_mode<synchronous>, transform_indices = @transform_16, window_bounds = array<i64: 1, 64>}, {pipeline_mode = #tpu.pipeline_mode<synchronous>, transform_indices = @transform_17, window_bounds = array<i64: 1, 64>}, {pipeline_mode = #tpu.pipeline_mode<synchronous>, transform_indices = @transform_18, window_bounds = array<i64: 1, 64>}, {transform_indices = @transform_19, window_bounds = array<i64: 4, 16, 64>}]} {
    %c0 = arith.constant 0 : index
    %c0_0 = arith.constant 0 : index
    %c0_1 = arith.constant 0 : index
    %0 = vector.load %arg1[%c0, %c0_0, %c0_1] : memref<4x16x64xf32, #tpu.memory_space<vmem>>, vector<4x16x64xf32>
    %1 = vector.shape_cast %0 : vector<4x16x64xf32> to vector<64x64xf32>
    %c0_2 = arith.constant 0 : index
    %c0_3 = arith.constant 0 : index
    %c0_4 = arith.constant 0 : index
    %2 = vector.load %arg2[%c0_2, %c0_3, %c0_4] : memref<4x16x64xf32, #tpu.memory_space<vmem>>, vector<4x16x64xf32>
    %3 = vector.shape_cast %2 : vector<4x16x64xf32> to vector<64x64xf32>
    %c0_5 = arith.constant 0 : index
    %c0_6 = arith.constant 0 : index
    %c0_7 = arith.constant 0 : index
    %4 = vector.load %arg3[%c0_5, %c0_6, %c0_7] : memref<4x16x64xf32, #tpu.memory_space<vmem>>, vector<4x16x64xf32>
    %5 = vector.shape_cast %4 : vector<4x16x64xf32> to vector<64x64xf32>
    %c0_8 = arith.constant 0 : index
    %c0_9 = arith.constant 0 : index
    %6 = vector.load %arg4[%c0_8, %c0_9] : memref<64x64xf32, #tpu.memory_space<vmem>>, vector<64x64xf32>
    %cst = arith.constant dense<0.000000e+00> : vector<64x64xf32>
    %7 = tpu.matmul %1, %6, %cst {dimension_numbers = #tpu.dot_dimension_numbers<[1], [0], [0], [1], [0, 0, 1, 1], [], []>} : vector<64x64xf32>, vector<64x64xf32>, vector<64x64xf32> -> vector<64x64xf32>
    %c0_10 = arith.constant 0 : index
    %c0_11 = arith.constant 0 : index
    %8 = vector.load %arg5[%c0_10, %c0_11] : memref<1x64xf32, #tpu.memory_space<vmem>>, vector<1x64xf32>
    %9 = vector.broadcast %8 : vector<1x64xf32> to vector<64x64xf32>
    %10 = arith.addf %7, %9 : vector<64x64xf32>
    %c0_12 = arith.constant 0 : index
    %c0_13 = arith.constant 0 : index
    %11 = vector.load %arg6[%c0_12, %c0_13] : memref<64x64xf32, #tpu.memory_space<vmem>>, vector<64x64xf32>
    %cst_14 = arith.constant dense<0.000000e+00> : vector<64x64xf32>
    %12 = tpu.matmul %3, %11, %cst_14 {dimension_numbers = #tpu.dot_dimension_numbers<[1], [0], [0], [1], [0, 0, 1, 1], [], []>} : vector<64x64xf32>, vector<64x64xf32>, vector<64x64xf32> -> vector<64x64xf32>
    %c0_15 = arith.constant 0 : index
    %c0_16 = arith.constant 0 : index
    %13 = vector.load %arg7[%c0_15, %c0_16] : memref<1x64xf32, #tpu.memory_space<vmem>>, vector<1x64xf32>
    %14 = vector.broadcast %13 : vector<1x64xf32> to vector<64x64xf32>
    %15 = arith.addf %12, %14 : vector<64x64xf32>
    %c0_17 = arith.constant 0 : index
    %c0_18 = arith.constant 0 : index
    %16 = vector.load %arg8[%c0_17, %c0_18] : memref<64x64xf32, #tpu.memory_space<vmem>>, vector<64x64xf32>
    %cst_19 = arith.constant dense<0.000000e+00> : vector<64x64xf32>
    %17 = tpu.matmul %5, %16, %cst_19 {dimension_numbers = #tpu.dot_dimension_numbers<[1], [0], [0], [1], [0, 0, 1, 1], [], []>} : vector<64x64xf32>, vector<64x64xf32>, vector<64x64xf32> -> vector<64x64xf32>
    %c0_20 = arith.constant 0 : index
    %c0_21 = arith.constant 0 : index
    %18 = vector.load %arg9[%c0_20, %c0_21] : memref<1x64xf32, #tpu.memory_space<vmem>>, vector<1x64xf32>
    %19 = vector.broadcast %18 : vector<1x64xf32> to vector<64x64xf32>
    %20 = arith.addf %17, %19 : vector<64x64xf32>
    %21 = tpu.iota {dimensions = array<i32: 0>} : vector<16x16xi32>
    %22 = tpu.iota {dimensions = array<i32: 1>} : vector<16x16xi32>
    %23 = arith.cmpi sgt, %22, %21 : vector<16x16xi32>
    %24 = vector.shape_cast %23 : vector<16x16xi1> to vector<1x16x16xi1>
    %cst_22 = arith.constant 0.000000e+00 : f32
    %25 = vector.broadcast %cst_22 : f32 to vector<64x64xf32>
    %26 = vector.extract_strided_slice %10 {offsets = [0, 0], sizes = [64, 16], strides = [1, 1]} : vector<64x64xf32> to vector<64x16xf32>
    %27 = vector.shape_cast %26 : vector<64x16xf32> to vector<4x16x16xf32>
    %28 = vector.extract_strided_slice %15 {offsets = [0, 0], sizes = [64, 16], strides = [1, 1]} : vector<64x64xf32> to vector<64x16xf32>
    %29 = vector.shape_cast %28 : vector<64x16xf32> to vector<4x16x16xf32>
    %30 = vector.extract_strided_slice %20 {offsets = [0, 0], sizes = [64, 16], strides = [1, 1]} : vector<64x64xf32> to vector<64x16xf32>
    %31 = vector.shape_cast %30 : vector<64x16xf32> to vector<4x16x16xf32>
    "tpu.trace_start"() <{level = 10 : i32, message = "bqd,bkd->bqk"}> : () -> ()
    %cst_23 = arith.constant dense<0.000000e+00> : vector<4x16x16xf32>
    %32 = tpu.matmul %27, %29, %cst_23 {dimension_numbers = #tpu.dot_dimension_numbers<[2], [2], [1], [1], [0, 0, 0, 1, 1, 1], [0], [0]>} : vector<4x16x16xf32>, vector<4x16x16xf32>, vector<4x16x16xf32> -> vector<4x16x16xf32>
    %cst_24 = arith.constant 0xFF800000 : f32
    "tpu.trace_stop"() : () -> ()
    %33 = vector.shape_cast %24 : vector<1x16x16xi1> to vector<1x16x16xi1>
    %34 = vector.broadcast %33 : vector<1x16x16xi1> to vector<4x16x16xi1>
    %35 = vector.broadcast %cst_24 : f32 to vector<4x16x16xf32>
    %36 = arith.select %34, %35, %32 : vector<4x16x16xi1>, vector<4x16x16xf32>
    %cst_25 = arith.constant dense<0xFF800000> : vector<4x16xf32>
    %37 = vector.multi_reduction <maximumf>, %36, %cst_25 [2] : vector<4x16x16xf32> to vector<4x16xf32>
    %38 = vector.shape_cast %37 : vector<4x16xf32> to vector<4x16x1xf32>
    %39 = vector.broadcast %38 : vector<4x16x1xf32> to vector<4x16x16xf32>
    %40 = arith.subf %36, %39 : vector<4x16x16xf32>
    %41 = math.exp %40 : vector<4x16x16xf32>
    %cst_26 = arith.constant dense<0.000000e+00> : vector<4x16xf32>
    %42 = vector.multi_reduction <add>, %41, %cst_26 [2] : vector<4x16x16xf32> to vector<4x16xf32>
    %43 = vector.shape_cast %42 : vector<4x16xf32> to vector<4x16x1xf32>
    %44 = tpu.reciprocal %43 {approx = true} : vector<4x16x1xf32> -> vector<4x16x1xf32>
    %45 = vector.broadcast %44 : vector<4x16x1xf32> to vector<4x16x16xf32>
    %46 = arith.mulf %41, %45 : vector<4x16x16xf32>
    "tpu.trace_start"() <{level = 10 : i32, message = "bqk,bkd->bqd"}> : () -> ()
    %cst_27 = arith.constant dense<0.000000e+00> : vector<4x16x16xf32>
    %47 = tpu.matmul %46, %31, %cst_27 {dimension_numbers = #tpu.dot_dimension_numbers<[2], [1], [1], [2], [0, 0, 0, 1, 1, 2], [0], [0]>} : vector<4x16x16xf32>, vector<4x16x16xf32>, vector<4x16x16xf32> -> vector<4x16x16xf32>
    "tpu.trace_stop"() : () -> ()
    %48 = vector.shape_cast %47 : vector<4x16x16xf32> to vector<64x16xf32>
    %c0_28 = arith.constant 0 : index
    %c0_29 = arith.constant 0 : index
    %c0_30 = arith.constant 0 : index
    %49 = vector.load %arg10[%c0_28, %c0_29, %c0_30] : memref<4x16x64xf32, #tpu.memory_space<vmem>>, vector<1x16x64xf32>
    %50 = vector.shape_cast %49 : vector<1x16x64xf32> to vector<16x64xf32>
    %cst_31 = arith.constant dense<0.000000e+00> : vector<64x64xf32>
    %51 = tpu.matmul %48, %50, %cst_31 {dimension_numbers = #tpu.dot_dimension_numbers<[1], [0], [0], [1], [0, 0, 1, 1], [], []>} : vector<64x16xf32>, vector<16x64xf32>, vector<64x64xf32> -> vector<64x64xf32>
    %52 = arith.addf %25, %51 : vector<64x64xf32>
    %53 = vector.extract_strided_slice %10 {offsets = [0, 16], sizes = [64, 16], strides = [1, 1]} : vector<64x64xf32> to vector<64x16xf32>
    %54 = vector.shape_cast %53 : vector<64x16xf32> to vector<4x16x16xf32>
    %55 = vector.extract_strided_slice %15 {offsets = [0, 16], sizes = [64, 16], strides = [1, 1]} : vector<64x64xf32> to vector<64x16xf32>
    %56 = vector.shape_cast %55 : vector<64x16xf32> to vector<4x16x16xf32>
    %57 = vector.extract_strided_slice %20 {offsets = [0, 16], sizes = [64, 16], strides = [1, 1]} : vector<64x64xf32> to vector<64x16xf32>
    %58 = vector.shape_cast %57 : vector<64x16xf32> to vector<4x16x16xf32>
    "tpu.trace_start"() <{level = 10 : i32, message = "bqd,bkd->bqk"}> : () -> ()
    %cst_32 = arith.constant dense<0.000000e+00> : vector<4x16x16xf32>
    %59 = tpu.matmul %54, %56, %cst_32 {dimension_numbers = #tpu.dot_dimension_numbers<[2], [2], [1], [1], [0, 0, 0, 1, 1, 1], [0], [0]>} : vector<4x16x16xf32>, vector<4x16x16xf32>, vector<4x16x16xf32> -> vector<4x16x16xf32>
    %cst_33 = arith.constant 0xFF800000 : f32
    "tpu.trace_stop"() : () -> ()
    %60 = vector.shape_cast %24 : vector<1x16x16xi1> to vector<1x16x16xi1>
    %61 = vector.broadcast %60 : vector<1x16x16xi1> to vector<4x16x16xi1>
    %62 = vector.broadcast %cst_33 : f32 to vector<4x16x16xf32>
    %63 = arith.select %61, %62, %59 : vector<4x16x16xi1>, vector<4x16x16xf32>
    %cst_34 = arith.constant dense<0xFF800000> : vector<4x16xf32>
    %64 = vector.multi_reduction <maximumf>, %63, %cst_34 [2] : vector<4x16x16xf32> to vector<4x16xf32>
    %65 = vector.shape_cast %64 : vector<4x16xf32> to vector<4x16x1xf32>
    %66 = vector.broadcast %65 : vector<4x16x1xf32> to vector<4x16x16xf32>
    %67 = arith.subf %63, %66 : vector<4x16x16xf32>
    %68 = math.exp %67 : vector<4x16x16xf32>
    %cst_35 = arith.constant dense<0.000000e+00> : vector<4x16xf32>
    %69 = vector.multi_reduction <add>, %68, %cst_35 [2] : vector<4x16x16xf32> to vector<4x16xf32>
    %70 = vector.shape_cast %69 : vector<4x16xf32> to vector<4x16x1xf32>
    %71 = tpu.reciprocal %70 {approx = true} : vector<4x16x1xf32> -> vector<4x16x1xf32>
    %72 = vector.broadcast %71 : vector<4x16x1xf32> to vector<4x16x16xf32>
    %73 = arith.mulf %68, %72 : vector<4x16x16xf32>
    "tpu.trace_start"() <{level = 10 : i32, message = "bqk,bkd->bqd"}> : () -> ()
    %cst_36 = arith.constant dense<0.000000e+00> : vector<4x16x16xf32>
    %74 = tpu.matmul %73, %58, %cst_36 {dimension_numbers = #tpu.dot_dimension_numbers<[2], [1], [1], [2], [0, 0, 0, 1, 1, 2], [0], [0]>} : vector<4x16x16xf32>, vector<4x16x16xf32>, vector<4x16x16xf32> -> vector<4x16x16xf32>
    "tpu.trace_stop"() : () -> ()
    %75 = vector.shape_cast %74 : vector<4x16x16xf32> to vector<64x16xf32>
    %c1 = arith.constant 1 : index
    %c0_37 = arith.constant 0 : index
    %c0_38 = arith.constant 0 : index
    %76 = vector.load %arg10[%c1, %c0_37, %c0_38] : memref<4x16x64xf32, #tpu.memory_space<vmem>>, vector<1x16x64xf32>
    %77 = vector.shape_cast %76 : vector<1x16x64xf32> to vector<16x64xf32>
    %cst_39 = arith.constant dense<0.000000e+00> : vector<64x64xf32>
    %78 = tpu.matmul %75, %77, %cst_39 {dimension_numbers = #tpu.dot_dimension_numbers<[1], [0], [0], [1], [0, 0, 1, 1], [], []>} : vector<64x16xf32>, vector<16x64xf32>, vector<64x64xf32> -> vector<64x64xf32>
    %79 = arith.addf %52, %78 : vector<64x64xf32>
    %80 = vector.extract_strided_slice %10 {offsets = [0, 32], sizes = [64, 16], strides = [1, 1]} : vector<64x64xf32> to vector<64x16xf32>
    %81 = vector.shape_cast %80 : vector<64x16xf32> to vector<4x16x16xf32>
    %82 = vector.extract_strided_slice %15 {offsets = [0, 32], sizes = [64, 16], strides = [1, 1]} : vector<64x64xf32> to vector<64x16xf32>
    %83 = vector.shape_cast %82 : vector<64x16xf32> to vector<4x16x16xf32>
    %84 = vector.extract_strided_slice %20 {offsets = [0, 32], sizes = [64, 16], strides = [1, 1]} : vector<64x64xf32> to vector<64x16xf32>
    %85 = vector.shape_cast %84 : vector<64x16xf32> to vector<4x16x16xf32>
    "tpu.trace_start"() <{level = 10 : i32, message = "bqd,bkd->bqk"}> : () -> ()
    %cst_40 = arith.constant dense<0.000000e+00> : vector<4x16x16xf32>
    %86 = tpu.matmul %81, %83, %cst_40 {dimension_numbers = #tpu.dot_dimension_numbers<[2], [2], [1], [1], [0, 0, 0, 1, 1, 1], [0], [0]>} : vector<4x16x16xf32>, vector<4x16x16xf32>, vector<4x16x16xf32> -> vector<4x16x16xf32>
    %cst_41 = arith.constant 0xFF800000 : f32
    "tpu.trace_stop"() : () -> ()
    %87 = vector.shape_cast %24 : vector<1x16x16xi1> to vector<1x16x16xi1>
    %88 = vector.broadcast %87 : vector<1x16x16xi1> to vector<4x16x16xi1>
    %89 = vector.broadcast %cst_41 : f32 to vector<4x16x16xf32>
    %90 = arith.select %88, %89, %86 : vector<4x16x16xi1>, vector<4x16x16xf32>
    %cst_42 = arith.constant dense<0xFF800000> : vector<4x16xf32>
    %91 = vector.multi_reduction <maximumf>, %90, %cst_42 [2] : vector<4x16x16xf32> to vector<4x16xf32>
    %92 = vector.shape_cast %91 : vector<4x16xf32> to vector<4x16x1xf32>
    %93 = vector.broadcast %92 : vector<4x16x1xf32> to vector<4x16x16xf32>
    %94 = arith.subf %90, %93 : vector<4x16x16xf32>
    %95 = math.exp %94 : vector<4x16x16xf32>
    %cst_43 = arith.constant dense<0.000000e+00> : vector<4x16xf32>
    %96 = vector.multi_reduction <add>, %95, %cst_43 [2] : vector<4x16x16xf32> to vector<4x16xf32>
    %97 = vector.shape_cast %96 : vector<4x16xf32> to vector<4x16x1xf32>
    %98 = tpu.reciprocal %97 {approx = true} : vector<4x16x1xf32> -> vector<4x16x1xf32>
    %99 = vector.broadcast %98 : vector<4x16x1xf32> to vector<4x16x16xf32>
    %100 = arith.mulf %95, %99 : vector<4x16x16xf32>
    "tpu.trace_start"() <{level = 10 : i32, message = "bqk,bkd->bqd"}> : () -> ()
    %cst_44 = arith.constant dense<0.000000e+00> : vector<4x16x16xf32>
    %101 = tpu.matmul %100, %85, %cst_44 {dimension_numbers = #tpu.dot_dimension_numbers<[2], [1], [1], [2], [0, 0, 0, 1, 1, 2], [0], [0]>} : vector<4x16x16xf32>, vector<4x16x16xf32>, vector<4x16x16xf32> -> vector<4x16x16xf32>
    "tpu.trace_stop"() : () -> ()
    %102 = vector.shape_cast %101 : vector<4x16x16xf32> to vector<64x16xf32>
    %c2 = arith.constant 2 : index
    %c0_45 = arith.constant 0 : index
    %c0_46 = arith.constant 0 : index
    %103 = vector.load %arg10[%c2, %c0_45, %c0_46] : memref<4x16x64xf32, #tpu.memory_space<vmem>>, vector<1x16x64xf32>
    %104 = vector.shape_cast %103 : vector<1x16x64xf32> to vector<16x64xf32>
    %cst_47 = arith.constant dense<0.000000e+00> : vector<64x64xf32>
    %105 = tpu.matmul %102, %104, %cst_47 {dimension_numbers = #tpu.dot_dimension_numbers<[1], [0], [0], [1], [0, 0, 1, 1], [], []>} : vector<64x16xf32>, vector<16x64xf32>, vector<64x64xf32> -> vector<64x64xf32>
    %106 = arith.addf %79, %105 : vector<64x64xf32>
    %107 = vector.extract_strided_slice %10 {offsets = [0, 48], sizes = [64, 16], strides = [1, 1]} : vector<64x64xf32> to vector<64x16xf32>
    %108 = vector.shape_cast %107 : vector<64x16xf32> to vector<4x16x16xf32>
    %109 = vector.extract_strided_slice %15 {offsets = [0, 48], sizes = [64, 16], strides = [1, 1]} : vector<64x64xf32> to vector<64x16xf32>
    %110 = vector.shape_cast %109 : vector<64x16xf32> to vector<4x16x16xf32>
    %111 = vector.extract_strided_slice %20 {offsets = [0, 48], sizes = [64, 16], strides = [1, 1]} : vector<64x64xf32> to vector<64x16xf32>
    %112 = vector.shape_cast %111 : vector<64x16xf32> to vector<4x16x16xf32>
    "tpu.trace_start"() <{level = 10 : i32, message = "bqd,bkd->bqk"}> : () -> ()
    %cst_48 = arith.constant dense<0.000000e+00> : vector<4x16x16xf32>
    %113 = tpu.matmul %108, %110, %cst_48 {dimension_numbers = #tpu.dot_dimension_numbers<[2], [2], [1], [1], [0, 0, 0, 1, 1, 1], [0], [0]>} : vector<4x16x16xf32>, vector<4x16x16xf32>, vector<4x16x16xf32> -> vector<4x16x16xf32>
    %cst_49 = arith.constant 0xFF800000 : f32
    "tpu.trace_stop"() : () -> ()
    %114 = vector.shape_cast %24 : vector<1x16x16xi1> to vector<1x16x16xi1>
    %115 = vector.broadcast %114 : vector<1x16x16xi1> to vector<4x16x16xi1>
    %116 = vector.broadcast %cst_49 : f32 to vector<4x16x16xf32>
    %117 = arith.select %115, %116, %113 : vector<4x16x16xi1>, vector<4x16x16xf32>
    %cst_50 = arith.constant dense<0xFF800000> : vector<4x16xf32>
    %118 = vector.multi_reduction <maximumf>, %117, %cst_50 [2] : vector<4x16x16xf32> to vector<4x16xf32>
    %119 = vector.shape_cast %118 : vector<4x16xf32> to vector<4x16x1xf32>
    %120 = vector.broadcast %119 : vector<4x16x1xf32> to vector<4x16x16xf32>
    %121 = arith.subf %117, %120 : vector<4x16x16xf32>
    %122 = math.exp %121 : vector<4x16x16xf32>
    %cst_51 = arith.constant dense<0.000000e+00> : vector<4x16xf32>
    %123 = vector.multi_reduction <add>, %122, %cst_51 [2] : vector<4x16x16xf32> to vector<4x16xf32>
    %124 = vector.shape_cast %123 : vector<4x16xf32> to vector<4x16x1xf32>
    %125 = tpu.reciprocal %124 {approx = true} : vector<4x16x1xf32> -> vector<4x16x1xf32>
    %126 = vector.broadcast %125 : vector<4x16x1xf32> to vector<4x16x16xf32>
    %127 = arith.mulf %122, %126 : vector<4x16x16xf32>
    "tpu.trace_start"() <{level = 10 : i32, message = "bqk,bkd->bqd"}> : () -> ()
    %cst_52 = arith.constant dense<0.000000e+00> : vector<4x16x16xf32>
    %128 = tpu.matmul %127, %112, %cst_52 {dimension_numbers = #tpu.dot_dimension_numbers<[2], [1], [1], [2], [0, 0, 0, 1, 1, 2], [0], [0]>} : vector<4x16x16xf32>, vector<4x16x16xf32>, vector<4x16x16xf32> -> vector<4x16x16xf32>
    "tpu.trace_stop"() : () -> ()
    %129 = vector.shape_cast %128 : vector<4x16x16xf32> to vector<64x16xf32>
    %c3 = arith.constant 3 : index
    %c0_53 = arith.constant 0 : index
    %c0_54 = arith.constant 0 : index
    %130 = vector.load %arg10[%c3, %c0_53, %c0_54] : memref<4x16x64xf32, #tpu.memory_space<vmem>>, vector<1x16x64xf32>
    %131 = vector.shape_cast %130 : vector<1x16x64xf32> to vector<16x64xf32>
    %cst_55 = arith.constant dense<0.000000e+00> : vector<64x64xf32>
    %132 = tpu.matmul %129, %131, %cst_55 {dimension_numbers = #tpu.dot_dimension_numbers<[1], [0], [0], [1], [0, 0, 1, 1], [], []>} : vector<64x16xf32>, vector<16x64xf32>, vector<64x64xf32> -> vector<64x64xf32>
    %133 = arith.addf %106, %132 : vector<64x64xf32>
    %c0_56 = arith.constant 0 : index
    %c0_57 = arith.constant 0 : index
    %134 = vector.load %arg11[%c0_56, %c0_57] : memref<1x64xf32, #tpu.memory_space<vmem>>, vector<1x64xf32>
    %135 = vector.broadcast %134 : vector<1x64xf32> to vector<64x64xf32>
    %136 = arith.addf %133, %135 : vector<64x64xf32>
    %137 = arith.addf %1, %136 : vector<64x64xf32>
    %cst_58 = arith.constant dense<0.000000e+00> : vector<64xf32>
    %138 = vector.multi_reduction <add>, %137, %cst_58 [1] : vector<64x64xf32> to vector<64xf32>
    %139 = vector.shape_cast %138 : vector<64xf32> to vector<64x1xf32>
    %cst_59 = arith.constant 6.400000e+01 : f32
    %140 = vector.broadcast %cst_59 : f32 to vector<64x1xf32>
    %141 = arith.divf %139, %140 : vector<64x1xf32>
    %142 = vector.broadcast %141 : vector<64x1xf32> to vector<64x64xf32>
    %143 = arith.subf %137, %142 : vector<64x64xf32>
    %144 = arith.mulf %143, %143 : vector<64x64xf32>
    %cst_60 = arith.constant dense<0.000000e+00> : vector<64xf32>
    %145 = vector.multi_reduction <add>, %144, %cst_60 [1] : vector<64x64xf32> to vector<64xf32>
    %146 = vector.shape_cast %145 : vector<64xf32> to vector<64x1xf32>
    %cst_61 = arith.constant 6.400000e+01 : f32
    %147 = vector.broadcast %cst_61 : f32 to vector<64x1xf32>
    %148 = arith.divf %146, %147 : vector<64x1xf32>
    %149 = vector.broadcast %141 : vector<64x1xf32> to vector<64x64xf32>
    %150 = arith.subf %137, %149 : vector<64x64xf32>
    %cst_62 = arith.constant 9.99999974E-6 : f32
    %151 = vector.broadcast %cst_62 : f32 to vector<64x1xf32>
    %152 = arith.addf %148, %151 : vector<64x1xf32>
    %153 = math.rsqrt %152 : vector<64x1xf32>
    %154 = vector.broadcast %153 : vector<64x1xf32> to vector<64x64xf32>
    %155 = arith.mulf %150, %154 : vector<64x64xf32>
    %c0_63 = arith.constant 0 : index
    %c0_64 = arith.constant 0 : index
    %156 = vector.load %arg12[%c0_63, %c0_64] : memref<1x64xf32, #tpu.memory_space<vmem>>, vector<1x64xf32>
    %157 = vector.broadcast %156 : vector<1x64xf32> to vector<64x64xf32>
    %158 = arith.mulf %155, %157 : vector<64x64xf32>
    %c0_65 = arith.constant 0 : index
    %c0_66 = arith.constant 0 : index
    %159 = vector.load %arg13[%c0_65, %c0_66] : memref<1x64xf32, #tpu.memory_space<vmem>>, vector<1x64xf32>
    %160 = vector.broadcast %159 : vector<1x64xf32> to vector<64x64xf32>
    %161 = arith.addf %158, %160 : vector<64x64xf32>
    %c0_67 = arith.constant 0 : index
    %c0_68 = arith.constant 0 : index
    %162 = vector.load %arg14[%c0_67, %c0_68] : memref<64x64xf32, #tpu.memory_space<vmem>>, vector<64x64xf32>
    %cst_69 = arith.constant dense<0.000000e+00> : vector<64x64xf32>
    %163 = tpu.matmul %161, %162, %cst_69 {dimension_numbers = #tpu.dot_dimension_numbers<[1], [0], [0], [1], [0, 0, 1, 1], [], []>} : vector<64x64xf32>, vector<64x64xf32>, vector<64x64xf32> -> vector<64x64xf32>
    %c0_70 = arith.constant 0 : index
    %c0_71 = arith.constant 0 : index
    %164 = vector.load %arg15[%c0_70, %c0_71] : memref<1x64xf32, #tpu.memory_space<vmem>>, vector<1x64xf32>
    %165 = vector.broadcast %164 : vector<1x64xf32> to vector<64x64xf32>
    %166 = arith.addf %163, %165 : vector<64x64xf32>
    %cst_72 = arith.constant 0.000000e+00 : f32
    %167 = vector.broadcast %cst_72 : f32 to vector<64x64xf32>
    %168 = arith.maximumf %166, %167 : vector<64x64xf32>
    %c0_73 = arith.constant 0 : index
    %c0_74 = arith.constant 0 : index
    %169 = vector.load %arg16[%c0_73, %c0_74] : memref<64x64xf32, #tpu.memory_space<vmem>>, vector<64x64xf32>
    %cst_75 = arith.constant dense<0.000000e+00> : vector<64x64xf32>
    %170 = tpu.matmul %168, %169, %cst_75 {dimension_numbers = #tpu.dot_dimension_numbers<[1], [0], [0], [1], [0, 0, 1, 1], [], []>} : vector<64x64xf32>, vector<64x64xf32>, vector<64x64xf32> -> vector<64x64xf32>
    %c0_76 = arith.constant 0 : index
    %c0_77 = arith.constant 0 : index
    %171 = vector.load %arg17[%c0_76, %c0_77] : memref<1x64xf32, #tpu.memory_space<vmem>>, vector<1x64xf32>
    %172 = vector.broadcast %171 : vector<1x64xf32> to vector<64x64xf32>
    %173 = arith.addf %170, %172 : vector<64x64xf32>
    %174 = arith.addf %161, %173 : vector<64x64xf32>
    %cst_78 = arith.constant dense<0.000000e+00> : vector<64xf32>
    %175 = vector.multi_reduction <add>, %174, %cst_78 [1] : vector<64x64xf32> to vector<64xf32>
    %176 = vector.shape_cast %175 : vector<64xf32> to vector<64x1xf32>
    %cst_79 = arith.constant 6.400000e+01 : f32
    %177 = vector.broadcast %cst_79 : f32 to vector<64x1xf32>
    %178 = arith.divf %176, %177 : vector<64x1xf32>
    %179 = vector.broadcast %178 : vector<64x1xf32> to vector<64x64xf32>
    %180 = arith.subf %174, %179 : vector<64x64xf32>
    %181 = arith.mulf %180, %180 : vector<64x64xf32>
    %cst_80 = arith.constant dense<0.000000e+00> : vector<64xf32>
    %182 = vector.multi_reduction <add>, %181, %cst_80 [1] : vector<64x64xf32> to vector<64xf32>
    %183 = vector.shape_cast %182 : vector<64xf32> to vector<64x1xf32>
    %cst_81 = arith.constant 6.400000e+01 : f32
    %184 = vector.broadcast %cst_81 : f32 to vector<64x1xf32>
    %185 = arith.divf %183, %184 : vector<64x1xf32>
    %186 = vector.broadcast %178 : vector<64x1xf32> to vector<64x64xf32>
    %187 = arith.subf %174, %186 : vector<64x64xf32>
    %cst_82 = arith.constant 9.99999974E-6 : f32
    %188 = vector.broadcast %cst_82 : f32 to vector<64x1xf32>
    %189 = arith.addf %185, %188 : vector<64x1xf32>
    %190 = math.rsqrt %189 : vector<64x1xf32>
    %191 = vector.broadcast %190 : vector<64x1xf32> to vector<64x64xf32>
    %192 = arith.mulf %187, %191 : vector<64x64xf32>
    %c0_83 = arith.constant 0 : index
    %c0_84 = arith.constant 0 : index
    %193 = vector.load %arg18[%c0_83, %c0_84] : memref<1x64xf32, #tpu.memory_space<vmem>>, vector<1x64xf32>
    %194 = vector.broadcast %193 : vector<1x64xf32> to vector<64x64xf32>
    %195 = arith.mulf %192, %194 : vector<64x64xf32>
    %c0_85 = arith.constant 0 : index
    %c0_86 = arith.constant 0 : index
    %196 = vector.load %arg19[%c0_85, %c0_86] : memref<1x64xf32, #tpu.memory_space<vmem>>, vector<1x64xf32>
    %197 = vector.broadcast %196 : vector<1x64xf32> to vector<64x64xf32>
    %198 = arith.addf %195, %197 : vector<64x64xf32>
    %199 = vector.shape_cast %198 : vector<64x64xf32> to vector<4x16x64xf32>
    %c0_87 = arith.constant 0 : index
    %c0_88 = arith.constant 0 : index
    %c0_89 = arith.constant 0 : index
    %200 = vector.load %arg20[%c0_87, %c0_88, %c0_89] : memref<4x16x64xf32, #tpu.memory_space<vmem>>, vector<4x16x64xf32>
    tpu.vector_store %arg20[%c0_87, %c0_88, %c0_89], %199 {strides = array<i32>} : memref<4x16x64xf32, #tpu.memory_space<vmem>>, vector<4x16x64xf32>,
    return
  }
  func.func @transform_0(%arg0: i32) -> (i32, i32, i32) {
    %c0_i32 = arith.constant 0 : i32
    %c0_i32_0 = arith.constant 0 : i32
    %c0_i32_1 = arith.constant 0 : i32
    return %arg0, %c0_i32, %c0_i32_0 : i32, i32, i32
  }
  func.func @transform_1(%arg0: i32) -> (i32, i32, i32) {
    %c0_i32 = arith.constant 0 : i32
    %c0_i32_0 = arith.constant 0 : i32
    %c0_i32_1 = arith.constant 0 : i32
    return %arg0, %c0_i32, %c0_i32_0 : i32, i32, i32
  }
  func.func @transform_2(%arg0: i32) -> (i32, i32, i32) {
    %c0_i32 = arith.constant 0 : i32
    %c0_i32_0 = arith.constant 0 : i32
    %c0_i32_1 = arith.constant 0 : i32
    return %arg0, %c0_i32, %c0_i32_0 : i32, i32, i32
  }
  func.func @transform_3(%arg0: i32) -> (i32, i32) {
    %c0_i32 = arith.constant 0 : i32
    %c0_i32_0 = arith.constant 0 : i32
    %c0_i32_1 = arith.constant 0 : i32
    return %c0_i32, %c0_i32_0 : i32, i32
  }
  func.func @transform_4(%arg0: i32) -> (i32, i32) {
    %c0_i32 = arith.constant 0 : i32
    %c0_i32_0 = arith.constant 0 : i32
    %c0_i32_1 = arith.constant 0 : i32
    return %c0_i32, %c0_i32_0 : i32, i32
  }
  func.func @transform_5(%arg0: i32) -> (i32, i32) {
    %c0_i32 = arith.constant 0 : i32
    %c0_i32_0 = arith.constant 0 : i32
    %c0_i32_1 = arith.constant 0 : i32
    return %c0_i32, %c0_i32_0 : i32, i32
  }
  func.func @transform_6(%arg0: i32) -> (i32, i32) {
    %c0_i32 = arith.constant 0 : i32
    %c0_i32_0 = arith.constant 0 : i32
    %c0_i32_1 = arith.constant 0 : i32
    return %c0_i32, %c0_i32_0 : i32, i32
  }
  func.func @transform_7(%arg0: i32) -> (i32, i32) {
    %c0_i32 = arith.constant 0 : i32
    %c0_i32_0 = arith.constant 0 : i32
    %c0_i32_1 = arith.constant 0 : i32
    return %c0_i32, %c0_i32_0 : i32, i32
  }
  func.func @transform_8(%arg0: i32) -> (i32, i32) {
    %c0_i32 = arith.constant 0 : i32
    %c0_i32_0 = arith.constant 0 : i32
    %c0_i32_1 = arith.constant 0 : i32
    return %c0_i32, %c0_i32_0 : i32, i32
  }
  func.func @transform_9(%arg0: i32) -> (i32, i32, i32) {
    %c0_i32 = arith.constant 0 : i32
    %c0_i32_0 = arith.constant 0 : i32
    %c0_i32_1 = arith.constant 0 : i32
    %c0_i32_2 = arith.constant 0 : i32
    return %c0_i32, %c0_i32_0, %c0_i32_1 : i32, i32, i32
  }
  func.func @transform_10(%arg0: i32) -> (i32, i32) {
    %c0_i32 = arith.constant 0 : i32
    %c0_i32_0 = arith.constant 0 : i32
    %c0_i32_1 = arith.constant 0 : i32
    return %c0_i32, %c0_i32_0 : i32, i32
  }
  func.func @transform_11(%arg0: i32) -> (i32, i32) {
    %c0_i32 = arith.constant 0 : i32
    %c0_i32_0 = arith.constant 0 : i32
    %c0_i32_1 = arith.constant 0 : i32
    return %c0_i32, %c0_i32_0 : i32, i32
  }
  func.func @transform_12(%arg0: i32) -> (i32, i32) {
    %c0_i32 = arith.constant 0 : i32
    %c0_i32_0 = arith.constant 0 : i32
    %c0_i32_1 = arith.constant 0 : i32
    return %c0_i32, %c0_i32_0 : i32, i32
  }
  func.func @transform_13(%arg0: i32) -> (i32, i32) {
    %c0_i32 = arith.constant 0 : i32
    %c0_i32_0 = arith.constant 0 : i32
    %c0_i32_1 = arith.constant 0 : i32
    return %c0_i32, %c0_i32_0 : i32, i32
  }
  func.func @transform_14(%arg0: i32) -> (i32, i32) {
    %c0_i32 = arith.constant 0 : i32
    %c0_i32_0 = arith.constant 0 : i32
    %c0_i32_1 = arith.constant 0 : i32
    return %c0_i32, %c0_i32_0 : i32, i32
  }
  func.func @transform_15(%arg0: i32) -> (i32, i32) {
    %c0_i32 = arith.constant 0 : i32
    %c0_i32_0 = arith.constant 0 : i32
    %c0_i32_1 = arith.constant 0 : i32
    return %c0_i32, %c0_i32_0 : i32, i32
  }
  func.func @transform_16(%arg0: i32) -> (i32, i32) {
    %c0_i32 = arith.constant 0 : i32
    %c0_i32_0 = arith.constant 0 : i32
    %c0_i32_1 = arith.constant 0 : i32
    return %c0_i32, %c0_i32_0 : i32, i32
  }
  func.func @transform_17(%arg0: i32) -> (i32, i32) {
    %c0_i32 = arith.constant 0 : i32
    %c0_i32_0 = arith.constant 0 : i32
    %c0_i32_1 = arith.constant 0 : i32
    return %c0_i32, %c0_i32_0 : i32, i32
  }
  func.func @transform_18(%arg0: i32) -> (i32, i32) {
    %c0_i32 = arith.constant 0 : i32
    %c0_i32_0 = arith.constant 0 : i32
    %c0_i32_1 = arith.constant 0 : i32
    return %c0_i32, %c0_i32_0 : i32, i32
  }
  func.func @transform_19(%arg0: i32) -> (i32, i32, i32) {
    %c0_i32 = arith.constant 0 : i32
    %c0_i32_0 = arith.constant 0 : i32
    %c0_i32_1 = arith.constant 0 : i32
    return %arg0, %c0_i32, %c0_i32_0 : i32, i32, i32
  }
}

</mosaic_0001>

<bundles_post_ra>
// kernel: tpu_custom_call.1
= control target key start
LH: loop header
LB: loop body
LE: loop exit
PB: predicated region body
PF: predicated region fallthrough
CT: control target
= control target key end

     0   :  { %s7850_s0 = inlined_call_operand.hbm [shape: f32[4,16,64], index: 0, kind: input, shape index: {}]   ;;  %s7851_s1 = inlined_call_operand.hbm [shape: f32[4,16,64], index: 1, kind: input, shape index: {}]   ;;  %s7852_s2 = inlined_call_operand.hbm [shape: f32[4,16,64], index: 2, kind: input, shape index: {}]   ;;  %s7853_s3 = inlined_call_operand.hbm [shape: f32[64,64], index: 3, kind: input, shape index: {}]   ;;  %s7854_s4 = inlined_call_operand.vmem [shape: f32[1,64], index: 4, kind: input, shape index: {}]   ;;  %s7855_s5 = inlined_call_operand.hbm [shape: f32[64,64], index: 5, kind: input, shape index: {}]   ;;  %s7856_s6 = inlined_call_operand.vmem [shape: f32[1,64], index: 6, kind: input, shape index: {}]   ;;  %s7857_s7 = inlined_call_operand.hbm [shape: f32[64,64], index: 7, kind: input, shape index: {}]   ;;  %s7858_s8 = inlined_call_operand.vmem [shape: f32[1,64], index: 8, kind: input, shape index: {}]   ;;  %s7859_s9 = inlined_call_operand.hbm [shape: f32[4,16,64], index: 9, kind: input, shape index: {}]   ;;  %s7860_s10 = inlined_call_operand.vmem [shape: f32[1,64], index: 10, kind: input, shape index: {}]   ;;  %s7861_s11 = inlined_call_operand.vmem [shape: f32[1,64], index: 11, kind: input, shape index: {}]   ;;  %s7862_s12 = inlined_call_operand.vmem [shape: f32[1,64], index: 12, kind: input, shape index: {}]   ;;  %s7863_s13 = inlined_call_operand.hbm [shape: f32[64,64], index: 13, kind: input, shape index: {}]   ;;  %s7864_s14 = inlined_call_operand.vmem [shape: f32[1,64], index: 14, kind: input, shape index: {}]   ;;  %s7865_s15 = inlined_call_operand.hbm [shape: f32[64,64], index: 15, kind: input, shape index: {}]   ;;  %s7866_s16 = inlined_call_operand.vmem [shape: f32[1,64], index: 16, kind: input, shape index: {}]   ;;  %s7867_s17 = inlined_call_operand.vmem [shape: f32[1,64], index: 17, kind: input, shape index: {}]   ;;  %s7868_s18 = inlined_call_operand.vmem [shape: f32[1,64], index: 18, kind: input, shape index: {}]   ;;  %s7869_s19 = inlined_call_operand.hbm [shape: f32[4,16,64], index: 19, kind: output, shape index: {}]  }
   0x1   :  { %7875 = sst [smem:[#allocation24_spill]] %s7850_s0 }
   0x2   :  { %7876 = sst [smem:[#allocation25_spill]] %s7851_s1 }
   0x3   :  { %7877 = sst [smem:[#allocation26_spill]] %s7852_s2 }
   0x4   :  { %7878 = sst [smem:[#allocation27_spill]] %s7853_s3 }
   0x5   :  { %7879 = sst [smem:[#allocation28_spill]] %s7868_s18 }
   0x6   :  { %7880 = sst [smem:[#allocation29_spill]] %s7869_s19 }
   0x7   :  { %24 = vsyncpa [#allocation3], 0 }
   0x8   :  { %25 = vsyncpa [#allocation6], 0 }
   0x9   :  { %26 = vsyncpa [#allocation9], 0 }
   0xa   :  { %27 = vsyncpa [#allocation12], 0 }
   0xb   :  { %28 = vsyncpa [#allocation15], 0 }
   0xc   :  { %29 = vsyncpa [#allocation4], 0  ;;  %s6691_s0 = smov [#allocation5]   ;;  %s6692_s20 = smov [#allocation8]  }
   0xd   :  { %s47_s30 = sshll.u32 %s6691_s0, 4  ;;  %s71_s21 = sshll.u32 %s6692_s20, 4  ;;  %s48_s30 = int_to_ptr.vmem [resolvable:$true] %s47_s30  ;;  %s6806_s21 = int_to_ptr.vmem [resolvable:$true] %s71_s21 }
   0xe   :  { %s7881_s2 = sld [smem:[#allocation25_spill]] }
  0x14   :  { %s6459_s23 = scalar_lea.hbm %s7881_s2, 1024 }
  0x15   :  { %p6460_p0 = scmp.ne.s32.totalorder %s7881_s2, %s6459_s23  ;;  %p6463_p1 = scmp.lt.u32.totalorder %s6459_s23, %s7881_s2 }
  0x17   :  { %p6465_p2 = pnand %p6463_p1, %p6460_p0 }
  0x19   :  { %6468 = shalt.err (!%p6465_p2)
}
  0x1a   :  { %s6469_s27 = scalar_lea.vmem %s48_s30, 1024  ;;  %p6474_p4 = scmp.lt.s32.totalorder %s48_s30, %s48_s30 }
  0x1b   :  { %p6470_p3 = scmp.ne.s32.totalorder %s48_s30, %s6469_s27  ;;  %p6475_p5 = scmp.lt.s32.totalorder %s6469_s27, %s6469_s27 }
  0x1d   :  { %p6476_p6 = por %p6475_p5, %p6474_p4 }
  0x1f   :  { %p6477_p7 = pnand %p6476_p6, %p6470_p3 }
  0x21   :  { %6480 = shalt.err (!%p6477_p7)
}
  0x22   :  { %s6693_s28 = smov 128   ;;  %s6694_s29 = smov 8  }
  0x23   :  { %53 = dma.hbm_to_vmem [thread:$0]  %s7881_s2, 1024, %s48_s30, [#allocation6], %s6693_s28, %s6693_s28, %s6694_s29  }
  0x24   :  { %s7882_s23 = sld [smem:[#allocation27_spill]] }
  0x2a   :  { %s6481_s24 = scalar_lea.hbm %s7882_s23, 1024 }
  0x2b   :  { %p6482_p8 = scmp.ne.s32.totalorder %s7882_s23, %s6481_s24  ;;  %p6485_p9 = scmp.lt.u32.totalorder %s6481_s24, %s7882_s23 }
  0x2d   :  { %p6487_p10 = pnand %p6485_p9, %p6482_p8 }
  0x2f   :  { %6490 = shalt.err (!%p6487_p10)
}
  0x30   :  { %s6491_s19 = scalar_lea.vmem %s6806_s21, 1024  ;;  %p6496_p12 = scmp.lt.s32.totalorder %s6806_s21, %s6806_s21 }
  0x31   :  { %p6492_p11 = scmp.ne.s32.totalorder %s6806_s21, %s6491_s19  ;;  %p6497_p13 = scmp.lt.s32.totalorder %s6491_s19, %s6491_s19 }
  0x33   :  { %p6498_p0 = por %p6497_p13, %p6496_p12 }
  0x35   :  { %p6499_p1 = pnand %p6498_p0, %p6492_p11 }
  0x37   :  { %6502 = shalt.err (!%p6499_p1)
}
  0x38   :  { %77 = dma.hbm_to_vmem [thread:$0]  %s7882_s23, 1024, %s6806_s21, [#allocation9], %s6693_s28, %s6693_s28, %s6694_s29  }
  0x39   :  { %s6695_s0 = smov [#allocation11]   ;;  %s6696_s1 = smov [#allocation14]  }
  0x3a   :  { %s99_s20 = sshll.u32 %s6695_s0, 4  ;;  %s131_s22 = sshll.u32 %s6696_s1, 4  ;;  %s100_s20 = int_to_ptr.vmem [resolvable:$true] %s99_s20  ;;  %s6843_s22 = int_to_ptr.vmem [resolvable:$true] %s131_s22 }
  0x3b   :  { %s6503_s25 = scalar_lea.hbm %s7857_s7, 1024 }
  0x3c   :  { %p6504_p2 = scmp.ne.s32.totalorder %s7857_s7, %s6503_s25  ;;  %p6507_p3 = scmp.lt.u32.totalorder %s6503_s25, %s7857_s7 }
  0x3e   :  { %p6509_p4 = pnand %p6507_p3, %p6504_p2 }
  0x40   :  { %6512 = shalt.err (!%p6509_p4)
}
  0x41   :  { %s6513_s21 = scalar_lea.vmem %s100_s20, 1024  ;;  %p6518_p6 = scmp.lt.s32.totalorder %s100_s20, %s100_s20 }
  0x42   :  { %p6514_p5 = scmp.ne.s32.totalorder %s100_s20, %s6513_s21  ;;  %p6519_p7 = scmp.lt.s32.totalorder %s6513_s21, %s6513_s21 }
  0x44   :  { %p6520_p8 = por %p6519_p7, %p6518_p6 }
  0x46   :  { %p6521_p9 = pnand %p6520_p8, %p6514_p5 }
  0x48   :  { %6524 = shalt.err (!%p6521_p9)
}
  0x49   :  { %105 = dma.hbm_to_vmem [thread:$0]  %s7857_s7, 1024, %s100_s20, [#allocation12], %s6693_s28, %s6693_s28, %s6694_s29  }
  0x4a   :  { %s6525_s18 = scalar_lea.hbm %s7863_s13, 1024 }
  0x4b   :  { %p6526_p10 = scmp.ne.s32.totalorder %s7863_s13, %s6525_s18  ;;  %p6529_p11 = scmp.lt.u32.totalorder %s6525_s18, %s7863_s13 }
  0x4d   :  { %p6531_p12 = pnand %p6529_p11, %p6526_p10 }
  0x4f   :  { %6534 = shalt.err (!%p6531_p12)
}
  0x50   :  { %s6535_s3 = scalar_lea.vmem %s6843_s22, 1024  ;;  %p6540_p0 = scmp.lt.s32.totalorder %s6843_s22, %s6843_s22 }
  0x51   :  { %p6536_p13 = scmp.ne.s32.totalorder %s6843_s22, %s6535_s3  ;;  %p6541_p1 = scmp.lt.s32.totalorder %s6535_s3, %s6535_s3 }
  0x53   :  { %p6542_p2 = por %p6541_p1, %p6540_p0 }
  0x55   :  { %p6543_p3 = pnand %p6542_p2, %p6536_p13 }
  0x57   :  { %6546 = shalt.err (!%p6543_p3)
}
  0x58   :  { %137 = dma.hbm_to_vmem [thread:$0]  %s7863_s13, 1024, %s6843_s22, [#allocation15], %s6693_s28, %s6693_s28, %s6694_s29  }
  0x59   :  { %s6697_s26 = smov [#allocation2]   ;;  %s6698_s21 = smov [#allocation7]  }
  0x5a   :  { %s35_s27 = sshll.u32 %s6697_s26, 4  ;;  %s59_s23 = sshll.u32 %s6698_s21, 4  ;;  %s36_s27 = int_to_ptr.vmem [resolvable:$true] %s35_s27  ;;  %s6880_s23 = int_to_ptr.vmem [resolvable:$true] %s59_s23 }
  0x5b   :  { %s7883_s0 = sld [smem:[#allocation24_spill]] }
  0x61   :  { %s6547_s18 = scalar_lea.hbm %s7883_s0, 1024 }
  0x62   :  { %p6548_p4 = scmp.ne.s32.totalorder %s7883_s0, %s6547_s18  ;;  %p6551_p5 = scmp.lt.u32.totalorder %s6547_s18, %s7883_s0 }
  0x64   :  { %p6553_p6 = pnand %p6551_p5, %p6548_p4 }
  0x66   :  { %6556 = shalt.err (!%p6553_p6)
}
  0x67   :  { %s6557_s13 = scalar_lea.vmem %s36_s27, 1024  ;;  %p6562_p8 = scmp.lt.s32.totalorder %s36_s27, %s36_s27 }
  0x68   :  { %p6558_p7 = scmp.ne.s32.totalorder %s36_s27, %s6557_s13  ;;  %p6563_p9 = scmp.lt.s32.totalorder %s6557_s13, %s6557_s13 }
  0x6a   :  { %p6564_p10 = por %p6563_p9, %p6562_p8 }
  0x6c   :  { %p6565_p11 = pnand %p6564_p10, %p6558_p7 }
  0x6e   :  { %6568 = shalt.err (!%p6565_p11)
}
  0x6f   :  { %41 = dma.hbm_to_vmem [thread:$0]  %s7883_s0, 1024, %s36_s27, [#allocation3], %s6693_s28, %s6693_s28, %s6694_s29  }
  0x70   :  { %s7884_s26 = sld [smem:[#allocation26_spill]] }
  0x76   :  { %s6569_s21 = scalar_lea.hbm %s7884_s26, 1024 }
  0x77   :  { %p6570_p12 = scmp.ne.s32.totalorder %s7884_s26, %s6569_s21  ;;  %p6573_p13 = scmp.lt.u32.totalorder %s6569_s21, %s7884_s26 }
  0x79   :  { %p6575_p0 = pnand %p6573_p13, %p6570_p12 }
  0x7b   :  { %6578 = shalt.err (!%p6575_p0)
}
  0x7c   :  { %s6579_s24 = scalar_lea.vmem %s6880_s23, 1024  ;;  %p6584_p2 = scmp.lt.s32.totalorder %s6880_s23, %s6880_s23 }
  0x7d   :  { %p6580_p1 = scmp.ne.s32.totalorder %s6880_s23, %s6579_s24  ;;  %p6585_p3 = scmp.lt.s32.totalorder %s6579_s24, %s6579_s24 }
  0x7f   :  { %p6586_p4 = por %p6585_p3, %p6584_p2 }
  0x81   :  { %p6587_p5 = pnand %p6586_p4, %p6580_p1 }
  0x83   :  { %6590 = shalt.err (!%p6587_p5)
}
  0x84   :  { %65 = dma.hbm_to_vmem [thread:$0]  %s7884_s26, 1024, %s6880_s23, [#allocation6], %s6693_s28, %s6693_s28, %s6694_s29  }
  0x85   :  { %s6699_s19 = smov [#allocation10]   ;;  %s6700_s13 = smov [#allocation13]  }
  0x86   :  { %s85_s25 = sshll.u32 %s6699_s19, 4  ;;  %s113_s22 = sshll.u32 %s6700_s13, 4  ;;  %s86_s25 = int_to_ptr.vmem [resolvable:$true] %s85_s25  ;;  %s6917_s22 = int_to_ptr.vmem [resolvable:$true] %s113_s22 }
  0x87   :  { %s6591_s20 = scalar_lea.hbm %s7855_s5, 1024 }
  0x88   :  { %p6592_p6 = scmp.ne.s32.totalorder %s7855_s5, %s6591_s20  ;;  %p6595_p7 = scmp.lt.u32.totalorder %s6591_s20, %s7855_s5 }
  0x8a   :  { %p6597_p8 = pnand %p6595_p7, %p6592_p6 }
  0x8c   :  { %6600 = shalt.err (!%p6597_p8)
}
  0x8d   :  { %s6601_s23 = scalar_lea.vmem %s86_s25, 1024  ;;  %p6606_p10 = scmp.lt.s32.totalorder %s86_s25, %s86_s25 }
  0x8e   :  { %p6602_p9 = scmp.ne.s32.totalorder %s86_s25, %s6601_s23  ;;  %p6607_p11 = scmp.lt.s32.totalorder %s6601_s23, %s6601_s23 }
  0x90   :  { %p6608_p12 = por %p6607_p11, %p6606_p10 }
  0x92   :  { %p6609_p13 = pnand %p6608_p12, %p6602_p9 }
  0x94   :  { %6612 = shalt.err (!%p6609_p13)
}
  0x95   :  { %91 = dma.hbm_to_vmem [thread:$0]  %s7855_s5, 1024, %s86_s25, [#allocation9], %s6693_s28, %s6693_s28, %s6694_s29  }
  0x96   :  { %s6613_s0 = scalar_lea.hbm %s7859_s9, 1024 }
  0x97   :  { %p6614_p0 = scmp.ne.s32.totalorder %s7859_s9, %s6613_s0  ;;  %p6617_p1 = scmp.lt.u32.totalorder %s6613_s0, %s7859_s9 }
  0x99   :  { %p6619_p2 = pnand %p6617_p1, %p6614_p0 }
  0x9b   :  { %6622 = shalt.err (!%p6619_p2)
}
  0x9c   :  { %s6623_s20 = scalar_lea.vmem %s6917_s22, 1024  ;;  %p6628_p4 = scmp.lt.s32.totalorder %s6917_s22, %s6917_s22 }
  0x9d   :  { %p6624_p3 = scmp.ne.s32.totalorder %s6917_s22, %s6623_s20  ;;  %p6629_p5 = scmp.lt.s32.totalorder %s6623_s20, %s6623_s20 }
  0x9f   :  { %p6630_p6 = por %p6629_p5, %p6628_p4 }
  0xa1   :  { %p6631_p7 = pnand %p6630_p6, %p6624_p3 }
  0xa3   :  { %6634 = shalt.err (!%p6631_p7)
}
  0xa4   :  { %119 = dma.hbm_to_vmem [thread:$0]  %s7859_s9, 1024, %s6917_s22, [#allocation12], %s6693_s28, %s6693_s28, %s6694_s29  }
  0xa5   :  { %s6701_s21 = smov [#allocation16]   ;;  %s6635_s23 = scalar_lea.hbm %s7865_s15, 1024 }
  0xa6   :  { %s145_s30 = sshll.u32 %s6701_s21, 4  ;;  %p6636_p8 = scmp.ne.s32.totalorder %s7865_s15, %s6635_s23  ;;  %s146_s30 = int_to_ptr.vmem [resolvable:$true] %s145_s30 }
  0xa7   :  { %p6639_p9 = scmp.lt.u32.totalorder %s6635_s23, %s7865_s15 }
  0xa9   :  { %p6641_p10 = pnand %p6639_p9, %p6636_p8 }
  0xab   :  { %6644 = shalt.err (!%p6641_p10)
}
  0xac   :  { %s6645_s0 = scalar_lea.vmem %s146_s30, 1024  ;;  %p6650_p12 = scmp.lt.s32.totalorder %s146_s30, %s146_s30 }
  0xad   :  { %p6646_p11 = scmp.ne.s32.totalorder %s146_s30, %s6645_s0  ;;  %p6651_p13 = scmp.lt.s32.totalorder %s6645_s0, %s6645_s0 }
  0xaf   :  { %p6652_p0 = por %p6651_p13, %p6650_p12 }
  0xb1   :  { %p6653_p1 = pnand %p6652_p0, %p6646_p11 }
  0xb3   :  { %6656 = shalt.err (!%p6653_p1)
}
  0xb4   :  { %151 = dma.hbm_to_vmem [thread:$0]  %s7865_s15, 1024, %s146_s30, [#allocation15], %s6693_s28, %s6693_s28, %s6694_s29  }
  0xb5   :  { %6679 = dma.done.wait [#allocation3], 1024  }
  0xb6   :  { %6680 = vsyncadd [#allocation3], 4294966272 }
  0xb7   :  { %6681 = dma.done.wait [#allocation6], 2048  }
  0xb8   :  { %6682 = vsyncadd [#allocation6], 4294965248 }
  0xb9   :  { %6683 = dma.done.wait [#allocation9], 2048  }
  0xba   :  { %6684 = vsyncadd [#allocation9], 4294965248 }
  0xbb   :  { %6685 = dma.done.wait [#allocation12], 2048  }
  0xbc   :  { %6686 = vsyncadd [#allocation12], 4294965248 }
  0xbd   :  { %6687 = dma.done.wait [#allocation15], 2048  }
  0xbe   :  { %6688 = vsyncadd [#allocation15], 4294965248  ;;  %v354_v0 = vld [vmem:[#allocation10] sm:$0xff]  ;;  %v355_v1 = vld [vmem:[#allocation10 + $0x8] sm:$0xff]  ;;  %vm224_vm0 = vcmask 523264   ;;  %vm649_vm1 = vcmask 130048  }
  0xbf   :  { %v356_v2 = vld [vmem:[#allocation10 + $0x10] sm:$0xff]  ;;  %v5892_v3 = vpack.c.bf16 %v355_v1, %v354_v0  ;;  %v357_v4 = vld [vmem:[#allocation10 + $0x18] sm:$0xff]  ;;  %v358_v5 = vld [vmem:[#allocation10 + $0x20] sm:$0xff]  ;;  %s6703_s7 = smov 96   ;;  %s6704_s20 = smov 80  }
  0xc0   :  { %v5896_v6 = vpack.c.bf16 %v357_v4, %v356_v2  ;;  %v359_v7 = vld [vmem:[#allocation10 + $0x28] sm:$0xff]  ;;  %v209_v8 = vld [vmem:[#allocation8] sm:$0xff]  ;;  %v211_v11 = vld [vmem:[#allocation8 + $0x10] sm:$0xff]  ;;  %s7891_s24 = sld [smem:[#allocation28_spill]] }
  0xc1   :  { %v210_v9 = vld [vmem:[#allocation8 + $0x8] sm:$0xff]  ;;  %5893 = vmatprep.subr.bf16.mxu1 %v5892_v3  ;;  %v212_v12 = vld [vmem:[#allocation8 + $0x18] sm:$0xff]  ;;  %v193_v14 = vld [vmem:[#allocation5] sm:$0xff]  ;;  %v5900_v16 = vpack.c.bf16 %v359_v7, %v358_v5 }
  0xc2   :  { %v5876_v10 = vpack.c.bf16 %v210_v9, %v209_v8  ;;  %5895 = vmatpush3.bf16.msra.mxu1 %v5892_v3  ;;  %v5880_v13 = vpack.c.bf16 %v212_v12, %v211_v11  ;;  %v213_v15 = vld [vmem:[#allocation8 + $0x20] sm:$0xff]  ;;  %v214_v17 = vld [vmem:[#allocation8 + $0x28] sm:$0xff]  ;;  %v360_v18 = vld [vmem:[#allocation10 + $0x30] sm:$0xff]  ;;  %5492 = vmatprep.mubr.msk.f32.mxu1 %vm224_vm0, %v193_v14 }
  0xc3   :  { %5897 = vmatprep.subr.bf16.mxu1 %v5896_v6  ;;  %v361_v19 = vld [vmem:[#allocation10 + $0x38] sm:$0xff]  ;;  %v185_v20 = vld [vmem:[#allocation2] sm:$0xff]  ;;  %v5884_v21 = vpack.c.bf16 %v214_v17, %v213_v15  ;;  %v215_v22 = vld [vmem:[#allocation8 + $0x30] sm:$0xff] }
  0xc4   :  { %5877 = vmatprep.subr.bf16.mxu0 %v5876_v10  ;;  %5464 = vmatprep.mubr.msk.f32.mxu0 %vm224_vm0, %v185_v20  ;;  %v216_v23 = vld [vmem:[#allocation8 + $0x38] sm:$0xff]  ;;  %v5904_v24 = vpack.c.bf16 %v361_v19, %v360_v18  ;;  %v498_v26 = vld [vmem:[#allocation11] sm:$0xff]  ;;  %v499_v27 = vld [vmem:[#allocation11 + $0x8] sm:$0xff] }
  0xc5   :  { %5879 = vmatpush3.bf16.msra.mxu0 %v5876_v10  ;;  %v5888_v25 = vpack.c.bf16 %v216_v23, %v215_v22  ;;  %v5908_v28 = vpack.c.bf16 %v499_v27, %v498_v26  ;;  %v194_v29 = vld [vmem:[#allocation5 + $0x8] sm:$0xff]  ;;  %v500_v30 = vld [vmem:[#allocation11 + $0x10] sm:$0xff]  ;;  %v501_v31 = vld [vmem:[#allocation11 + $0x18] sm:$0xff] }
  0xc6   :  { %5881 = vmatprep.subr.bf16.mxu0 %v5880_v13  ;;  %5899 = vmatpush3.bf16.msra.mxu1 %v5896_v6  ;;  %v195_v32 = vld [vmem:[#allocation5 + $0x10] sm:$0xff]  ;;  %v186_v33 = vld [vmem:[#allocation2 + $0x8] sm:$0xff]  ;;  %v5912_v35 = vpack.c.bf16 %v501_v31, %v500_v30  ;;  %v196_v36 = vld [vmem:[#allocation5 + $0x18] sm:$0xff] }
  0xc7   :  { %5901 = vmatprep.subr.bf16.mxu1 %v5900_v16  ;;  %v187_v34 = vld [vmem:[#allocation2 + $0x10] sm:$0xff]  ;;  %v197_v37 = vld [vmem:[#allocation5 + $0x20] sm:$0xff]  ;;  %v188_v38 = vld [vmem:[#allocation2 + $0x18] sm:$0xff] }
  0xc8   :  { %v189_v39 = vld [vmem:[#allocation2 + $0x20] sm:$0xff]  ;;  %v198_v40 = vld [vmem:[#allocation5 + $0x28] sm:$0xff]  ;;  %v199_v41 = vld [vmem:[#allocation5 + $0x30] sm:$0xff] }
  0xc9   :  { %5883 = vmatpush3.bf16.msra.mxu0 %v5880_v13  ;;  %v190_v42 = vld [vmem:[#allocation2 + $0x28] sm:$0xff]  ;;  %v191_v43 = vld [vmem:[#allocation2 + $0x30] sm:$0xff]  ;;  %v200_v44 = vld [vmem:[#allocation5 + $0x38] sm:$0xff] }
  0xca   :  { %5885 = vmatprep.subr.bf16.mxu0 %v5884_v21  ;;  %5903 = vmatpush3.bf16.msra.mxu1 %v5900_v16  ;;  %v192_v45 = vld [vmem:[#allocation2 + $0x38] sm:$0xff]  ;;  %v502_v46 = vld [vmem:[#allocation11 + $0x20] sm:$0xff]  ;;  %v503_v47 = vld [vmem:[#allocation11 + $0x28] sm:$0xff] }
  0xcb   :  { %5905 = vmatprep.subr.bf16.mxu1 %v5904_v24  ;;  %v5916_v48 = vpack.c.bf16 %v503_v47, %v502_v46  ;;  %v504_v49 = vld [vmem:[#allocation11 + $0x30] sm:$0xff]  ;;  %v505_v50 = vld [vmem:[#allocation11 + $0x38] sm:$0xff]  ;;  %v201_v52 = vld [vmem:[#allocation7] sm:$0xff] }
  0xcc   :  { %v5920_v51 = vpack.c.bf16 %v505_v50, %v504_v49  ;;  %v202_v53 = vld [vmem:[#allocation7 + $0x8] sm:$0xff]  ;;  %v203_v54 = vld [vmem:[#allocation7 + $0x10] sm:$0xff]  ;;  %v204_v55 = vld [vmem:[#allocation7 + $0x18] sm:$0xff]  ;;  %v642_v50 = vlaneseq }
  0xcd   :  { %5887 = vmatpush3.bf16.msra.mxu0 %v5884_v21  ;;  %v205_v56 = vld [vmem:[#allocation7 + $0x20] sm:$0xff]  ;;  %v206_v57 = vld [vmem:[#allocation7 + $0x28] sm:$0xff]  ;;  %v207_v58 = vld [vmem:[#allocation7 + $0x30] sm:$0xff] }
  0xce   :  { %5889 = vmatprep.subr.bf16.mxu0 %v5888_v25  ;;  %5907 = vmatpush3.bf16.msra.mxu1 %v5904_v24  ;;  %v208_v59 = vld [vmem:[#allocation7 + $0x38] sm:$0xff]  ;;  %v5031_v60 = vld [vmem:[%s7856_s6] ss:$0 sm:$0xff]  ;;  %vm7001_vm2 = vmpackc.low %vm649_vm1, %vm649_vm1 }
  0xcf   :  { %v5022_v0 = vld [vmem:[%s7854_s4] ss:$0 sm:$0xff] }
  0xd1   :  { %5891 = vmatpush3.bf16.msra.mxu0 %v5888_v25  ;;  %5493 = vmatmul.mubr.msk.f32.vlgmr.msra.gmra.mrb[0].mxu1 %vm224_vm0, %v194_v29 }
  0xd2   :  { %5909 = vmatprep.subr.bf16.mxu0 %v5908_v28  ;;  %5495 = vmatprep.mubr.msk.f32.mxu1 %vm224_vm0, %v195_v32 }
  0xd4   :  { %5465 = vmatmul.mubr.msk.f32.vlgmr.msra.gmra.mrb[0].mxu0 %vm224_vm0, %v186_v33 }
  0xd5   :  { %5467 = vmatprep.mubr.msk.f32.mxu0 %vm224_vm0, %v187_v34  ;;  %5911 = vmatpush3.bf16.msra.mxu0 %v5908_v28 }
  0xd6   :  { %5496 = vmatmul.mubr.msk.f32.gmra.mrb[2].mxu1 %vm224_vm0, %v196_v36  ;;  %5913 = vmatprep.subr.bf16.mxu0 %v5912_v35 }
  0xd7   :  { %5498 = vmatprep.mubr.msk.f32.mxu1 %vm224_vm0, %v197_v37 }
  0xd8   :  { %5468 = vmatmul.mubr.msk.f32.gmra.mrb[2].mxu0 %vm224_vm0, %v188_v38 }
  0xd9   :  { %5470 = vmatprep.mubr.msk.f32.mxu0 %vm224_vm0, %v189_v39  ;;  %5915 = vmatpush3.bf16.msra.mxu0 %v5912_v35 }
  0xda   :  { %5499 = vmatmul.mubr.msk.f32.gmra.mrb[4].mxu1 %vm224_vm0, %v198_v40  ;;  %5917 = vmatprep.subr.bf16.mxu0 %v5916_v48 }
  0xdb   :  { %5501 = vmatprep.mubr.msk.f32.mxu1 %vm224_vm0, %v199_v41 }
  0xdc   :  { %5471 = vmatmul.mubr.msk.f32.gmra.mrb[4].mxu0 %vm224_vm0, %v190_v42 }
  0xdd   :  { %5473 = vmatprep.mubr.msk.f32.mxu0 %vm224_vm0, %v191_v43  ;;  %5919 = vmatpush3.bf16.msra.mxu0 %v5916_v48 }
  0xde   :  { %5502 = vmatmul.mubr.msk.f32.gmra.mrb[6].mxu1 %vm224_vm0, %v200_v44  ;;  %5921 = vmatprep.subr.bf16.mxu0 %v5920_v51 }
  0xe0   :  { %5474 = vmatmul.mubr.msk.f32.gmra.mrb[6].mxu0 %vm224_vm0, %v192_v45  ;;  %v7076_v45 = vld [vmem:[%s7858_s8] ss:$0 sm:$0xff]  ;;  %s6702_s8 = smov 112  }
  0xe1   :  { %5923 = vmatpush3.bf16.msra.mxu0 %v5920_v51  ;;  %5520 = vmatprep.mubr.msk.f32.mxu0 %vm224_vm0, %v201_v52  ;;  %v643_v51 = vshrl.u32 %v642_v50, 7  ;;  %v646_v52 = vand.u32 127, %v642_v50 }
  0xe3   :  { %vm7084_vm3 = vcmp.gt.s32.totalorder %v646_v52, %v643_v51 }
  0xe4   :  { %5521 = vmatmul.mubr.msk.f32.vlgmr.msra.gmra.mrb[8].mxu0 %vm224_vm0, %v202_v53  ;;  %v644_v53 = vadd.s32 8, %v643_v51 }
  0xe5   :  { %5523 = vmatprep.mubr.msk.f32.mxu0 %vm224_vm0, %v203_v54 }
  0xe6   :  { %vm7088_vm4 = vcmp.gt.s32.totalorder %v646_v52, %v644_v53 }
  0xe8   :  { %5524 = vmatmul.mubr.msk.f32.gmra.mrb[10].mxu0 %vm224_vm0, %v204_v55 }
  0xe9   :  { %5526 = vmatprep.mubr.msk.f32.mxu0 %vm224_vm0, %v205_v56 }
  0xec   :  { %5527 = vmatmul.mubr.msk.f32.gmra.mrb[12].mxu0 %vm224_vm0, %v206_v57 }
  0xed   :  { %5529 = vmatprep.mubr.msk.f32.mxu0 %vm224_vm0, %v207_v58 }
  0xf0   :  { %5530 = vmatmul.mubr.msk.f32.gmra.mrb[14].mxu0 %vm224_vm0, %v208_v59 }
 0x1a4   :  { %v5494_v61 = vpop.f32.mrb[0].mxu1 }
 0x1a5   :  { %v465_v62 = vadd.f32 %v5494_v61, %v5031_v60  ;;  %v459_v63 = vpop.f32.mrb[1].mxu1 }
 0x1a6   :  { %v460_v1 = vadd.f32 %v5031_v60, %v459_v63 }
 0x1a7   :  { %v5466_v2 = vpop.f32.mrb[0].mxu0 }
 0x1a8   :  { %v315_v4 = vpop.f32.mrb[1].mxu0  ;;  %v5924_v5 = vpack.c.bf16 %v465_v62, %v460_v1  ;;  %v7007_v8 = vpack.i.bf16 %v465_v62, %v460_v1  ;;  %v7017_v19 = vadd.f32 %v5466_v2, %v5022_v0 }
 0x1a9   :  { %v5497_v6 = vpop.f32.mrb[2].mxu1  ;;  %v7005_v7 = vadd.f32 %v5022_v0, %v315_v4 }
 0x1aa   :  { %v475_v9 = vadd.f32 %v5497_v6, %v5031_v60  ;;  %v469_v10 = vpop.f32.mrb[3].mxu1  ;;  %5926 = vmatprep.subr.msk.bf16.mxu1 %vm7001_vm2, %v5924_v5 }
 0x1ab   :  { %v470_v11 = vadd.f32 %v5031_v60, %v469_v10  ;;  %5536 = vmatprep.mubr.msk.f32.mxu1 %vm649_vm1, %v7005_v7  ;;  %v5469_v12 = vpop.f32.mrb[2].mxu0  ;;  %5929 = vmatpush3.bf16.xpose.msk.msra.mxu1 %vm7001_vm2, %v5924_v5 }
 0x1ac   :  { %v325_v13 = vpop.f32.mrb[3].mxu0  ;;  %v7045_v36 = vadd.f32 %v5469_v12, %v5022_v0 }
 0x1ad   :  { %v5500_v14 = vpop.f32.mrb[4].mxu1  ;;  %v5930_v15 = vpack.c.bf16 %v475_v9, %v470_v11  ;;  %v7015_v16 = vpack.i.bf16 %v475_v9, %v470_v11  ;;  %v7021_v22 = vadd.f32 %v5022_v0, %v325_v13 }
 0x1ae   :  { %v485_v17 = vadd.f32 %v5500_v14, %v5031_v60  ;;  %v479_v18 = vpop.f32.mrb[5].mxu1 }
 0x1af   :  { %5932 = vmatprep.subr.msk.bf16.mxu1 %vm7001_vm2, %v5930_v15  ;;  %v480_v20 = vadd.f32 %v5031_v60, %v479_v18  ;;  %v5472_v21 = vpop.f32.mrb[4].mxu0 }
 0x1b0   :  { %v335_v23 = vpop.f32.mrb[5].mxu0  ;;  %v7043_v35 = vadd.f32 %v5472_v21, %v5022_v0 }
 0x1b1   :  { %v5503_v24 = vpop.f32.mrb[6].mxu1  ;;  %v5936_v25 = vpack.c.bf16 %v485_v17, %v480_v20  ;;  %v7023_v26 = vadd.f32 %v5022_v0, %v335_v23  ;;  %v7025_v27 = vpack.i.bf16 %v485_v17, %v480_v20 }
 0x1b2   :  { %v495_v28 = vadd.f32 %v5503_v24, %v5031_v60  ;;  %v489_v29 = vpop.f32.mrb[7].mxu1  ;;  %5537 = vmatmul.mubr.msk.f32.vlgmr.msra.gmra.mrb[8].mxu1 %vm649_vm1, %v7017_v19 }
 0x1b3   :  { %v490_v30 = vadd.f32 %v5031_v60, %v489_v29  ;;  %5938 = vmatprep.subr.msk.bf16.mxu0 %vm7001_vm2, %v5936_v25  ;;  %v5475_v31 = vpop.f32.mrb[6].mxu0  ;;  %5935 = vmatpush3.bf16.xpose.msk.msra.mxu1 %vm7001_vm2, %v5930_v15 }
 0x1b4   :  { %5543 = vmatprep.mubr.msk.f32.mxu1 %vm649_vm1, %v7021_v22  ;;  %v345_v32 = vpop.f32.mrb[7].mxu0  ;;  %5941 = vmatpush3.bf16.xpose.msk.msra.mxu0 %vm7001_vm2, %v5936_v25  ;;  %v7057_v38 = vadd.f32 %v5475_v31, %v5022_v0 }
 0x1b5   :  { %v5942_v33 = vpack.c.bf16 %v495_v28, %v490_v30  ;;  %5550 = vmatprep.mubr.msk.f32.mxu0 %vm649_vm1, %v7023_v26  ;;  %v7039_v34 = vpack.i.bf16 %v495_v28, %v490_v30  ;;  %v7047_v37 = vadd.f32 %v5022_v0, %v345_v32 }
 0x1b7   :  { %5944 = vmatprep.subr.msk.bf16.mxu1 %vm7001_vm2, %v5942_v33  ;;  %v7061_v39 = vpop.f32.mrb[8].mxu0 }
 0x1b8   :  { %v7063_v40 = vpop.f32.mrb[9].mxu0 }
 0x1ba   :  { %5544 = vmatmul.mubr.msk.f32.vlgmr.msra.gmra.mrb[10].mxu1 %vm649_vm1, %v7045_v36 }
 0x1bb   :  { %5947 = vmatpush3.bf16.xpose.msk.msra.mxu1 %vm7001_vm2, %v5942_v33  ;;  %5551 = vmatmul.mubr.msk.f32.vlgmr.msra.gmra.mrb[16].mxu0 %vm649_vm1, %v7043_v35  ;;  %v7065_v41 = vpop.f32.mrb[10].mxu0 }
 0x1bc   :  { %5557 = vmatprep.mubr.msk.f32.mxu1 %vm649_vm1, %v7047_v37  ;;  %v7067_v42 = vpop.f32.mrb[11].mxu0 }
 0x1bf   :  { %v7069_v43 = vpop.f32.mrb[12].mxu0 }
 0x1c0   :  { %v7071_v44 = vpop.f32.mrb[13].mxu0 }
 0x1c2   :  { %5558 = vmatmul.mubr.msk.f32.vlgmr.msra.gmra.mrb[12].mxu1 %vm649_vm1, %v7057_v38 }
 0x1c3   :  { %v5531_v46 = vpop.f32.mrb[14].mxu0 }
 0x1c4   :  { %v7079_v47 = vadd.f32 %v5531_v46, %v7076_v45  ;;  %v633_v48 = vpop.f32.mrb[15].mxu0 }
 0x1c5   :  { %v7082_v49 = vadd.f32 %v7076_v45, %v633_v48 }
 0x285   :  { %v5538_v55 = vpop.f32.mrb[8].mxu1 }
 0x286   :  { %v728_v57 = vpop.f32.mrb[9].mxu1  ;;  %v1003_v60 = vsel %vm7088_vm4, -inf, %v5538_v55 }
 0x287   :  { %v1002_v58 = vsel %vm7084_vm3, -inf, %v728_v57  ;;  %v1013_v61 = vsel %vm649_vm1, %v1003_v60, -inf }
 0x288   :  { %v1010_v59 = vsel %vm649_vm1, %v1002_v58, -inf }
 0x289   :  { %1011 = vmax.xlane.f32.xlu0 %v1010_v59 }
 0x28d   :  { %1014 = vmax.xlane.f32.xlu0 %v1013_v61  ;;  %v5545_v62 = vpop.f32.mrb[10].mxu1 }
 0x28e   :  { %v815_v63 = vpop.f32.mrb[11].mxu1  ;;  %v7098_v0 = vpop.f32.mrb[16].mxu0  ;;  %v1005_v5 = vsel %vm7088_vm4, -inf, %v5545_v62 }
 0x28f   :  { %v1004_v1 = vsel %vm7084_vm3, -inf, %v815_v63  ;;  %v7102_v2 = vpop.f32.mrb[17].mxu0  ;;  %v1019_v6 = vsel %vm649_vm1, %v1005_v5, -inf }
 0x290   :  { %v1016_v4 = vsel %vm649_vm1, %v1004_v1, -inf }
 0x291   :  { %1017 = vmax.xlane.f32.xlu1 %v1016_v4 }
 0x295   :  { %1020 = vmax.xlane.f32.xlu1 %v1019_v6  ;;  %v5559_v9 = vpop.f32.mrb[12].mxu1  ;;  %v604_v6 = vadd.f32 %v7076_v45, %v7063_v40 }
 0x296   :  { %v1009_v10 = vsel %vm7088_vm4, -inf, %v5559_v9  ;;  %v989_v11 = vpop.f32.mrb[13].mxu1 }
 0x297   :  { %v1008_v12 = vsel %vm7084_vm3, -inf, %v989_v11  ;;  %v1031_v13 = vsel %vm649_vm1, %v1009_v10, -inf  ;;  %v614_v11 = vadd.f32 %v7076_v45, %v7067_v42  ;;  %v7162_v42 = vpack.i.bf16 %v7079_v47, %v7082_v49 }
 0x298   :  { %v1028_v14 = vsel %vm649_vm1, %v1008_v12, -inf }
 0x299   :  { %1032 = vmax.xlane.f32.xlu1 %v1031_v13  ;;  %1029 = vmax.xlane.f32.xlu0 %v1028_v14  ;;  %v629_v13 = vadd.f32 %v7069_v43, %v7076_v45  ;;  %v7177_v43 = vsel %vm7084_vm3, -inf, %v7102_v2 }
 0x316   :  { %v1012_v15 = vpop.xlane.xlu0 %1011 }
 0x317   :  { %v1034_v17 = vsub.f32 %v1002_v58, %v1012_v15 }
 0x319   :  { %v1042_v18 = vmul.f32 1.442695, %v1034_v17 }
 0x31a   :  { %v1015_v20 = vpop.xlane.xlu0 %1014 }
 0x31b   :  { %6291 = vpow2.f32 %v1042_v18  ;;  %v1035_v21 = vsub.f32 %v1003_v60, %v1015_v20 }
 0x31d   :  { %v1044_v23 = vmul.f32 1.442695, %v1035_v21 }
 0x31e   :  { %v1018_v24 = vpop.xlane.xlu1 %1017 }
 0x31f   :  { %6293 = vpow2.f32 %v1044_v23  ;;  %v1036_v25 = vsub.f32 %v1004_v1, %v1018_v24 }
 0x321   :  { %v1046_v28 = vmul.f32 1.442695, %v1036_v25 }
 0x322   :  { %v1021_v29 = vpop.xlane.xlu1 %1020 }
 0x323   :  { %6295 = vpow2.f32 %v1046_v28  ;;  %v1037_v30 = vsub.f32 %v1005_v5, %v1021_v29  ;;  %v609_v5 = vadd.f32 %v7061_v39, %v7076_v45  ;;  %v624_v39 = vadd.f32 %v7076_v45, %v7071_v44 }
 0x324   :  { %v1022_v44 = vsel %vm649_vm1, %v7177_v43, -inf }
 0x325   :  { %v7114_v31 = vpop.eup %6291  ;;  %v1048_v32 = vmul.f32 1.442695, %v1037_v30  ;;  %v5948_v9 = vpack.c.bf16 %v609_v5, %v604_v6  ;;  %v5956_v40 = vpack.c.bf16 %v629_v13, %v624_v39  ;;  %v7154_v17 = vpack.i.bf16 %v629_v13, %v624_v39 }
 0x326   :  { %v1033_v33 = vpop.xlane.xlu1 %1032  ;;  %v1030_v46 = vpop.xlane.xlu0 %1029  ;;  %v1058_v48 = vsel %vm649_vm1, %v7114_v31, 0.0 }
 0x327   :  { %6297 = vpow2.f32 %v1048_v32  ;;  %v1041_v50 = vsub.f32 %v1009_v10, %v1033_v33  ;;  %v1040_v51 = vsub.f32 %v1008_v12, %v1030_v46  ;;  %1059 = vadd.xlane.f32.xlu0 %v1058_v48  ;;  %v619_v10 = vadd.f32 %v7065_v41, %v7076_v45  ;;  %5949 = vmatprep.subr.bf16.mxu1 %v5948_v9 }
 0x328   :  { %v7146_v12 = vpack.i.bf16 %v609_v5, %v604_v6  ;;  %5951 = vmatpush3.bf16.msra.mxu1 %v5948_v9  ;;  %5957 = vmatprep.subr.bf16.mxu0 %v5956_v40  ;;  %v5960_v41 = vpack.c.bf16 %v7079_v47, %v7082_v49  ;;  %v7184_v45 = vsel %vm7088_vm4, -inf, %v7098_v0 }
 0x329   :  { %v7118_v52 = vpop.eup %6293  ;;  %v1056_v53 = vmul.f32 1.442695, %v1041_v50  ;;  %v1054_v55 = vmul.f32 1.442695, %v1040_v51  ;;  %v5952_v14 = vpack.c.bf16 %v619_v10, %v614_v11  ;;  %v7152_v15 = vpack.i.bf16 %v619_v10, %v614_v11  ;;  %5959 = vmatpush3.bf16.msra.mxu0 %v5956_v40 }
 0x32a   :  { %v1061_v57 = vsel %vm649_vm1, %v7118_v52, 0.0  ;;  %v1025_v47 = vsel %vm649_vm1, %v7184_v45, -inf }
 0x32b   :  { %6299 = vpow2.f32 %v1056_v53  ;;  %1062 = vadd.xlane.f32.xlu1 %v1061_v57  ;;  %5953 = vmatprep.subr.bf16.mxu1 %v5952_v14 }
 0x32c   :  { %6301 = vpow2.f32 %v1054_v55 }
 0x32d   :  { %v7122_v58 = vpop.eup %6295 }
 0x32e   :  { %v1064_v59 = vsel %vm649_vm1, %v7122_v58, 0.0 }
 0x32f   :  { %1065 = vadd.xlane.f32.xlu0 %v1064_v59 }
 0x331   :  { %v7126_v60 = vpop.eup %6297 }
 0x332   :  { %v1067_v61 = vsel %vm649_vm1, %v7126_v60, 0.0 }
 0x333   :  { %1068 = vadd.xlane.f32.xlu1 %v1067_v61 }
 0x335   :  { %v7130_v62 = vpop.eup %6299 }
 0x336   :  { %v7132_v63 = vpop.eup %6301  ;;  %v1079_v1 = vsel %vm649_vm1, %v7130_v62, 0.0 }
 0x337   :  { %1080 = vadd.xlane.f32.xlu1 %v1079_v1  ;;  %v1076_v4 = vsel %vm649_vm1, %v7132_v63, 0.0 }
 0x338   :  { %1077 = vadd.xlane.f32.xlu0 %v1076_v4 }
 0x348   :  { %1515 = vrot.lane.b32.xlu1 %v7021_v22, %s6702_s8 }
 0x34c   :  { %6177 = vrot.lane.b32.xlu1 %v7039_v34, %s6702_s8 }
 0x34e   :  { %6172 = vrot.lane.b32.xlu0 %v7015_v16, %s6702_s8 }
 0x350   :  { %1517 = vrot.lane.b32.xlu1 %v7045_v36, %s6702_s8 }
 0x352   :  { %1697 = vrot.lane.b32.xlu0 %v7047_v37, %s6702_s8 }
 0x354   :  { %1699 = vrot.lane.b32.xlu1 %v7057_v38, %s6702_s8 }
 0x371   :  { %1023 = vmax.xlane.f32.xlu0 %v1022_v44 }
 0x378   :  { %1026 = vmax.xlane.f32.xlu1 %v1025_v47 }
 0x389   :  { %6187 = vrot.lane.b32.xlu1 %v7025_v27, %s6702_s8 }
 0x38d   :  { %1424 = vrot.lane.b32.xlu1 %v7005_v7, %s6702_s8 }
 0x391   :  { %1426 = vrot.lane.b32.xlu1 %v7017_v19, %s6702_s8 }
 0x395   :  { %1608 = vrot.lane.b32.xlu1 %v7043_v35, %s6702_s8 }
 0x3b4   :  { %v1060_v49 = vpop.xlane.xlu0 %1059 }
 0x3b5   :  { %6303 = vrcp.f32 %v1060_v49 }
 0x3b8   :  { %v1063_v0 = vpop.xlane.xlu1 %1062 }
 0x3b9   :  { %6305 = vrcp.f32 %v1063_v0 }
 0x3bc   :  { %v1066_v2 = vpop.xlane.xlu0 %1065 }
 0x3bd   :  { %6307 = vrcp.f32 %v1066_v2 }
 0x3bf   :  { %v6304_v18 = vpop.eup %6303 }
 0x3c0   :  { %v1069_v20 = vpop.xlane.xlu1 %1068  ;;  %v1090_v21 = vmul.f32 %v6304_v18, %v7114_v31 }
 0x3c1   :  { %6309 = vrcp.f32 %v1069_v20 }
 0x3c2   :  { %5564 = vmatprep.mubr.msk.f32.mxu1 %vm649_vm1, %v1090_v21 }
 0x3c3   :  { %v6306_v23 = vpop.eup %6305 }
 0x3c4   :  { %v1081_v24 = vpop.xlane.xlu1 %1080  ;;  %v1091_v25 = vmul.f32 %v6306_v23, %v7118_v52 }
 0x3c5   :  { %6311 = vrcp.f32 %v1081_v24  ;;  %v1078_v28 = vpop.xlane.xlu0 %1077 }
 0x3c6   :  { %6313 = vrcp.f32 %v1078_v28  ;;  %5565 = vmatmul.mubr.msk.f32.vlgmr.msra.gmra.mrb[14].mxu1 %vm649_vm1, %v1091_v25 }
 0x3c7   :  { %v6308_v29 = vpop.eup %6307  ;;  %5955 = vmatpush3.bf16.msra.mxu1 %v5952_v14 }
 0x3c8   :  { %v1092_v30 = vmul.f32 %v6308_v29, %v7122_v58  ;;  %5961 = vmatprep.subr.bf16.mxu1 %v5960_v41  ;;  %v1516_v33 = vpop.permute.xlu1 %1515 }
 0x3c9   :  { %v6173_v32 = vpop.permute.xlu0 %6172 }
 0x3ca   :  { %v6175_v31 = vunpack.i.h.bf16 %v6173_v32  ;;  %v6174_v46 = vunpack.i.l.bf16 %v6173_v32  ;;  %5571 = vmatprep.mubr.msk.f32.mxu1 %vm649_vm1, %v1092_v30 }
 0x3cb   :  { %v6310_v48 = vpop.eup %6309 }
 0x3cc   :  { %v1093_v50 = vmul.f32 %v6310_v48, %v7126_v60  ;;  %v5970_v51 = vpack.c.bf16 %v6175_v31, %v6174_v46  ;;  %v6178_v55 = vpop.permute.xlu1 %6177 }
 0x3cd   :  { %v6180_v59 = vunpack.i.h.bf16 %v6178_v55  ;;  %v6179_v61 = vunpack.i.l.bf16 %v6178_v55  ;;  %v1698_v4 = vpop.permute.xlu0 %1697 }
 0x3ce   :  { %5572 = vmatmul.mubr.msk.f32.vlgmr.msra.gmra.mrb[16].mxu1 %vm649_vm1, %v1093_v50 }
 0x3cf   :  { %v6312_v52 = vpop.eup %6311  ;;  %5963 = vmatpush3.bf16.msra.mxu1 %v5960_v41  ;;  %v5982_v60 = vpack.c.bf16 %v6180_v59, %v6179_v61 }
 0x3d0   :  { %v6314_v53 = vpop.eup %6313  ;;  %5972 = vmatprep.subr.msk.bf16.mxu1 %vm7001_vm2, %v5970_v51  ;;  %v1097_v57 = vmul.f32 %v6312_v52, %v7130_v62  ;;  %v1518_v1 = vpop.permute.xlu1 %1517 }
 0x3d1   :  { %v1096_v58 = vmul.f32 %v6314_v53, %v7132_v63 }
 0x3d3   :  { %5585 = vmatprep.mubr.msk.f32.mxu1 %vm649_vm1, %v1096_v58 }
 0x3d4   :  { %5586 = vmatmul.mubr.msk.f32.vlgmr.msra.gmra.mrb[18].mxu1 %vm649_vm1, %v1097_v57  ;;  %v1700_v62 = vpop.permute.xlu1 %1699 }
 0x3d5   :  { %5599 = vmatprep.mubr.msk.f32.mxu1 %vm649_vm1, %v1516_v33 }
 0x3d8   :  { %5975 = vmatpush3.bf16.xpose.msk.msra.mxu1 %vm7001_vm2, %v5970_v51 }
 0x3d9   :  { %5984 = vmatprep.subr.msk.bf16.mxu1 %vm7001_vm2, %v5982_v60 }
 0x3df   :  { %5600 = vmatmul.mubr.msk.f32.vlgmr.msra.gmra.mrb[20].mxu1 %vm649_vm1, %v1518_v1 }
 0x3e0   :  { %5987 = vmatpush3.bf16.xpose.msk.msra.mxu1 %vm7001_vm2, %v5982_v60  ;;  %5613 = vmatprep.mubr.msk.f32.mxu1 %vm649_vm1, %v1698_v4 }
 0x3e7   :  { %5614 = vmatmul.mubr.msk.f32.vlgmr.msra.gmra.mrb[22].mxu1 %vm649_vm1, %v1700_v62 }
 0x3fe   :  { %v1024_v63 = vpop.xlane.xlu0 %1023 }
 0x3ff   :  { %v1038_v5 = vsub.f32 %v7177_v43, %v1024_v63 }
 0x401   :  { %v1050_v6 = vmul.f32 1.442695, %v1038_v5 }
 0x403   :  { %6315 = vpow2.f32 %v1050_v6 }
 0x405   :  { %v1027_v9 = vpop.xlane.xlu1 %1026 }
 0x406   :  { %v1039_v10 = vsub.f32 %v7184_v45, %v1027_v9 }
 0x408   :  { %v1052_v11 = vmul.f32 1.442695, %v1039_v10 }
 0x409   :  { %v6188_v25 = vpop.permute.xlu1 %6187 }
 0x40a   :  { %6317 = vpow2.f32 %v1052_v11  ;;  %v6190_v29 = vunpack.i.h.bf16 %v6188_v25  ;;  %v6189_v30 = vunpack.i.l.bf16 %v6188_v25 }
 0x40c   :  { %v5976_v31 = vpack.c.bf16 %v6190_v29, %v6189_v30 }
 0x40d   :  { %v6316_v13 = vpop.eup %6315  ;;  %v1425_v46 = vpop.permute.xlu1 %1424 }
 0x40e   :  { %v1070_v39 = vsel %vm649_vm1, %v6316_v13, 0.0 }
 0x40f   :  { %1071 = vadd.xlane.f32.xlu0 %v1070_v39 }
 0x411   :  { %v1427_v57 = vpop.permute.xlu1 %1426 }
 0x414   :  { %v6318_v14 = vpop.eup %6317 }
 0x415   :  { %v1073_v40 = vsel %vm649_vm1, %v6318_v14, 0.0  ;;  %v1609_v62 = vpop.permute.xlu1 %1608 }
 0x416   :  { %1074 = vadd.xlane.f32.xlu0 %v1073_v40 }
 0x42c   :  { %6182 = vrot.lane.b32.xlu0 %v7007_v8, %s6702_s8 }
 0x430   :  { %1606 = vrot.lane.b32.xlu0 %v7023_v26, %s6702_s8 }
 0x499   :  { %v7228_v41 = vpop.f32.mrb[14].mxu1 }
 0x49a   :  { %v7230_v43 = vpop.f32.mrb[15].mxu1 }
 0x49c   :  { %v1072_v44 = vpop.xlane.xlu0 %1071 }
 0x49d   :  { %6319 = vrcp.f32 %v1072_v44 }
 0x4a1   :  { %v7232_v45 = vpop.f32.mrb[16].mxu1 }
 0x4a2   :  { %v7234_v47 = vpop.f32.mrb[17].mxu1 }
 0x4a3   :  { %v1075_v49 = vpop.xlane.xlu0 %1074 }
 0x4a4   :  { %6321 = vrcp.f32 %v1075_v49 }
 0x4a7   :  { %v6320_v0 = vpop.eup %6319  ;;  %v7236_v2 = vpop.f32.mrb[18].mxu1 }
 0x4a8   :  { %v6183_v18 = vpop.permute.xlu0 %6182  ;;  %v7238_v20 = vpop.f32.mrb[19].mxu1  ;;  %v1094_v24 = vmul.f32 %v6320_v0, %v6316_v13 }
 0x4a9   :  { %v6185_v21 = vunpack.i.h.bf16 %v6183_v18  ;;  %v6184_v23 = vunpack.i.l.bf16 %v6183_v18 }
 0x4aa   :  { %5578 = vmatprep.mubr.msk.f32.mxu0 %vm649_vm1, %v1094_v24 }
 0x4ab   :  { %v5964_v28 = vpack.c.bf16 %v6185_v21, %v6184_v23 }
 0x4ac   :  { %v1607_v58 = vpop.permute.xlu0 %1606 }
 0x4ad   :  { %5966 = vmatprep.subr.msk.bf16.mxu0 %vm7001_vm2, %v5964_v28 }
 0x4ae   :  { %v6322_v32 = vpop.eup %6321 }
 0x4af   :  { %v1095_v33 = vmul.f32 %v6322_v32, %v6318_v14 }
 0x4b1   :  { %5579 = vmatmul.mubr.msk.f32.vlgmr.msra.gmra.mrb[18].mxu0 %vm649_vm1, %v1095_v33 }
 0x4b2   :  { %5969 = vmatpush3.bf16.xpose.msk.msra.mxu0 %vm7001_vm2, %v5964_v28  ;;  %v5601_v48 = vpop.f32.mrb[20].mxu1  ;;  %5592 = vmatprep.mubr.msk.f32.mxu0 %vm649_vm1, %v1425_v46 }
 0x4b3   :  { %v1791_v50 = vsel %vm7088_vm4, -inf, %v5601_v48  ;;  %v1597_v51 = vpop.f32.mrb[21].mxu1  ;;  %5978 = vmatprep.subr.msk.bf16.mxu0 %vm7001_vm2, %v5976_v31 }
 0x4b4   :  { %v1790_v52 = vsel %vm7084_vm3, -inf, %v1597_v51  ;;  %v1805_v53 = vsel %vm649_vm1, %v1791_v50, -inf }
 0x4b5   :  { %1806 = vmax.xlane.f32.xlu1 %v1805_v53  ;;  %v1802_v55 = vsel %vm649_vm1, %v1790_v52, -inf }
 0x4b6   :  { %1803 = vmax.xlane.f32.xlu0 %v1802_v55 }
 0x4b9   :  { %5593 = vmatmul.mubr.msk.f32.vlgmr.msra.gmra.mrb[20].mxu0 %vm649_vm1, %v1427_v57 }
 0x4ba   :  { %5981 = vmatpush3.bf16.xpose.msk.msra.mxu0 %vm7001_vm2, %v5976_v31  ;;  %5606 = vmatprep.mubr.msk.f32.mxu0 %vm649_vm1, %v1607_v58  ;;  %v5615_v59 = vpop.f32.mrb[22].mxu1 }
 0x4bb   :  { %v1779_v61 = vpop.f32.mrb[23].mxu1  ;;  %v1795_v4 = vsel %vm7088_vm4, -inf, %v5615_v59 }
 0x4bc   :  { %v1794_v60 = vsel %vm7084_vm3, -inf, %v1779_v61  ;;  %v1817_v63 = vsel %vm649_vm1, %v1795_v4, -inf }
 0x4bd   :  { %v1814_v1 = vsel %vm649_vm1, %v1794_v60, -inf }
 0x4be   :  { %1815 = vmax.xlane.f32.xlu0 %v1814_v1 }
 0x4c1   :  { %5607 = vmatmul.mubr.msk.f32.vlgmr.msra.gmra.mrb[22].mxu0 %vm649_vm1, %v1609_v62 }
 0x4c2   :  { %1818 = vmax.xlane.f32.xlu0 %v1817_v63 }
 0x542   :  { %v1807_v5 = vpop.xlane.xlu1 %1806 }
 0x543   :  { %v1823_v6 = vsub.f32 %v1791_v50, %v1807_v5  ;;  %v1804_v9 = vpop.xlane.xlu0 %1803 }
 0x544   :  { %v1822_v10 = vsub.f32 %v1790_v52, %v1804_v9 }
 0x545   :  { %v1834_v11 = vmul.f32 1.442695, %v1823_v6 }
 0x546   :  { %v1832_v13 = vmul.f32 1.442695, %v1822_v10 }
 0x547   :  { %6323 = vpow2.f32 %v1834_v11 }
 0x548   :  { %6325 = vpow2.f32 %v1832_v13 }
 0x54b   :  { %v1816_v39 = vpop.xlane.xlu0 %1815 }
 0x54c   :  { %v1826_v14 = vsub.f32 %v1794_v60, %v1816_v39 }
 0x54e   :  { %v1840_v40 = vmul.f32 1.442695, %v1826_v14 }
 0x54f   :  { %v1819_v44 = vpop.xlane.xlu0 %1818 }
 0x550   :  { %6327 = vpow2.f32 %v1840_v40  ;;  %v1827_v49 = vsub.f32 %v1795_v4, %v1819_v44 }
 0x551   :  { %v7266_v0 = vpop.eup %6323 }
 0x552   :  { %v6326_v18 = vpop.eup %6325  ;;  %v1842_v21 = vmul.f32 1.442695, %v1827_v49  ;;  %v1853_v23 = vsel %vm649_vm1, %v7266_v0, 0.0 }
 0x553   :  { %1854 = vadd.xlane.f32.xlu1 %v1853_v23  ;;  %v1850_v24 = vsel %vm649_vm1, %v6326_v18, 0.0 }
 0x554   :  { %6329 = vpow2.f32 %v1842_v21  ;;  %1851 = vadd.xlane.f32.xlu0 %v1850_v24 }
 0x55a   :  { %v7271_v25 = vpop.eup %6327 }
 0x55b   :  { %v1862_v28 = vsel %vm649_vm1, %v7271_v25, 0.0 }
 0x55c   :  { %1863 = vadd.xlane.f32.xlu0 %v1862_v28 }
 0x55e   :  { %v7275_v29 = vpop.eup %6329 }
 0x55f   :  { %v1865_v30 = vsel %vm649_vm1, %v7275_v29, 0.0 }
 0x560   :  { %1866 = vadd.xlane.f32.xlu1 %v1865_v30 }
 0x571   :  { %6197 = vrot.lane.b32.xlu1 %v7162_v42, %s6702_s8 }
 0x572   :  { %6192 = vrot.lane.b32.xlu0 %v7152_v15, %s6702_s8 }
 0x575   :  { %6202 = vrot.lane.b32.xlu1 %v7007_v8, %s6703_s7 }
 0x576   :  { %2501 = vrot.lane.b32.xlu0 %v7005_v7, %s6703_s7 }
 0x579   :  { %6207 = vrot.lane.b32.xlu1 %v7015_v16, %s6703_s7 }
 0x57a   :  { %6212 = vrot.lane.b32.xlu0 %v7025_v27, %s6703_s7 }
 0x57d   :  { %2503 = vrot.lane.b32.xlu1 %v7017_v19, %s6703_s7 }
 0x57e   :  { %2594 = vrot.lane.b32.xlu0 %v7045_v36, %s6703_s7 }
 0x581   :  { %2592 = vrot.lane.b32.xlu1 %v7021_v22, %s6703_s7 }
 0x582   :  { %2683 = vrot.lane.b32.xlu0 %v7023_v26, %s6703_s7 }
 0x584   :  { %v7299_v32 = vpop.f32.mrb[18].mxu0 }
 0x585   :  { %6217 = vrot.lane.b32.xlu1 %v7039_v34, %s6703_s7  ;;  %v7303_v33 = vpop.f32.mrb[19].mxu0 }
 0x586   :  { %2774 = vrot.lane.b32.xlu0 %v7047_v37, %s6703_s7 }
 0x589   :  { %2685 = vrot.lane.b32.xlu1 %v7043_v35, %s6703_s7 }
 0x58c   :  { %v5594_v31 = vpop.f32.mrb[20].mxu0 }
 0x58d   :  { %v1506_v46 = vpop.f32.mrb[21].mxu0  ;;  %2776 = vrot.lane.b32.xlu1 %v7057_v38, %s6703_s7  ;;  %v7331_v59 = vsel %vm7088_vm4, -inf, %v5594_v31 }
 0x58e   :  { %v7313_v51 = vsel %vm7084_vm3, -inf, %v1506_v46  ;;  %v1799_v61 = vsel %vm649_vm1, %v7331_v59, -inf }
 0x58f   :  { %v1796_v52 = vsel %vm649_vm1, %v7313_v51, -inf }
 0x594   :  { %v5608_v48 = vpop.f32.mrb[22].mxu0 }
 0x595   :  { %v1688_v50 = vpop.f32.mrb[23].mxu0  ;;  %v7325_v57 = vsel %vm7088_vm4, -inf, %v5608_v48 }
 0x596   :  { %v7319_v53 = vsel %vm7084_vm3, -inf, %v1688_v50  ;;  %v1811_v58 = vsel %vm649_vm1, %v7325_v57, -inf }
 0x597   :  { %v1808_v55 = vsel %vm649_vm1, %v7319_v53, -inf }
 0x5a5   :  { %1797 = vmax.xlane.f32.xlu0 %v1796_v52 }
 0x5a9   :  { %1809 = vmax.xlane.f32.xlu0 %v1808_v55 }
 0x5ad   :  { %1812 = vmax.xlane.f32.xlu0 %v1811_v58 }
 0x5b1   :  { %1800 = vmax.xlane.f32.xlu1 %v1799_v61 }
 0x5e0   :  { %v1855_v1 = vpop.xlane.xlu1 %1854 }
 0x5e1   :  { %v1852_v60 = vpop.xlane.xlu0 %1851 }
 0x5e2   :  { %6331 = vrcp.f32 %v1852_v60 }
 0x5e3   :  { %6333 = vrcp.f32 %v1855_v1 }
 0x5e9   :  { %v1864_v4 = vpop.xlane.xlu0 %1863 }
 0x5ea   :  { %6335 = vrcp.f32 %v1864_v4 }
 0x5ec   :  { %v6332_v62 = vpop.eup %6331 }
 0x5ed   :  { %v1867_v63 = vpop.xlane.xlu1 %1866  ;;  %v6193_v5 = vpop.permute.xlu0 %6192  ;;  %v1878_v6 = vmul.f32 %v6332_v62, %v6326_v18 }
 0x5ee   :  { %6337 = vrcp.f32 %v1867_v63  ;;  %v6195_v9 = vunpack.i.h.bf16 %v6193_v5  ;;  %v6194_v10 = vunpack.i.l.bf16 %v6193_v5  ;;  %v6334_v13 = vpop.eup %6333 }
 0x5ef   :  { %5627 = vmatprep.mubr.msk.f32.mxu1 %vm649_vm1, %v1878_v6  ;;  %v1879_v49 = vmul.f32 %v6334_v13, %v7266_v0 }
 0x5f0   :  { %v5992_v11 = vpack.c.bf16 %v6195_v9, %v6194_v10 }
 0x5f1   :  { %v6198_v39 = vpop.permute.xlu1 %6197  ;;  %v2502_v50 = vpop.permute.xlu0 %2501 }
 0x5f2   :  { %v6200_v14 = vunpack.i.h.bf16 %v6198_v39  ;;  %v6199_v40 = vunpack.i.l.bf16 %v6198_v39  ;;  %5993 = vmatprep.subr.bf16.mxu1 %v5992_v11 }
 0x5f3   :  { %5995 = vmatpush3.bf16.msra.mxu1 %v5992_v11 }
 0x5f4   :  { %v6336_v44 = vpop.eup %6335  ;;  %v6000_v21 = vpack.c.bf16 %v6200_v14, %v6199_v40 }
 0x5f5   :  { %v6203_v23 = vpop.permute.xlu1 %6202  ;;  %v1882_v24 = vmul.f32 %v6336_v44, %v7271_v25  ;;  %v6213_v58 = vpop.permute.xlu0 %6212 }
 0x5f6   :  { %v6205_v18 = vunpack.i.h.bf16 %v6203_v23  ;;  %v6204_v28 = vunpack.i.l.bf16 %v6203_v23  ;;  %5628 = vmatmul.mubr.msk.f32.vlgmr.msra.gmra.mrb[24].mxu1 %vm649_vm1, %v1879_v49  ;;  %6001 = vmatprep.subr.bf16.mxu1 %v6000_v21  ;;  %v6215_v61 = vunpack.i.h.bf16 %v6213_v58  ;;  %v6214_v60 = vunpack.i.l.bf16 %v6213_v58 }
 0x5f7   :  { %6003 = vmatpush3.bf16.msra.mxu1 %v6000_v21  ;;  %5641 = vmatprep.mubr.msk.f32.mxu1 %vm649_vm1, %v1882_v24 }
 0x5f8   :  { %v6338_v30 = vpop.eup %6337  ;;  %v6012_v31 = vpack.c.bf16 %v6205_v18, %v6204_v28  ;;  %v6024_v1 = vpack.c.bf16 %v6215_v61, %v6214_v60 }
 0x5f9   :  { %v6208_v46 = vpop.permute.xlu1 %6207  ;;  %v1883_v48 = vmul.f32 %v6338_v30, %v7275_v29  ;;  %v2595_v62 = vpop.permute.xlu0 %2594 }
 0x5fa   :  { %6014 = vmatprep.subr.msk.bf16.mxu1 %vm7001_vm2, %v6012_v31  ;;  %v6210_v0 = vunpack.i.h.bf16 %v6208_v46  ;;  %v6209_v52 = vunpack.i.l.bf16 %v6208_v46 }
 0x5fb   :  { %5642 = vmatmul.mubr.msk.f32.vlgmr.msra.gmra.mrb[26].mxu1 %vm649_vm1, %v1883_v48 }
 0x5fc   :  { %5680 = vmatprep.mubr.msk.f32.mxu1 %vm649_vm1, %v2502_v50  ;;  %v6018_v55 = vpack.c.bf16 %v6210_v0, %v6209_v52 }
 0x5fd   :  { %v2504_v25 = vpop.permute.xlu1 %2503  ;;  %v2684_v6 = vpop.permute.xlu0 %2683 }
 0x600   :  { %6017 = vmatpush3.bf16.xpose.msk.msra.mxu1 %vm7001_vm2, %v6012_v31 }
 0x601   :  { %6020 = vmatprep.subr.msk.bf16.mxu1 %vm7001_vm2, %v6018_v55  ;;  %v2593_v29 = vpop.permute.xlu1 %2592  ;;  %v2775_v11 = vpop.permute.xlu0 %2774 }
 0x605   :  { %v6218_v4 = vpop.permute.xlu1 %6217 }
 0x606   :  { %v6220_v63 = vunpack.i.h.bf16 %v6218_v4  ;;  %v6219_v5 = vunpack.i.l.bf16 %v6218_v4 }
 0x607   :  { %5681 = vmatmul.mubr.msk.f32.vlgmr.msra.gmra.mrb[28].mxu1 %vm649_vm1, %v2504_v25 }
 0x608   :  { %6023 = vmatpush3.bf16.xpose.msk.msra.mxu1 %vm7001_vm2, %v6018_v55  ;;  %5687 = vmatprep.mubr.msk.f32.mxu1 %vm649_vm1, %v2593_v29  ;;  %v6030_v9 = vpack.c.bf16 %v6220_v63, %v6219_v5 }
 0x609   :  { %6026 = vmatprep.subr.msk.bf16.mxu1 %vm7001_vm2, %v6024_v1  ;;  %v2686_v10 = vpop.permute.xlu1 %2685 }
 0x60d   :  { %v2777_v13 = vpop.permute.xlu1 %2776 }
 0x60f   :  { %5688 = vmatmul.mubr.msk.f32.vlgmr.msra.gmra.mrb[30].mxu1 %vm649_vm1, %v2595_v62 }
 0x610   :  { %6029 = vmatpush3.bf16.xpose.msk.msra.mxu1 %vm7001_vm2, %v6024_v1  ;;  %5694 = vmatprep.mubr.msk.f32.mxu1 %vm649_vm1, %v2684_v6 }
 0x611   :  { %6032 = vmatprep.subr.msk.bf16.mxu1 %vm7001_vm2, %v6030_v9 }
 0x617   :  { %5695 = vmatmul.mubr.msk.f32.vlgmr.msra.gmra.mrb[32].mxu1 %vm649_vm1, %v2686_v10 }
 0x618   :  { %6035 = vmatpush3.bf16.xpose.msk.msra.mxu1 %vm7001_vm2, %v6030_v9  ;;  %5701 = vmatprep.mubr.msk.f32.mxu1 %vm649_vm1, %v2775_v11 }
 0x61f   :  { %5702 = vmatmul.mubr.msk.f32.vlgmr.msra.gmra.mrb[34].mxu1 %vm649_vm1, %v2777_v13 }
 0x632   :  { %v1798_v39 = vpop.xlane.xlu0 %1797 }
 0x633   :  { %v1820_v14 = vsub.f32 %v7313_v51, %v1798_v39 }
 0x635   :  { %v1828_v40 = vmul.f32 1.442695, %v1820_v14 }
 0x636   :  { %v1810_v44 = vpop.xlane.xlu0 %1809 }
 0x637   :  { %6339 = vpow2.f32 %v1828_v40  ;;  %v1824_v49 = vsub.f32 %v7319_v53, %v1810_v44 }
 0x639   :  { %v1836_v21 = vmul.f32 1.442695, %v1824_v49 }
 0x63a   :  { %v1813_v23 = vpop.xlane.xlu0 %1812 }
 0x63b   :  { %6341 = vpow2.f32 %v1836_v21  ;;  %v1825_v24 = vsub.f32 %v7325_v57, %v1813_v23 }
 0x63d   :  { %v1838_v31 = vmul.f32 1.442695, %v1825_v24 }
 0x63e   :  { %v1801_v18 = vpop.xlane.xlu1 %1800 }
 0x63f   :  { %v1821_v28 = vsub.f32 %v7331_v59, %v1801_v18 }
 0x641   :  { %v6340_v30 = vpop.eup %6339  ;;  %v1830_v46 = vmul.f32 1.442695, %v1821_v28 }
 0x642   :  { %v1844_v48 = vsel %vm649_vm1, %v6340_v30, 0.0 }
 0x643   :  { %6343 = vpow2.f32 %v1830_v46  ;;  %1845 = vadd.xlane.f32.xlu0 %v1844_v48 }
 0x644   :  { %6345 = vpow2.f32 %v1838_v31 }
 0x645   :  { %v6342_v51 = vpop.eup %6341 }
 0x646   :  { %v1856_v50 = vsel %vm649_vm1, %v6342_v51, 0.0 }
 0x647   :  { %1857 = vadd.xlane.f32.xlu0 %v1856_v50 }
 0x64d   :  { %v6344_v53 = vpop.eup %6343 }
 0x64e   :  { %v1847_v0 = vsel %vm649_vm1, %v6344_v53, 0.0  ;;  %v6346_v52 = vpop.eup %6345 }
 0x64f   :  { %1848 = vadd.xlane.f32.xlu1 %v1847_v0  ;;  %v1859_v57 = vsel %vm649_vm1, %v6346_v52, 0.0 }
 0x653   :  { %1860 = vadd.xlane.f32.xlu1 %v1859_v57 }
 0x65d   :  { %6222 = vrot.lane.b32.xlu0 %v7146_v12, %s6702_s8 }
 0x664   :  { %6227 = vrot.lane.b32.xlu1 %v7154_v17, %s6702_s8 }
 0x6c9   :  { %v7378_v59 = vpop.f32.mrb[24].mxu1 }
 0x6ca   :  { %v7380_v25 = vpop.f32.mrb[25].mxu1 }
 0x6ce   :  { %v7382_v55 = vpop.f32.mrb[26].mxu1 }
 0x6cf   :  { %v7384_v58 = vpop.f32.mrb[27].mxu1 }
 0x6d0   :  { %v1846_v29 = vpop.xlane.xlu0 %1845 }
 0x6d1   :  { %6347 = vrcp.f32 %v1846_v29 }
 0x6d4   :  { %v1858_v61 = vpop.xlane.xlu0 %1857 }
 0x6d5   :  { %6349 = vrcp.f32 %v1858_v61 }
 0x6d8   :  { %v6223_v60 = vpop.permute.xlu0 %6222 }
 0x6d9   :  { %v6225_v1 = vunpack.i.h.bf16 %v6223_v60  ;;  %v6224_v4 = vunpack.i.l.bf16 %v6223_v60 }
 0x6da   :  { %v5682_v62 = vpop.f32.mrb[28].mxu1 }
 0x6db   :  { %v6348_v63 = vpop.eup %6347  ;;  %v5988_v5 = vpack.c.bf16 %v6225_v1, %v6224_v4  ;;  %v7388_v6 = vsel %vm7088_vm4, -inf, %v5682_v62  ;;  %v2583_v9 = vpop.f32.mrb[29].mxu1 }
 0x6dc   :  { %v7392_v10 = vsel %vm7084_vm3, -inf, %v2583_v9  ;;  %v1849_v11 = vpop.xlane.xlu1 %1848  ;;  %v2876_v13 = vsel %vm649_vm1, %v7388_v6, -inf  ;;  %v1876_v39 = vmul.f32 %v6348_v63, %v6340_v30 }
 0x6dd   :  { %6351 = vrcp.f32 %v1849_v11  ;;  %5989 = vmatprep.subr.bf16.mxu0 %v5988_v5  ;;  %2877 = vmax.xlane.f32.xlu0 %v2876_v13  ;;  %v2873_v14 = vsel %vm649_vm1, %v7392_v10, -inf }
 0x6de   :  { %5991 = vmatpush3.bf16.msra.mxu0 %v5988_v5  ;;  %5620 = vmatprep.mubr.msk.f32.mxu0 %vm649_vm1, %v1876_v39  ;;  %v2241_v39 = vld [vmem:[#allocation13 + $0x10] sm:$0xff] }
 0x6df   :  { %2874 = vmax.xlane.f32.xlu1 %v2873_v14  ;;  %v6350_v46 = vpop.eup %6349  ;;  %v2242_v14 = vld [vmem:[#allocation13 + $0x18] sm:$0xff] }
 0x6e0   :  { %v1861_v40 = vpop.xlane.xlu1 %1860  ;;  %v1880_v57 = vmul.f32 %v6350_v46, %v6342_v51 }
 0x6e1   :  { %6353 = vrcp.f32 %v1861_v40  ;;  %v6004_v40 = vpack.c.bf16 %v2242_v14, %v2241_v39 }
 0x6e2   :  { %v5689_v44 = vpop.f32.mrb[30].mxu1 }
 0x6e3   :  { %v2868_v49 = vsel %vm7088_vm4, -inf, %v5689_v44  ;;  %v2674_v21 = vpop.f32.mrb[31].mxu1  ;;  %v1422_v44 = vld [vmem:[#allocation13] sm:$0xff] }
 0x6e4   :  { %v2867_v23 = vsel %vm7084_vm3, -inf, %v2674_v21  ;;  %v6228_v24 = vpop.permute.xlu1 %6227  ;;  %v2882_v18 = vsel %vm649_vm1, %v2868_v49, -inf  ;;  %v1423_v21 = vld [vmem:[#allocation13 + $0x8] sm:$0xff] }
 0x6e5   :  { %v6230_v28 = vunpack.i.h.bf16 %v6228_v24  ;;  %v6229_v30 = vunpack.i.l.bf16 %v6228_v24  ;;  %2883 = vmax.xlane.f32.xlu1 %v2882_v18  ;;  %v2879_v31 = vsel %vm649_vm1, %v2867_v23, -inf  ;;  %v7420_v24 = vpack.c.bf16 %v1423_v21, %v1422_v44 }
 0x6e6   :  { %2880 = vmax.xlane.f32.xlu0 %v2879_v31 }
 0x6e7   :  { %v6352_v48 = vpop.eup %6351  ;;  %v5996_v50 = vpack.c.bf16 %v6230_v28, %v6229_v30 }
 0x6e8   :  { %v1877_v0 = vmul.f32 %v6352_v48, %v6344_v53 }
 0x6e9   :  { %5997 = vmatprep.subr.bf16.mxu0 %v5996_v50 }
 0x6ea   :  { %5621 = vmatmul.mubr.msk.f32.vlgmr.msra.gmra.mrb[24].mxu0 %vm649_vm1, %v1877_v0  ;;  %v5696_v29 = vpop.f32.mrb[32].mxu1 }
 0x6eb   :  { %v6354_v61 = vpop.eup %6353  ;;  %5999 = vmatpush3.bf16.msra.mxu0 %v5996_v50  ;;  %v2870_v60 = vsel %vm7088_vm4, -inf, %v5696_v29  ;;  %5634 = vmatprep.mubr.msk.f32.mxu0 %vm649_vm1, %v1880_v57  ;;  %v2765_v1 = vpop.f32.mrb[33].mxu1 }
 0x6ec   :  { %v1881_v4 = vmul.f32 %v6354_v61, %v6346_v52  ;;  %v2869_v62 = vsel %vm7084_vm3, -inf, %v2765_v1  ;;  %v2888_v63 = vsel %vm649_vm1, %v2870_v60, -inf  ;;  %6005 = vmatprep.subr.bf16.mxu0 %v6004_v40 }
 0x6ed   :  { %2889 = vmax.xlane.f32.xlu1 %v2888_v63  ;;  %v2885_v51 = vsel %vm649_vm1, %v2869_v62, -inf }
 0x6ee   :  { %5635 = vmatmul.mubr.msk.f32.vlgmr.msra.gmra.mrb[26].mxu0 %vm649_vm1, %v1881_v4  ;;  %2886 = vmax.xlane.f32.xlu0 %v2885_v51 }
 0x6ef   :  { %6007 = vmatpush3.bf16.msra.mxu0 %v6004_v40 }
 0x6f0   :  { %6009 = vmatprep.subr.bf16.mxu0 %v7420_v24 }
 0x6f2   :  { %v5703_v53 = vpop.f32.mrb[34].mxu1 }
 0x6f3   :  { %v2872_v5 = vsel %vm7088_vm4, -inf, %v5703_v53  ;;  %v2856_v9 = vpop.f32.mrb[35].mxu1 }
 0x6f4   :  { %v2871_v11 = vsel %vm7084_vm3, -inf, %v2856_v9  ;;  %v2894_v52 = vsel %vm649_vm1, %v2872_v5, -inf }
 0x6f5   :  { %2895 = vmax.xlane.f32.xlu1 %v2894_v52  ;;  %v2891_v13 = vsel %vm649_vm1, %v2871_v11, -inf }
 0x6f6   :  { %2892 = vmax.xlane.f32.xlu0 %v2891_v13 }
 0x76a   :  { %v2878_v18 = vpop.xlane.xlu0 %2877 }
 0x76b   :  { %v2898_v28 = vsub.f32 %v7388_v6, %v2878_v18 }
 0x76c   :  { %v2875_v30 = vpop.xlane.xlu1 %2874 }
 0x76d   :  { %v2907_v31 = vmul.f32 1.442695, %v2898_v28  ;;  %v2897_v46 = vsub.f32 %v7392_v10, %v2875_v30 }
 0x76f   :  { %6355 = vpow2.f32 %v2907_v31  ;;  %v2905_v48 = vmul.f32 1.442695, %v2897_v46 }
 0x771   :  { %6357 = vpow2.f32 %v2905_v48 }
 0x772   :  { %v2884_v50 = vpop.xlane.xlu1 %2883 }
 0x773   :  { %v2900_v0 = vsub.f32 %v2868_v49, %v2884_v50  ;;  %v2881_v57 = vpop.xlane.xlu0 %2880 }
 0x774   :  { %v2899_v29 = vsub.f32 %v2867_v23, %v2881_v57 }
 0x775   :  { %v2911_v61 = vmul.f32 1.442695, %v2900_v0 }
 0x776   :  { %v2909_v1 = vmul.f32 1.442695, %v2899_v29 }
 0x777   :  { %6359 = vpow2.f32 %v2911_v61 }
 0x778   :  { %6361 = vpow2.f32 %v2909_v1 }
 0x779   :  { %v7425_v4 = vpop.eup %6355 }
 0x77a   :  { %v2890_v63 = vpop.xlane.xlu1 %2889  ;;  %v2924_v6 = vsel %vm649_vm1, %v7425_v4, 0.0 }
 0x77b   :  { %v7429_v51 = vpop.eup %6357  ;;  %v2902_v10 = vsub.f32 %v2870_v60, %v2890_v63  ;;  %v2887_v53 = vpop.xlane.xlu0 %2886  ;;  %2925 = vadd.xlane.f32.xlu1 %v2924_v6 }
 0x77c   :  { %v2901_v9 = vsub.f32 %v2869_v62, %v2887_v53  ;;  %v2921_v49 = vsel %vm649_vm1, %v7429_v51, 0.0 }
 0x77d   :  { %v2915_v23 = vmul.f32 1.442695, %v2902_v10  ;;  %2922 = vadd.xlane.f32.xlu0 %v2921_v49  ;;  %v3311_v10 = vld [vmem:[#allocation13 + $0x28] sm:$0xff] }
 0x77e   :  { %v2913_v52 = vmul.f32 1.442695, %v2901_v9 }
 0x77f   :  { %6363 = vpow2.f32 %v2915_v23 }
 0x780   :  { %6365 = vpow2.f32 %v2913_v52 }
 0x781   :  { %v7433_v13 = vpop.eup %6359 }
 0x782   :  { %v7435_v39 = vpop.eup %6361  ;;  %v2896_v14 = vpop.xlane.xlu1 %2895  ;;  %v2930_v40 = vsel %vm649_vm1, %v7433_v13, 0.0 }
 0x783   :  { %v2904_v60 = vsub.f32 %v2872_v5, %v2896_v14  ;;  %2931 = vadd.xlane.f32.xlu1 %v2930_v40  ;;  %v2893_v44 = vpop.xlane.xlu0 %2892  ;;  %v2927_v62 = vsel %vm649_vm1, %v7435_v39, 0.0 }
 0x784   :  { %v2903_v21 = vsub.f32 %v2871_v11, %v2893_v44  ;;  %2928 = vadd.xlane.f32.xlu0 %v2927_v62 }
 0x785   :  { %v2919_v18 = vmul.f32 1.442695, %v2904_v60 }
 0x786   :  { %v2917_v28 = vmul.f32 1.442695, %v2903_v21 }
 0x787   :  { %6367 = vpow2.f32 %v2919_v18 }
 0x788   :  { %6369 = vpow2.f32 %v2917_v28 }
 0x789   :  { %v7441_v30 = vpop.eup %6363 }
 0x78a   :  { %v7443_v31 = vpop.eup %6365  ;;  %v2936_v46 = vsel %vm649_vm1, %v7441_v30, 0.0 }
 0x78b   :  { %2937 = vadd.xlane.f32.xlu1 %v2936_v46  ;;  %v2933_v5 = vsel %vm649_vm1, %v7443_v31, 0.0 }
 0x78c   :  { %2934 = vadd.xlane.f32.xlu0 %v2933_v5 }
 0x791   :  { %v7449_v48 = vpop.eup %6367 }
 0x792   :  { %v7451_v11 = vpop.eup %6369  ;;  %v2942_v50 = vsel %vm649_vm1, %v7449_v48, 0.0 }
 0x793   :  { %2943 = vadd.xlane.f32.xlu1 %v2942_v50  ;;  %v2939_v0 = vsel %vm649_vm1, %v7451_v11, 0.0 }
 0x794   :  { %2940 = vadd.xlane.f32.xlu0 %v2939_v0 }
 0x7a4   :  { %6237 = vrot.lane.b32.xlu1 %v7152_v15, %s6703_s7 }
 0x7a8   :  { %6242 = vrot.lane.b32.xlu1 %v7154_v17, %s6703_s7 }
 0x7aa   :  { %6232 = vrot.lane.b32.xlu0 %v7146_v12, %s6703_s7 }
 0x7ac   :  { %6247 = vrot.lane.b32.xlu1 %v7162_v42, %s6703_s7 }
 0x7ae   :  { %6252 = vrot.lane.b32.xlu0 %v7007_v8, %s6704_s20 }
 0x7b0   :  { %6257 = vrot.lane.b32.xlu1 %v7015_v16, %s6704_s20 }
 0x7b2   :  { %3449 = vrot.lane.b32.xlu0 %v7005_v7, %s6704_s20 }
 0x7b4   :  { %3451 = vrot.lane.b32.xlu1 %v7017_v19, %s6704_s20 }
 0x7b6   :  { %6262 = vrot.lane.b32.xlu0 %v7025_v27, %s6704_s20 }
 0x7b8   :  { %6267 = vrot.lane.b32.xlu1 %v7039_v34, %s6704_s20 }
 0x7ba   :  { %3540 = vrot.lane.b32.xlu0 %v7021_v22, %s6704_s20 }
 0x7bc   :  { %3542 = vrot.lane.b32.xlu1 %v7045_v36, %s6704_s20 }
 0x7bd   :  { %v5622_v8 = vpop.f32.mrb[24].mxu0 }
 0x7be   :  { %v1964_v16 = vpop.f32.mrb[25].mxu0  ;;  %3631 = vrot.lane.b32.xlu0 %v7023_v26, %s6704_s20 }
 0x7bf   :  { %5648 = vmatprep.mubr.msk.f32.mxu0 %vm649_vm1, %v1964_v16 }
 0x7c0   :  { %5649 = vmatmul.mubr.msk.f32.vlgmr.msra.gmra.mrb[28].mxu0 %vm649_vm1, %v5622_v8  ;;  %3633 = vrot.lane.b32.xlu1 %v7043_v35, %s6704_s20 }
 0x7c1   :  { %v5636_v7 = vpop.f32.mrb[26].mxu0  ;;  %5651 = vmatprep.mubr.msk.f32.mxu0 %vm649_vm1, %v7380_v25  ;;  %6011 = vmatpush3.bf16.msra.mxu0 %v7420_v24 }
 0x7c2   :  { %v2142_v19 = vpop.f32.mrb[27].mxu0  ;;  %3722 = vrot.lane.b32.xlu0 %v7047_v37, %s6704_s20 }
 0x7c4   :  { %5652 = vmatmul.mubr.msk.f32.gmra.mrb[30].mxu0 %vm649_vm1, %v7378_v59  ;;  %3724 = vrot.lane.b32.xlu1 %v7057_v38, %s6704_s20 }
 0x7c5   :  { %5654 = vmatprep.mubr.msk.f32.mxu0 %vm649_vm1, %v2142_v19 }
 0x7c8   :  { %5655 = vmatmul.mubr.msk.f32.gmra.mrb[32].mxu0 %vm649_vm1, %v5636_v7 }
 0x7c9   :  { %5657 = vmatprep.mubr.msk.f32.mxu0 %vm649_vm1, %v7384_v58 }
 0x7cc   :  { %5658 = vmatmul.mubr.msk.f32.gmra.mrb[34].mxu0 %vm649_vm1, %v7382_v55 }
 0x7cd   :  { %5664 = vmatprep.mubr.msk.f32.mxu0 %vm649_vm1, %v7230_v43 }
 0x7d0   :  { %5665 = vmatmul.mubr.msk.f32.vlgmr.msra.gmra.mrb[28].mxu0 %vm649_vm1, %v7228_v41 }
 0x7d1   :  { %5667 = vmatprep.mubr.msk.f32.mxu0 %vm649_vm1, %v7234_v47 }
 0x7d4   :  { %5668 = vmatmul.mubr.msk.f32.gmra.mrb[30].mxu0 %vm649_vm1, %v7232_v45 }
 0x7d5   :  { %5670 = vmatprep.mubr.msk.f32.mxu0 %vm649_vm1, %v7303_v33 }
 0x7d8   :  { %5671 = vmatmul.mubr.msk.f32.gmra.mrb[32].mxu0 %vm649_vm1, %v7299_v32 }
 0x7d9   :  { %5673 = vmatprep.mubr.msk.f32.mxu0 %vm649_vm1, %v7238_v20 }
 0x7dc   :  { %5674 = vmatmul.mubr.msk.f32.gmra.mrb[34].mxu0 %vm649_vm1, %v7236_v2 }
 0x808   :  { %v2926_v27 = vpop.xlane.xlu1 %2925 }
 0x80a   :  { %v2923_v22 = vpop.xlane.xlu0 %2922 }
 0x80b   :  { %6371 = vrcp.f32 %v2923_v22 }
 0x810   :  { %v2932_v36 = vpop.xlane.xlu1 %2931 }
 0x811   :  { %v2929_v26 = vpop.xlane.xlu0 %2928 }
 0x812   :  { %6373 = vrcp.f32 %v2929_v26 }
 0x813   :  { %6375 = vrcp.f32 %v2926_v27 }
 0x814   :  { %6377 = vrcp.f32 %v2932_v36 }
 0x815   :  { %v6372_v34 = vpop.eup %6371 }
 0x816   :  { %v2953_v35 = vmul.f32 %v6372_v34, %v7429_v51  ;;  %v3310_v51 = vld [vmem:[#allocation13 + $0x20] sm:$0xff] }
 0x817   :  { %v6052_v40 = vpack.c.bf16 %v3311_v10, %v3310_v51 }
 0x818   :  { %5708 = vmatprep.mubr.msk.f32.mxu0 %vm649_vm1, %v2953_v35  ;;  %v2938_v38 = vpop.xlane.xlu1 %2937 }
 0x819   :  { %v2935_v41 = vpop.xlane.xlu0 %2934 }
 0x81a   :  { %6379 = vrcp.f32 %v2935_v41 }
 0x81c   :  { %v6374_v37 = vpop.eup %6373 }
 0x81d   :  { %v2955_v43 = vmul.f32 %v6374_v37, %v7435_v39  ;;  %v6376_v55 = vpop.eup %6375 }
 0x81e   :  { %v6378_v24 = vpop.eup %6377  ;;  %v2954_v23 = vmul.f32 %v6376_v55, %v7425_v4 }
 0x81f   :  { %5715 = vmatprep.mubr.msk.f32.mxu1 %vm649_vm1, %v2955_v43  ;;  %v2956_v53 = vmul.f32 %v6378_v24, %v7433_v13 }
 0x820   :  { %v2944_v45 = vpop.xlane.xlu1 %2943 }
 0x821   :  { %v2941_v47 = vpop.xlane.xlu0 %2940 }
 0x822   :  { %6381 = vrcp.f32 %v2941_v47 }
 0x823   :  { %6383 = vrcp.f32 %v2938_v38 }
 0x824   :  { %v6238_v2 = vpop.permute.xlu1 %6237  ;;  %6385 = vrcp.f32 %v2944_v45  ;;  %v6380_v61 = vpop.eup %6379 }
 0x825   :  { %v6240_v20 = vunpack.i.h.bf16 %v6238_v2  ;;  %v6239_v32 = vunpack.i.l.bf16 %v6238_v2  ;;  %v6233_v33 = vpop.permute.xlu0 %6232  ;;  %v2957_v14 = vmul.f32 %v6380_v61, %v7443_v31 }
 0x826   :  { %v6235_v59 = vunpack.i.h.bf16 %v6233_v33  ;;  %v6234_v25 = vunpack.i.l.bf16 %v6233_v33 }
 0x827   :  { %v6040_v58 = vpack.c.bf16 %v6240_v20, %v6239_v32 }
 0x828   :  { %v6036_v57 = vpack.c.bf16 %v6235_v59, %v6234_v25  ;;  %v6243_v29 = vpop.permute.xlu1 %6242 }
 0x829   :  { %v6245_v1 = vunpack.i.h.bf16 %v6243_v29  ;;  %v6244_v63 = vunpack.i.l.bf16 %v6243_v29  ;;  %6041 = vmatprep.subr.bf16.mxu1 %v6040_v58  ;;  %v6253_v6 = vpop.permute.xlu0 %6252 }
 0x82a   :  { %6037 = vmatprep.subr.bf16.mxu0 %v6036_v57  ;;  %6043 = vmatpush3.bf16.msra.mxu1 %v6040_v58  ;;  %v6255_v52 = vunpack.i.h.bf16 %v6253_v6  ;;  %v6254_v44 = vunpack.i.l.bf16 %v6253_v6 }
 0x82b   :  { %v6044_v9 = vpack.c.bf16 %v6245_v1, %v6244_v63  ;;  %6039 = vmatpush3.bf16.msra.mxu0 %v6036_v57 }
 0x82c   :  { %v6382_v49 = vpop.eup %6381  ;;  %v6248_v39 = vpop.permute.xlu1 %6247  ;;  %v6056_v5 = vpack.c.bf16 %v6255_v52, %v6254_v44 }
 0x82d   :  { %v6384_v60 = vpop.eup %6383  ;;  %v6250_v62 = vunpack.i.h.bf16 %v6248_v39  ;;  %v6249_v21 = vunpack.i.l.bf16 %v6248_v39  ;;  %5716 = vmatmul.mubr.msk.f32.vlgmr.msra.gmra.mrb[36].mxu1 %vm649_vm1, %v2956_v53  ;;  %v3450_v18 = vpop.permute.xlu0 %3449  ;;  %6045 = vmatprep.subr.bf16.mxu0 %v6044_v9  ;;  %v2959_v13 = vmul.f32 %v6382_v49, %v7451_v11 }
 0x82e   :  { %5709 = vmatmul.mubr.msk.f32.vlgmr.msra.gmra.mrb[36].mxu0 %vm649_vm1, %v2954_v23  ;;  %v6386_v4 = vpop.eup %6385  ;;  %v2958_v31 = vmul.f32 %v6384_v60, %v7441_v30 }
 0x82f   :  { %v6048_v28 = vpack.c.bf16 %v6250_v62, %v6249_v21  ;;  %6047 = vmatpush3.bf16.msra.mxu0 %v6044_v9  ;;  %5722 = vmatprep.mubr.msk.f32.mxu0 %vm649_vm1, %v2957_v14  ;;  %v2960_v11 = vmul.f32 %v6386_v4, %v7449_v48 }
 0x830   :  { %5729 = vmatprep.mubr.msk.f32.mxu1 %vm649_vm1, %v2959_v13  ;;  %v6258_v46 = vpop.permute.xlu1 %6257  ;;  %6053 = vmatprep.subr.bf16.mxu0 %v6052_v40 }
 0x831   :  { %6049 = vmatprep.subr.bf16.mxu1 %v6048_v28  ;;  %v6263_v50 = vpop.permute.xlu0 %6262  ;;  %v6260_v7 = vunpack.i.h.bf16 %v6258_v46  ;;  %v6259_v19 = vunpack.i.l.bf16 %v6258_v46 }
 0x832   :  { %v6265_v0 = vunpack.i.h.bf16 %v6263_v50  ;;  %v6264_v8 = vunpack.i.l.bf16 %v6263_v50  ;;  %5723 = vmatmul.mubr.msk.f32.vlgmr.msra.gmra.mrb[38].mxu0 %vm649_vm1, %v2958_v31  ;;  %6051 = vmatpush3.bf16.msra.mxu1 %v6048_v28 }
 0x833   :  { %6058 = vmatprep.subr.msk.bf16.mxu1 %vm7001_vm2, %v6056_v5  ;;  %6055 = vmatpush3.bf16.msra.mxu0 %v6052_v40  ;;  %v6062_v22 = vpack.c.bf16 %v6260_v7, %v6259_v19 }
 0x834   :  { %v6068_v16 = vpack.c.bf16 %v6265_v0, %v6264_v8  ;;  %v3452_v30 = vpop.permute.xlu1 %3451 }
 0x835   :  { %5730 = vmatmul.mubr.msk.f32.vlgmr.msra.gmra.mrb[38].mxu1 %vm649_vm1, %v2960_v11  ;;  %v3541_v48 = vpop.permute.xlu0 %3540 }
 0x836   :  { %5752 = vmatprep.mubr.msk.f32.mxu1 %vm649_vm1, %v3450_v18  ;;  %6070 = vmatprep.subr.msk.bf16.mxu0 %vm7001_vm2, %v6068_v16 }
 0x838   :  { %v6268_v26 = vpop.permute.xlu1 %6267 }
 0x839   :  { %v6270_v27 = vunpack.i.h.bf16 %v6268_v26  ;;  %v6269_v34 = vunpack.i.l.bf16 %v6268_v26  ;;  %v3632_v36 = vpop.permute.xlu0 %3631 }
 0x83b   :  { %6061 = vmatpush3.bf16.xpose.msk.msra.mxu1 %vm7001_vm2, %v6056_v5  ;;  %v6074_v35 = vpack.c.bf16 %v6270_v27, %v6269_v34 }
 0x83c   :  { %6064 = vmatprep.subr.msk.bf16.mxu1 %vm7001_vm2, %v6062_v22  ;;  %v3543_v37 = vpop.permute.xlu1 %3542 }
 0x83d   :  { %v3723_v38 = vpop.permute.xlu0 %3722 }
 0x840   :  { %v3634_v41 = vpop.permute.xlu1 %3633 }
 0x842   :  { %5753 = vmatmul.mubr.msk.f32.vlgmr.msra.gmra.mrb[40].mxu1 %vm649_vm1, %v3452_v30 }
 0x843   :  { %6067 = vmatpush3.bf16.xpose.msk.msra.mxu1 %vm7001_vm2, %v6062_v22  ;;  %5759 = vmatprep.mubr.msk.f32.mxu1 %vm649_vm1, %v3541_v48 }
 0x844   :  { %6076 = vmatprep.subr.msk.bf16.mxu1 %vm7001_vm2, %v6074_v35  ;;  %v3725_v43 = vpop.permute.xlu1 %3724 }
 0x84a   :  { %5760 = vmatmul.mubr.msk.f32.vlgmr.msra.gmra.mrb[42].mxu1 %vm649_vm1, %v3543_v37 }
 0x84b   :  { %6079 = vmatpush3.bf16.xpose.msk.msra.mxu1 %vm7001_vm2, %v6074_v35  ;;  %5773 = vmatprep.mubr.msk.f32.mxu1 %vm649_vm1, %v3723_v38 }
 0x852   :  { %5774 = vmatmul.mubr.msk.f32.vlgmr.msra.gmra.mrb[44].mxu1 %vm649_vm1, %v3725_v43 }
 0x900   :  { %v5717_v45 = vpop.f32.mrb[36].mxu1 }
 0x901   :  { %v5710_v47 = vpop.f32.mrb[36].mxu0  ;;  %v3126_v2 = vpop.f32.mrb[37].mxu1 }
 0x902   :  { %v3039_v20 = vpop.f32.mrb[37].mxu0 }
 0x903   :  { %5736 = vmatprep.mubr.msk.f32.mxu0 %vm649_vm1, %v3039_v20 }
 0x904   :  { %5737 = vmatmul.mubr.msk.f32.vlgmr.msra.gmra.mrb[28].mxu0 %vm649_vm1, %v5710_v47 }
 0x905   :  { %6073 = vmatpush3.bf16.xpose.msk.msra.mxu0 %vm7001_vm2, %v6068_v16  ;;  %v5724_v32 = vpop.f32.mrb[38].mxu0  ;;  %5739 = vmatprep.mubr.msk.f32.mxu0 %vm649_vm1, %v3126_v2 }
 0x906   :  { %v3213_v33 = vpop.f32.mrb[39].mxu0 }
 0x908   :  { %v5731_v59 = vpop.f32.mrb[38].mxu1  ;;  %5740 = vmatmul.mubr.msk.f32.gmra.mrb[30].mxu0 %vm649_vm1, %v5717_v45 }
 0x909   :  { %v3300_v25 = vpop.f32.mrb[39].mxu1  ;;  %5742 = vmatprep.mubr.msk.f32.mxu0 %vm649_vm1, %v3213_v33 }
 0x90c   :  { %5743 = vmatmul.mubr.msk.f32.gmra.mrb[32].mxu0 %vm649_vm1, %v5724_v32 }
 0x90d   :  { %5745 = vmatprep.mubr.msk.f32.mxu0 %vm649_vm1, %v3300_v25 }
 0x910   :  { %5746 = vmatmul.mubr.msk.f32.gmra.mrb[34].mxu0 %vm649_vm1, %v5731_v59 }
 0x911   :  { %5766 = vmatprep.mubr.msk.f32.mxu0 %vm649_vm1, %v3632_v36 }
 0x914   :  { %5767 = vmatmul.mubr.msk.f32.vlgmr.msra.gmra.mrb[40].mxu0 %vm649_vm1, %v3634_v41 }
 0x915   :  { %v5754_v3 = vpop.f32.mrb[40].mxu1 }
 0x916   :  { %v3814_v55 = vsel %vm7088_vm4, -inf, %v5754_v3  ;;  %v3531_v58 = vpop.f32.mrb[41].mxu1 }
 0x917   :  { %v3813_v24 = vsel %vm7084_vm3, -inf, %v3531_v58  ;;  %v3824_v57 = vsel %vm649_vm1, %v3814_v55, -inf }
 0x918   :  { %3825 = vmax.xlane.f32.xlu1 %v3824_v57  ;;  %v3821_v29 = vsel %vm649_vm1, %v3813_v24, -inf }
 0x919   :  { %3822 = vmax.xlane.f32.xlu0 %v3821_v29 }
 0x91d   :  { %v5761_v61 = vpop.f32.mrb[42].mxu1 }
 0x91e   :  { %v3816_v1 = vsel %vm7088_vm4, -inf, %v5761_v61  ;;  %v3622_v63 = vpop.f32.mrb[43].mxu1 }
 0x91f   :  { %v3830_v6 = vsel %vm649_vm1, %v3816_v1, -inf  ;;  %v3815_v51 = vsel %vm7084_vm3, -inf, %v3622_v63 }
 0x920   :  { %3831 = vmax.xlane.f32.xlu0 %v3830_v6  ;;  %v3827_v10 = vsel %vm649_vm1, %v3815_v51, -inf }
 0x924   :  { %3828 = vmax.xlane.f32.xlu0 %v3827_v10 }
 0x925   :  { %v5775_v53 = vpop.f32.mrb[44].mxu1 }
 0x926   :  { %v3804_v9 = vpop.f32.mrb[45].mxu1  ;;  %v3820_v50 = vsel %vm7088_vm4, -inf, %v5775_v53 }
 0x927   :  { %v3819_v8 = vsel %vm7084_vm3, -inf, %v3804_v9  ;;  %v3842_v11 = vsel %vm649_vm1, %v3820_v50, -inf }
 0x928   :  { %v3839_v30 = vsel %vm649_vm1, %v3819_v8, -inf }
 0x9a5   :  { %v3826_v52 = vpop.xlane.xlu1 %3825 }
 0x9a6   :  { %v3823_v49 = vpop.xlane.xlu0 %3822  ;;  %v3846_v39 = vsub.f32 %v3814_v55, %v3826_v52 }
 0x9a7   :  { %v3845_v14 = vsub.f32 %v3813_v24, %v3823_v49 }
 0x9a8   :  { %v3855_v60 = vmul.f32 1.442695, %v3846_v39 }
 0x9a9   :  { %v3853_v62 = vmul.f32 1.442695, %v3845_v14 }
 0x9aa   :  { %6387 = vpow2.f32 %v3855_v60 }
 0x9ab   :  { %6389 = vpow2.f32 %v3853_v62 }
 0x9ad   :  { %v3832_v23 = vpop.xlane.xlu0 %3831 }
 0x9ae   :  { %v3848_v44 = vsub.f32 %v3816_v1, %v3832_v23 }
 0x9b0   :  { %v3859_v18 = vmul.f32 1.442695, %v3848_v44 }
 0x9b1   :  { %v3829_v40 = vpop.xlane.xlu0 %3828 }
 0x9b2   :  { %v3847_v21 = vsub.f32 %v3815_v51, %v3829_v40  ;;  %6391 = vpow2.f32 %v3859_v18 }
 0x9b4   :  { %v3857_v13 = vmul.f32 1.442695, %v3847_v21  ;;  %v7589_v16 = vpop.eup %6387 }
 0x9b5   :  { %v6390_v7 = vpop.eup %6389  ;;  %v3872_v56 = vsel %vm649_vm1, %v7589_v16, 0.0 }
 0x9b6   :  { %6393 = vpow2.f32 %v3857_v13  ;;  %v3869_v22 = vsel %vm649_vm1, %v6390_v7, 0.0 }
 0x9bc   :  { %v7594_v19 = vpop.eup %6391 }
 0x9bd   :  { %v3878_v26 = vsel %vm649_vm1, %v7594_v19, 0.0 }
 0x9c0   :  { %v7597_v54 = vpop.eup %6393 }
 0x9c1   :  { %v3875_v48 = vsel %vm649_vm1, %v7597_v54, 0.0 }
 0x9e7   :  { %v5768_v28 = vpop.f32.mrb[40].mxu0 }
 0x9e8   :  { %v3818_v4 = vsel %vm7088_vm4, -inf, %v5768_v28  ;;  %v3713_v31 = vpop.f32.mrb[41].mxu0 }
 0x9e9   :  { %v3817_v46 = vsel %vm7084_vm3, -inf, %v3713_v31  ;;  %v3836_v5 = vsel %vm649_vm1, %v3818_v4, -inf }
 0x9ea   :  { %3837 = vmax.xlane.f32.xlu1 %v3836_v5  ;;  %v3833_v0 = vsel %vm649_vm1, %v3817_v46, -inf }
 0x9eb   :  { %3834 = vmax.xlane.f32.xlu0 %v3833_v0 }
 0x9ee   :  { %3843 = vmax.xlane.f32.xlu1 %v3842_v11  ;;  %v4259_v11 = vld [vmem:[#allocation13 + $0x38] sm:$0xff] }
 0x9ef   :  { %3840 = vmax.xlane.f32.xlu0 %v3839_v30 }
 0x9f2   :  { %3873 = vadd.xlane.f32.xlu1 %v3872_v56 }
 0x9f3   :  { %3870 = vadd.xlane.f32.xlu0 %v3869_v22 }
 0x9f6   :  { %3879 = vadd.xlane.f32.xlu1 %v3878_v26 }
 0x9f7   :  { %3876 = vadd.xlane.f32.xlu0 %v3875_v48 }
 0xa77   :  { %v3838_v27 = vpop.xlane.xlu1 %3837 }
 0xa78   :  { %v3850_v34 = vsub.f32 %v3818_v4, %v3838_v27  ;;  %v3835_v35 = vpop.xlane.xlu0 %3834 }
 0xa79   :  { %v3849_v36 = vsub.f32 %v3817_v46, %v3835_v35 }
 0xa7a   :  { %v3863_v37 = vmul.f32 1.442695, %v3850_v34 }
 0xa7b   :  { %v3844_v38 = vpop.xlane.xlu1 %3843  ;;  %v3861_v47 = vmul.f32 1.442695, %v3849_v36 }
 0xa7c   :  { %v3852_v41 = vsub.f32 %v3820_v50, %v3844_v38  ;;  %v3841_v43 = vpop.xlane.xlu0 %3840  ;;  %6395 = vpow2.f32 %v3863_v37 }
 0xa7d   :  { %v3851_v45 = vsub.f32 %v3819_v8, %v3841_v43  ;;  %v4258_v8 = vld [vmem:[#allocation13 + $0x30] sm:$0xff]  ;;  %v5177_v43 = vld [vmem:[%s7860_s10] ss:$0 sm:$0xff] }
 0xa7e   :  { %v3867_v2 = vmul.f32 1.442695, %v3852_v41  ;;  %v6096_v22 = vpack.c.bf16 %v4259_v11, %v4258_v8 }
 0xa7f   :  { %v3865_v20 = vmul.f32 1.442695, %v3851_v45  ;;  %v3874_v1 = vpop.xlane.xlu1 %3873 }
 0xa80   :  { %6397 = vpow2.f32 %v3867_v2  ;;  %v3871_v32 = vpop.xlane.xlu0 %3870 }
 0xa81   :  { %6399 = vpow2.f32 %v3865_v20 }
 0xa82   :  { %6401 = vpow2.f32 %v3861_v47 }
 0xa83   :  { %6403 = vrcp.f32 %v3871_v32  ;;  %v3880_v63 = vpop.xlane.xlu1 %3879  ;;  %v6451_v32 = vld [vmem:[#allocation2 + $0x8] sm:$0xff] }
 0xa84   :  { %v3877_v6 = vpop.xlane.xlu0 %3876  ;;  %6405 = vrcp.f32 %v3874_v1 }
 0xa85   :  { %6407 = vrcp.f32 %v3877_v6 }
 0xa86   :  { %v7603_v33 = vpop.eup %6395 }
 0xa87   :  { %v3884_v29 = vsel %vm649_vm1, %v7603_v33, 0.0 }
 0xa8a   :  { %v7605_v59 = vpop.eup %6397 }
 0xa8b   :  { %v7607_v25 = vpop.eup %6399  ;;  %v3890_v3 = vsel %vm649_vm1, %v7605_v59, 0.0 }
 0xa8c   :  { %v6402_v55 = vpop.eup %6401  ;;  %3891 = vadd.xlane.f32.xlu1 %v3890_v3  ;;  %v3887_v58 = vsel %vm649_vm1, %v7607_v25, 0.0 }
 0xa8d   :  { %v6404_v24 = vpop.eup %6403  ;;  %3888 = vadd.xlane.f32.xlu0 %v3887_v58  ;;  %v3881_v61 = vsel %vm649_vm1, %v6402_v55, 0.0 }
 0xa8e   :  { %v3901_v57 = vmul.f32 %v6404_v24, %v6390_v7  ;;  %v6406_v14 = vpop.eup %6405 }
 0xa8f   :  { %v6408_v44 = vpop.eup %6407  ;;  %v3902_v28 = vmul.f32 %v6406_v14, %v7589_v16 }
 0xa90   :  { %5780 = vmatprep.mubr.msk.f32.mxu0 %vm649_vm1, %v3901_v57  ;;  %3885 = vadd.xlane.f32.xlu1 %v3884_v29  ;;  %v3903_v50 = vmul.f32 %v6408_v44, %v7597_v54  ;;  %v6457_v44 = vld [vmem:[#allocation2 + $0x38] sm:$0xff] }
 0xa91   :  { %3882 = vadd.xlane.f32.xlu0 %v3881_v61  ;;  %v6453_v61 = vld [vmem:[#allocation2 + $0x18] sm:$0xff] }
 0xaa1   :  { %6277 = vrot.lane.b32.xlu1 %v7152_v15, %s6704_s20 }
 0xaa5   :  { %6282 = vrot.lane.b32.xlu1 %v7154_v17, %s6704_s20 }
 0xaa7   :  { %6272 = vrot.lane.b32.xlu0 %v7146_v12, %s6704_s20 }
 0xaa9   :  { %6287 = vrot.lane.b32.xlu1 %v7162_v42, %s6704_s20 }
 0xb19   :  { %v3892_v51 = vpop.xlane.xlu1 %3891 }
 0xb1a   :  { %v3889_v10 = vpop.xlane.xlu0 %3888 }
 0xb1d   :  { %v3886_v53 = vpop.xlane.xlu1 %3885 }
 0xb1e   :  { %6409 = vrcp.f32 %v3886_v53  ;;  %v3883_v9 = vpop.xlane.xlu0 %3882  ;;  %v6454_v53 = vld [vmem:[#allocation2 + $0x10] sm:$0xff] }
 0xb1f   :  { %6411 = vrcp.f32 %v3883_v9 }
 0xb20   :  { %6413 = vrcp.f32 %v3880_v63 }
 0xb21   :  { %6415 = vrcp.f32 %v3889_v10  ;;  %v6278_v15 = vpop.permute.xlu1 %6277 }
 0xb22   :  { %v6273_v17 = vpop.permute.xlu0 %6272  ;;  %v6280_v49 = vunpack.i.h.bf16 %v6278_v15  ;;  %v6279_v12 = vunpack.i.l.bf16 %v6278_v15  ;;  %6417 = vrcp.f32 %v3892_v51 }
 0xb23   :  { %v6275_v23 = vunpack.i.h.bf16 %v6273_v17  ;;  %v6274_v52 = vunpack.i.l.bf16 %v6273_v17  ;;  %v6455_v17 = vld [vmem:[#allocation2 + $0x28] sm:$0xff] }
 0xb24   :  { %v6084_v62 = vpack.c.bf16 %v6280_v49, %v6279_v12 }
 0xb25   :  { %v6080_v42 = vpack.c.bf16 %v6275_v23, %v6274_v52  ;;  %v6283_v39 = vpop.permute.xlu1 %6282 }
 0xb26   :  { %v6285_v40 = vunpack.i.h.bf16 %v6283_v39  ;;  %v6284_v60 = vunpack.i.l.bf16 %v6283_v39  ;;  %v6456_v39 = vld [vmem:[#allocation2 + $0x20] sm:$0xff] }
 0xb27   :  { %6081 = vmatprep.subr.bf16.mxu0 %v6080_v42 }
 0xb28   :  { %v6410_v21 = vpop.eup %6409  ;;  %v6088_v18 = vpack.c.bf16 %v6285_v40, %v6284_v60  ;;  %6083 = vmatpush3.bf16.msra.mxu0 %v6080_v42 }
 0xb29   :  { %v6412_v13 = vpop.eup %6411  ;;  %v6288_v4 = vpop.permute.xlu1 %6287  ;;  %6085 = vmatprep.subr.bf16.mxu0 %v6084_v62  ;;  %v3906_v7 = vmul.f32 %v6410_v21, %v7603_v33 }
 0xb2a   :  { %v6414_v31 = vpop.eup %6413  ;;  %v6290_v46 = vunpack.i.h.bf16 %v6288_v4  ;;  %v6289_v5 = vunpack.i.l.bf16 %v6288_v4  ;;  %6089 = vmatprep.subr.bf16.mxu1 %v6088_v18  ;;  %v3905_v0 = vmul.f32 %v6412_v13, %v6402_v55 }
 0xb2b   :  { %v6416_v30 = vpop.eup %6415  ;;  %5781 = vmatmul.mubr.msk.f32.vlgmr.msra.gmra.mrb[42].mxu0 %vm649_vm1, %v3902_v28  ;;  %6091 = vmatpush3.bf16.msra.mxu1 %v6088_v18  ;;  %v3904_v16 = vmul.f32 %v6414_v31, %v7594_v19  ;;  %v6458_v18 = vld [vmem:[#allocation2 + $0x30] sm:$0xff] }
 0xb2c   :  { %v6092_v56 = vpack.c.bf16 %v6290_v46, %v6289_v5  ;;  %6087 = vmatpush3.bf16.msra.mxu0 %v6084_v62  ;;  %5787 = vmatprep.mubr.msk.f32.mxu0 %vm649_vm1, %v3903_v50  ;;  %v6418_v26 = vpop.eup %6417  ;;  %v3907_v54 = vmul.f32 %v6416_v30, %v7607_v25 }
 0xb2d   :  { %5794 = vmatprep.mubr.msk.f32.mxu1 %vm649_vm1, %v3905_v0  ;;  %v3908_v48 = vmul.f32 %v6418_v26, %v7605_v59  ;;  %v6452_v59 = vld [vmem:[#allocation2] sm:$0xff] }
 0xb2e   :  { %5795 = vmatmul.mubr.msk.f32.vlgmr.msra.gmra.mrb[46].mxu1 %vm649_vm1, %v3906_v7  ;;  %6093 = vmatprep.subr.bf16.mxu0 %v6092_v56 }
 0xb2f   :  { %5788 = vmatmul.mubr.msk.f32.vlgmr.msra.gmra.mrb[44].mxu0 %vm649_vm1, %v3904_v16 }
 0xb30   :  { %6095 = vmatpush3.bf16.msra.mxu0 %v6092_v56  ;;  %5801 = vmatprep.mubr.msk.f32.mxu0 %vm649_vm1, %v3907_v54 }
 0xb31   :  { %6097 = vmatprep.subr.bf16.mxu0 %v6096_v22 }
 0xb33   :  { %5802 = vmatmul.mubr.msk.f32.vlgmr.msra.gmra.mrb[46].mxu0 %vm649_vm1, %v3908_v48 }
 0xb34   :  { %6099 = vmatpush3.bf16.msra.mxu0 %v6096_v22 }
 0xbfe   :  { %v5782_v19 = vpop.f32.mrb[42].mxu0 }
 0xbff   :  { %v3987_v27 = vpop.f32.mrb[43].mxu0 }
 0xc00   :  { %5808 = vmatprep.mubr.msk.f32.mxu0 %vm649_vm1, %v3987_v27 }
 0xc01   :  { %v5796_v34 = vpop.f32.mrb[46].mxu1  ;;  %5809 = vmatmul.mubr.msk.f32.vlgmr.msra.gmra.mrb[28].mxu0 %vm649_vm1, %v5782_v19 }
 0xc02   :  { %v5789_v35 = vpop.f32.mrb[44].mxu0  ;;  %v4161_v36 = vpop.f32.mrb[47].mxu1 }
 0xc03   :  { %v4074_v37 = vpop.f32.mrb[45].mxu0 }
 0xc04   :  { %5811 = vmatprep.mubr.msk.f32.mxu0 %vm649_vm1, %v4074_v37 }
 0xc05   :  { %5812 = vmatmul.mubr.msk.f32.gmra.mrb[30].mxu0 %vm649_vm1, %v5789_v35 }
 0xc06   :  { %v5803_v38 = vpop.f32.mrb[46].mxu0  ;;  %5814 = vmatprep.mubr.msk.f32.mxu0 %vm649_vm1, %v4161_v36 }
 0xc07   :  { %v4248_v41 = vpop.f32.mrb[47].mxu0 }
 0xc09   :  { %5815 = vmatmul.mubr.msk.f32.gmra.mrb[32].mxu0 %vm649_vm1, %v5796_v34 }
 0xc0a   :  { %5817 = vmatprep.mubr.msk.f32.mxu0 %vm649_vm1, %v4248_v41 }
 0xc0d   :  { %5818 = vmatmul.mubr.msk.f32.gmra.mrb[34].mxu0 %vm649_vm1, %v5803_v38 }
 0xcd4   :  { %v5810_v45 = vpop.f32.mrb[28].mxu0 }
 0xcd5   :  { %v4405_v47 = vadd.f32 %v5810_v45, %v5177_v43  ;;  %v4350_v2 = vpop.f32.mrb[29].mxu0 }
 0xcd6   :  { %v4404_v20 = vadd.f32 %v5177_v43, %v4350_v2 }
 0xcd7   :  { %v4413_v33 = vadd.f32 %v6451_v32, %v4405_v47 }
 0xcd8   :  { %v4412_v25 = vadd.f32 %v6452_v59, %v4404_v20  ;;  %v5813_v3 = vpop.f32.mrb[30].mxu0 }
 0xcd9   :  { %v4407_v55 = vadd.f32 %v5813_v3, %v5177_v43  ;;  %v4360_v58 = vpop.f32.mrb[31].mxu0  ;;  %v4423_v24 = vsel %vm224_vm0, %v4413_v33, 0.0 }
 0xcda   :  { %v4406_v57 = vadd.f32 %v5177_v43, %v4360_v58  ;;  %4424 = vadd.xlane.f32.xlu1 %v4423_v24  ;;  %v4420_v29 = vsel %vm224_vm0, %v4412_v25, 0.0 }
 0xcdb   :  { %v4415_v1 = vadd.f32 %v6453_v61, %v4407_v55  ;;  %4421 = vadd.xlane.f32.xlu0 %v4420_v29 }
 0xcdc   :  { %v5816_v63 = vpop.f32.mrb[32].mxu0  ;;  %v4414_v9 = vadd.f32 %v6454_v53, %v4406_v57  ;;  %v4558_v53 = vld [vmem:[#allocation14 + $0x18] sm:$0xff] }
 0xcdd   :  { %v4409_v6 = vadd.f32 %v5816_v63, %v5177_v43  ;;  %v4370_v51 = vpop.f32.mrb[33].mxu0  ;;  %v4429_v10 = vsel %vm224_vm0, %v4415_v1, 0.0  ;;  %v4555_v63 = vld [vmem:[#allocation14] sm:$0xff] }
 0xcde   :  { %v4408_v15 = vadd.f32 %v5177_v43, %v4370_v51  ;;  %v4426_v60 = vsel %vm224_vm0, %v4414_v9, 0.0 }
 0xcdf   :  { %v4417_v49 = vadd.f32 %v6455_v17, %v4409_v6  ;;  %4430 = vadd.xlane.f32.xlu0 %v4429_v10  ;;  %v4556_v6 = vld [vmem:[#allocation14 + $0x8] sm:$0xff]  ;;  %v4557_v10 = vld [vmem:[#allocation14 + $0x10] sm:$0xff] }
 0xce0   :  { %v5819_v12 = vpop.f32.mrb[34].mxu0  ;;  %v4416_v14 = vadd.f32 %v6456_v39, %v4408_v15  ;;  %v6100_v51 = vpack.c.bf16 %v4556_v6, %v4555_v63  ;;  %v4559_v15 = vld [vmem:[#allocation14 + $0x20] sm:$0xff]  ;;  %v4560_v17 = vld [vmem:[#allocation14 + $0x28] sm:$0xff] }
 0xce1   :  { %v4411_v23 = vadd.f32 %v5819_v12, %v5177_v43  ;;  %v4380_v52 = vpop.f32.mrb[35].mxu0  ;;  %v4435_v42 = vsel %vm224_vm0, %v4417_v49, 0.0  ;;  %v4561_v12 = vld [vmem:[#allocation14 + $0x30] sm:$0xff]  ;;  %v4708_v39 = vld [vmem:[#allocation16 + $0x8] sm:$0xff] }
 0xce2   :  { %v4410_v40 = vadd.f32 %v5177_v43, %v4380_v52  ;;  %4436 = vadd.xlane.f32.xlu1 %v4435_v42  ;;  %v4432_v28 = vsel %vm224_vm0, %v4416_v14, 0.0  ;;  %6101 = vmatprep.subr.bf16.mxu1 %v6100_v51  ;;  %v4707_v42 = vld [vmem:[#allocation16] sm:$0xff] }
 0xce3   :  { %v4419_v62 = vadd.f32 %v6457_v44, %v4411_v23  ;;  %4427 = vadd.xlane.f32.xlu0 %v4426_v60  ;;  %6103 = vmatpush3.bf16.msra.mxu1 %v6100_v51  ;;  %v4562_v23 = vld [vmem:[#allocation14 + $0x38] sm:$0xff] }
 0xce4   :  { %v4418_v13 = vadd.f32 %v6458_v18, %v4410_v40  ;;  %v6112_v52 = vpack.c.bf16 %v4562_v23, %v4561_v12  ;;  %v6116_v40 = vpack.c.bf16 %v4708_v39, %v4707_v42  ;;  %v4710_v60 = vld [vmem:[#allocation16 + $0x18] sm:$0xff] }
 0xce5   :  { %v4441_v21 = vsel %vm224_vm0, %v4419_v62, 0.0 }
 0xce6   :  { %4442 = vadd.xlane.f32.xlu1 %v4441_v21  ;;  %v4438_v4 = vsel %vm224_vm0, %v4418_v13, 0.0  ;;  %v4712_v21 = vld [vmem:[#allocation16 + $0x28] sm:$0xff]  ;;  %6117 = vmatprep.subr.bf16.mxu0 %v6116_v40 }
 0xce7   :  { %4433 = vadd.xlane.f32.xlu0 %v4432_v28  ;;  %6119 = vmatpush3.bf16.msra.mxu0 %v6116_v40 }
 0xceb   :  { %4439 = vadd.xlane.f32.xlu0 %v4438_v4 }
 0xd67   :  { %v4425_v31 = vpop.xlane.xlu1 %4424 }
 0xd68   :  { %v4446_v46 = vmul.f32 0.015625, %v4425_v31  ;;  %v4422_v5 = vpop.xlane.xlu0 %4421 }
 0xd69   :  { %v4445_v50 = vmul.f32 0.015625, %v4422_v5 }
 0xd6a   :  { %v7657_v0 = vsub.f32 %v4413_v33, %v4446_v46 }
 0xd6b   :  { %v7659_v8 = vsub.f32 %v4412_v25, %v4445_v50 }
 0xd6c   :  { %v4431_v11 = vpop.xlane.xlu0 %4430  ;;  %v4462_v30 = vmul.f32 %v7657_v0, %v7657_v0 }
 0xd6d   :  { %v4448_v7 = vmul.f32 0.015625, %v4431_v11  ;;  %v4461_v56 = vmul.f32 %v7659_v8, %v7659_v8 }
 0xd6e   :  { %v4472_v16 = vsel %vm224_vm0, %v4462_v30, 0.0 }
 0xd6f   :  { %v7666_v22 = vsub.f32 %v4415_v1, %v4448_v7  ;;  %v4437_v26 = vpop.xlane.xlu1 %4436  ;;  %4473 = vadd.xlane.f32.xlu1 %v4472_v16  ;;  %v4469_v54 = vsel %vm224_vm0, %v4461_v56, 0.0 }
 0xd70   :  { %v4450_v48 = vmul.f32 0.015625, %v4437_v26  ;;  %v4428_v19 = vpop.xlane.xlu0 %4427  ;;  %4470 = vadd.xlane.f32.xlu0 %v4469_v54 }
 0xd71   :  { %v4447_v27 = vmul.f32 0.015625, %v4428_v19  ;;  %v4464_v34 = vmul.f32 %v7666_v22, %v7666_v22 }
 0xd72   :  { %v7671_v35 = vsub.f32 %v4417_v49, %v4450_v48  ;;  %v6108_v49 = vpack.c.bf16 %v4560_v17, %v4559_v15 }
 0xd73   :  { %v7673_v36 = vsub.f32 %v4414_v9, %v4447_v27  ;;  %v4443_v37 = vpop.xlane.xlu1 %4442  ;;  %v4478_v38 = vsel %vm224_vm0, %v4464_v34, 0.0  ;;  %v6104_v9 = vpack.c.bf16 %v4558_v53, %v4557_v10 }
 0xd74   :  { %v4452_v41 = vmul.f32 0.015625, %v4443_v37  ;;  %v4434_v43 = vpop.xlane.xlu0 %4433  ;;  %4479 = vadd.xlane.f32.xlu1 %v4478_v38  ;;  %v4466_v45 = vmul.f32 %v7671_v35, %v7671_v35 }
 0xd75   :  { %v4449_v47 = vmul.f32 0.015625, %v4434_v43  ;;  %v4463_v2 = vmul.f32 %v7673_v36, %v7673_v36  ;;  %6105 = vmatprep.subr.bf16.mxu1 %v6104_v9 }
 0xd76   :  { %v7680_v20 = vsub.f32 %v4419_v62, %v4452_v41  ;;  %v4484_v32 = vsel %vm224_vm0, %v4466_v45, 0.0  ;;  %6107 = vmatpush3.bf16.msra.mxu1 %v6104_v9  ;;  %v4711_v62 = vld [vmem:[#allocation16 + $0x20] sm:$0xff] }
 0xd77   :  { %v7683_v33 = vsub.f32 %v4416_v14, %v4449_v47  ;;  %v4475_v59 = vsel %vm224_vm0, %v4463_v2, 0.0  ;;  %6109 = vmatprep.subr.bf16.mxu1 %v6108_v49  ;;  %v4709_v14 = vld [vmem:[#allocation16 + $0x10] sm:$0xff]  ;;  %v6124_v18 = vpack.c.bf16 %v4712_v21, %v4711_v62  ;;  %v5178_v41 = vld [vmem:[%s7861_s11] ss:$0 sm:$0xff] }
 0xd78   :  { %4485 = vadd.xlane.f32.xlu1 %v4484_v32  ;;  %4476 = vadd.xlane.f32.xlu0 %v4475_v59  ;;  %v4440_v25 = vpop.xlane.xlu0 %4439  ;;  %v4468_v3 = vmul.f32 %v7680_v20, %v7680_v20  ;;  %v6120_v44 = vpack.c.bf16 %v4710_v60, %v4709_v14  ;;  %v4714_v60 = vld [vmem:[#allocation16 + $0x38] sm:$0xff]  ;;  %v5180_v62 = vld [vmem:[%s7864_s14] ss:$0 sm:$0xff] }
 0xd79   :  { %v4451_v55 = vmul.f32 0.015625, %v4440_v25  ;;  %v4465_v58 = vmul.f32 %v7683_v33, %v7683_v33 }
 0xd7a   :  { %v4490_v24 = vsel %vm224_vm0, %v4468_v3, 0.0  ;;  %6111 = vmatpush3.bf16.msra.mxu1 %v6108_v49  ;;  %6121 = vmatprep.subr.bf16.mxu0 %v6120_v44  ;;  %v5179_v3 = vld [vmem:[%s7862_s12] ss:$0 sm:$0xff] }
 0xd7b   :  { %v7691_v57 = vsub.f32 %v4418_v13, %v4451_v55  ;;  %v4481_v29 = vsel %vm224_vm0, %v4465_v58, 0.0  ;;  %6113 = vmatprep.subr.bf16.mxu1 %v6112_v52  ;;  %6123 = vmatpush3.bf16.msra.mxu0 %v6120_v44 }
 0xd7c   :  { %4491 = vadd.xlane.f32.xlu1 %v4490_v24  ;;  %4482 = vadd.xlane.f32.xlu0 %v4481_v29 }
 0xd7d   :  { %v4467_v61 = vmul.f32 %v7691_v57, %v7691_v57  ;;  %6125 = vmatprep.subr.bf16.mxu0 %v6124_v18 }
 0xd7e   :  { %6115 = vmatpush3.bf16.msra.mxu1 %v6112_v52 }
 0xd7f   :  { %v4487_v1 = vsel %vm224_vm0, %v4467_v61, 0.0  ;;  %6127 = vmatpush3.bf16.msra.mxu0 %v6124_v18 }
 0xd80   :  { %4488 = vadd.xlane.f32.xlu0 %v4487_v1 }
 0xdfc   :  { %v4474_v13 = vpop.xlane.xlu1 %4473 }
 0xdfd   :  { %v4494_v28 = vmul.f32 0.015625, %v4474_v13  ;;  %v4471_v4 = vpop.xlane.xlu0 %4470 }
 0xdfe   :  { %v4493_v31 = vmul.f32 0.015625, %v4471_v4 }
 0xdff   :  { %v4502_v46 = vadd.f32 1e-05, %v4494_v28 }
 0xe00   :  { %v4501_v5 = vadd.f32 1e-05, %v4493_v31 }
 0xe01   :  { %6419 = vrsqrt.f32 %v4502_v46  ;;  %v4480_v50 = vpop.xlane.xlu1 %4479 }
 0xe02   :  { %6421 = vrsqrt.f32 %v4501_v5  ;;  %v4496_v11 = vmul.f32 0.015625, %v4480_v50 }
 0xe04   :  { %v4504_v30 = vadd.f32 1e-05, %v4496_v11 }
 0xe05   :  { %v4486_v7 = vpop.xlane.xlu1 %4485  ;;  %v4477_v56 = vpop.xlane.xlu0 %4476 }
 0xe06   :  { %6423 = vrsqrt.f32 %v4504_v30  ;;  %v4498_v16 = vmul.f32 0.015625, %v4486_v7  ;;  %v4495_v26 = vmul.f32 0.015625, %v4477_v56 }
 0xe08   :  { %v4506_v54 = vadd.f32 1e-05, %v4498_v16  ;;  %v4503_v48 = vadd.f32 1e-05, %v4495_v26 }
 0xe09   :  { %v4492_v19 = vpop.xlane.xlu1 %4491  ;;  %v4483_v27 = vpop.xlane.xlu0 %4482 }
 0xe0a   :  { %6425 = vrsqrt.f32 %v4506_v54  ;;  %v4500_v34 = vmul.f32 0.015625, %v4492_v19  ;;  %v4497_v37 = vmul.f32 0.015625, %v4483_v27 }
 0xe0b   :  { %v6420_v38 = vpop.eup %6419  ;;  %6427 = vrsqrt.f32 %v4503_v48 }
 0xe0c   :  { %v6422_v43 = vpop.eup %6421  ;;  %v4518_v45 = vmul.f32 %v6420_v38, %v7657_v0  ;;  %v4508_v47 = vadd.f32 1e-05, %v4500_v34  ;;  %v4505_v2 = vadd.f32 1e-05, %v4497_v37 }
 0xe0d   :  { %v4489_v32 = vpop.xlane.xlu0 %4488  ;;  %v4517_v59 = vmul.f32 %v6422_v43, %v7659_v8 }
 0xe0e   :  { %6429 = vrsqrt.f32 %v4508_v47  ;;  %v4499_v25 = vmul.f32 0.015625, %v4489_v32  ;;  %v4533_v55 = vmul.f32 %v5178_v41, %v4518_v45  ;;  %v5189_v45 = vld [vmem:[%s7866_s16] ss:$0 sm:$0xff] }
 0xe0f   :  { %6431 = vrsqrt.f32 %v4505_v2  ;;  %v4532_v58 = vmul.f32 %v5178_v41, %v4517_v59 }
 0xe10   :  { %v6424_v24 = vpop.eup %6423  ;;  %v4507_v29 = vadd.f32 1e-05, %v4499_v25  ;;  %v7707_v0 = vadd.f32 %v5179_v3, %v4533_v55 }
 0xe11   :  { %v7705_v61 = vadd.f32 %v5179_v3, %v4532_v58  ;;  %v4520_v8 = vmul.f32 %v6424_v24, %v7666_v22 }
 0xe12   :  { %6433 = vrsqrt.f32 %v4507_v29 }
 0xe13   :  { %5836 = vmatprep.mubr.msk.f32.mxu1 %vm224_vm0, %v7705_v61  ;;  %v4535_v51 = vmul.f32 %v5178_v41, %v4520_v8 }
 0xe14   :  { %v6426_v1 = vpop.eup %6425  ;;  %5837 = vmatmul.mubr.msk.f32.vlgmr.msra.gmra.mrb[48].mxu1 %vm224_vm0, %v7707_v0 }
 0xe15   :  { %v6428_v63 = vpop.eup %6427  ;;  %v4522_v10 = vmul.f32 %v6426_v1, %v7671_v35  ;;  %v7719_v12 = vadd.f32 %v5179_v3, %v4535_v51 }
 0xe16   :  { %v4519_v6 = vmul.f32 %v6428_v63, %v7673_v36 }
 0xe17   :  { %v4537_v22 = vmul.f32 %v5178_v41, %v4522_v10 }
 0xe18   :  { %v6430_v53 = vpop.eup %6429  ;;  %v4534_v9 = vmul.f32 %v5178_v41, %v4519_v6 }
 0xe19   :  { %v6432_v15 = vpop.eup %6431  ;;  %v4524_v23 = vmul.f32 %v6430_v53, %v7680_v20  ;;  %v7729_v39 = vadd.f32 %v5179_v3, %v4537_v22 }
 0xe1a   :  { %v7716_v17 = vadd.f32 %v5179_v3, %v4534_v9  ;;  %v4521_v49 = vmul.f32 %v6432_v15, %v7683_v33 }
 0xe1b   :  { %v4539_v14 = vmul.f32 %v5178_v41, %v4524_v23 }
 0xe1c   :  { %v6434_v52 = vpop.eup %6433  ;;  %5839 = vmatprep.mubr.msk.f32.mxu1 %vm224_vm0, %v7716_v17  ;;  %v4536_v36 = vmul.f32 %v5178_v41, %v4521_v49 }
 0xe1d   :  { %5840 = vmatmul.mubr.msk.f32.gmra.mrb[50].mxu1 %vm224_vm0, %v7719_v12  ;;  %v4523_v35 = vmul.f32 %v6434_v52, %v7691_v57  ;;  %v7739_v40 = vadd.f32 %v5179_v3, %v4539_v14  ;;  %v4713_v57 = vld [vmem:[#allocation16 + $0x30] sm:$0xff] }
 0xe1e   :  { %v7727_v42 = vadd.f32 %v5179_v3, %v4536_v36  ;;  %v6128_v44 = vpack.c.bf16 %v4714_v60, %v4713_v57 }
 0xe1f   :  { %v4538_v33 = vmul.f32 %v5178_v41, %v4523_v35 }
 0xe20   :  { %5842 = vmatprep.mubr.msk.f32.mxu1 %vm224_vm0, %v7727_v42  ;;  %6129 = vmatprep.subr.bf16.mxu0 %v6128_v44 }
 0xe21   :  { %5843 = vmatmul.mubr.msk.f32.gmra.mrb[52].mxu1 %vm224_vm0, %v7729_v39  ;;  %v7735_v20 = vadd.f32 %v5179_v3, %v4538_v33  ;;  %6131 = vmatpush3.bf16.msra.mxu0 %v6128_v44 }
 0xe23   :  { %5845 = vmatprep.mubr.msk.f32.mxu1 %vm224_vm0, %v7735_v20 }
 0xe25   :  { %5846 = vmatmul.mubr.msk.f32.gmra.mrb[54].mxu1 %vm224_vm0, %v7739_v40 }
 0xee7   :  { %v5838_v21 = vpop.f32.mrb[48].mxu1 }
 0xee8   :  { %v4666_v18 = vadd.f32 %v5838_v21, %v5180_v62  ;;  %v4660_v13 = vpop.f32.mrb[49].mxu1 }
 0xee9   :  { %v4661_v28 = vadd.f32 %v5180_v62, %v4660_v13 }
 0xeea   :  { %v4700_v31 = vmax.f32 %v4666_v18, 0.0 }
 0xeeb   :  { %v4699_v4 = vmax.f32 %v4661_v28, 0.0 }
 0xeed   :  { %5864 = vmatprep.mubr.msk.f32.mxu0 %vm224_vm0, %v4699_v4 }
 0xeee   :  { %5865 = vmatmul.mubr.msk.f32.vlgmr.msra.gmra.mrb[48].mxu0 %vm224_vm0, %v4700_v31 }
 0xef0   :  { %v5841_v46 = vpop.f32.mrb[50].mxu1 }
 0xef1   :  { %v4676_v5 = vadd.f32 %v5841_v46, %v5180_v62  ;;  %v4670_v50 = vpop.f32.mrb[51].mxu1 }
 0xef2   :  { %v4671_v11 = vadd.f32 %v5180_v62, %v4670_v50 }
 0xef3   :  { %v4702_v56 = vmax.f32 %v4676_v5, 0.0 }
 0xef4   :  { %v4701_v30 = vmax.f32 %v4671_v11, 0.0  ;;  %v5844_v7 = vpop.f32.mrb[52].mxu1 }
 0xef5   :  { %v4686_v16 = vadd.f32 %v5844_v7, %v5180_v62  ;;  %v4680_v26 = vpop.f32.mrb[53].mxu1 }
 0xef6   :  { %v4681_v54 = vadd.f32 %v5180_v62, %v4680_v26  ;;  %5867 = vmatprep.mubr.msk.f32.mxu0 %vm224_vm0, %v4701_v30 }
 0xef7   :  { %5868 = vmatmul.mubr.msk.f32.gmra.mrb[50].mxu0 %vm224_vm0, %v4702_v56  ;;  %v4704_v27 = vmax.f32 %v4686_v16, 0.0 }
 0xef8   :  { %v4703_v48 = vmax.f32 %v4681_v54, 0.0  ;;  %v5847_v19 = vpop.f32.mrb[54].mxu1 }
 0xef9   :  { %v4696_v34 = vadd.f32 %v5847_v19, %v5180_v62  ;;  %v4690_v37 = vpop.f32.mrb[55].mxu1 }
 0xefa   :  { %v4691_v38 = vadd.f32 %v5180_v62, %v4690_v37  ;;  %5870 = vmatprep.mubr.msk.f32.mxu0 %vm224_vm0, %v4703_v48 }
 0xefb   :  { %5871 = vmatmul.mubr.msk.f32.gmra.mrb[52].mxu0 %vm224_vm0, %v4704_v27  ;;  %v4706_v43 = vmax.f32 %v4696_v34, 0.0 }
 0xefc   :  { %v4705_v41 = vmax.f32 %v4691_v38, 0.0 }
 0xefe   :  { %5873 = vmatprep.mubr.msk.f32.mxu0 %vm224_vm0, %v4705_v41 }
 0xeff   :  { %5874 = vmatmul.mubr.msk.f32.gmra.mrb[54].mxu0 %vm224_vm0, %v4706_v43 }
 0xfc1   :  { %v5866_v47 = vpop.f32.mrb[48].mxu0 }
 0xfc2   :  { %v4818_v2 = vadd.f32 %v5866_v47, %v5189_v45  ;;  %v4812_v32 = vpop.f32.mrb[49].mxu0 }
 0xfc3   :  { %v4813_v59 = vadd.f32 %v5189_v45, %v4812_v32 }
 0xfc4   :  { %v4852_v25 = vadd.f32 %v4818_v2, %v7707_v0 }
 0xfc5   :  { %v4851_v3 = vadd.f32 %v4813_v59, %v7705_v61 }
 0xfc6   :  { %v4862_v55 = vsel %vm224_vm0, %v4852_v25, 0.0 }
 0xfc7   :  { %4863 = vadd.xlane.f32.xlu1 %v4862_v55  ;;  %v4859_v58 = vsel %vm224_vm0, %v4851_v3, 0.0 }
 0xfc8   :  { %4860 = vadd.xlane.f32.xlu0 %v4859_v58 }
 0xfca   :  { %v5869_v24 = vpop.f32.mrb[50].mxu0 }
 0xfcb   :  { %v4828_v29 = vadd.f32 %v5869_v24, %v5189_v45  ;;  %v4822_v8 = vpop.f32.mrb[51].mxu0 }
 0xfcc   :  { %v4823_v1 = vadd.f32 %v5189_v45, %v4822_v8 }
 0xfcd   :  { %v4854_v63 = vadd.f32 %v4828_v29, %v7719_v12 }
 0xfce   :  { %v4853_v6 = vadd.f32 %v4823_v1, %v7716_v17  ;;  %v5872_v51 = vpop.f32.mrb[52].mxu0 }
 0xfcf   :  { %v4838_v10 = vadd.f32 %v5872_v51, %v5189_v45  ;;  %v4832_v53 = vpop.f32.mrb[53].mxu0  ;;  %v4868_v0 = vsel %vm224_vm0, %v4854_v63, 0.0 }
 0xfd0   :  { %v4833_v61 = vadd.f32 %v5189_v45, %v4832_v53  ;;  %4869 = vadd.xlane.f32.xlu1 %v4868_v0  ;;  %v4865_v9 = vsel %vm224_vm0, %v4853_v6, 0.0 }
 0xfd1   :  { %v4856_v15 = vadd.f32 %v4838_v10, %v7729_v39  ;;  %4866 = vadd.xlane.f32.xlu0 %v4865_v9 }
 0xfd2   :  { %v4855_v49 = vadd.f32 %v4833_v61, %v7727_v42  ;;  %v5875_v22 = vpop.f32.mrb[54].mxu0 }
 0xfd3   :  { %v4848_v23 = vadd.f32 %v5875_v22, %v5189_v45  ;;  %v4842_v52 = vpop.f32.mrb[55].mxu0  ;;  %v4874_v12 = vsel %vm224_vm0, %v4856_v15, 0.0 }
 0xfd4   :  { %v4843_v17 = vadd.f32 %v5189_v45, %v4842_v52  ;;  %4875 = vadd.xlane.f32.xlu1 %v4874_v12  ;;  %v4871_v36 = vsel %vm224_vm0, %v4855_v49, 0.0  ;;  %v5198_v52 = vld [vmem:[%s7867_s17] ss:$0 sm:$0xff]  ;;  %s6705_s17 = smov [#allocation17]  }
 0xfd5   :  { %v4858_v35 = vadd.f32 %v4848_v23, %v7739_v40  ;;  %4872 = vadd.xlane.f32.xlu0 %v4871_v36  ;;  %s5006_s27 = sshll.u32 %s6705_s17, 4  ;;  %s5007_s27 = int_to_ptr.vmem [resolvable:$true] %s5006_s27 }
 0xfd6   :  { %v4857_v33 = vadd.f32 %v4843_v17, %v7735_v20  ;;  %s6657_s0 = scalar_lea.vmem %s5007_s27, 1024  ;;  %p6662_p3 = scmp.lt.s32.totalorder %s5007_s27, %s5007_s27 }
 0xfd7   :  { %v4880_v14 = vsel %vm224_vm0, %v4858_v35, 0.0  ;;  %p6658_p2 = scmp.ne.s32.totalorder %s5007_s27, %s6657_s0  ;;  %p6663_p4 = scmp.lt.s32.totalorder %s6657_s0, %s6657_s0 }
 0xfd8   :  { %4881 = vadd.xlane.f32.xlu1 %v4880_v14  ;;  %v4877_v39 = vsel %vm224_vm0, %v4857_v33, 0.0 }
 0xfd9   :  { %4878 = vadd.xlane.f32.xlu0 %v4877_v39  ;;  %p6664_p5 = por %p6663_p4, %p6662_p3 }
 0xfdb   :  { %p6665_p6 = pnand %p6664_p5, %p6658_p2 }
0x1054   :  { %v4864_v42 = vpop.xlane.xlu1 %4863 }
0x1055   :  { %v4884_v57 = vmul.f32 0.015625, %v4864_v42  ;;  %v4861_v60 = vpop.xlane.xlu0 %4860 }
0x1056   :  { %v4883_v44 = vmul.f32 0.015625, %v4861_v60 }
0x1057   :  { %v7773_v62 = vsub.f32 %v4852_v25, %v4884_v57 }
0x1058   :  { %v7775_v21 = vsub.f32 %v4851_v3, %v4883_v44 }
0x1059   :  { %v4900_v40 = vmul.f32 %v7773_v62, %v7773_v62 }
0x105a   :  { %v4899_v20 = vmul.f32 %v7775_v21, %v7775_v21 }
0x105b   :  { %v4910_v18 = vsel %vm224_vm0, %v4900_v40, 0.0 }
0x105c   :  { %4911 = vadd.xlane.f32.xlu1 %v4910_v18  ;;  %v4907_v13 = vsel %vm224_vm0, %v4899_v20, 0.0 }
0x105d   :  { %v4870_v28 = vpop.xlane.xlu1 %4869  ;;  %4908 = vadd.xlane.f32.xlu0 %v4907_v13 }
0x105e   :  { %v4886_v4 = vmul.f32 0.015625, %v4870_v28  ;;  %v4867_v31 = vpop.xlane.xlu0 %4866 }
0x105f   :  { %v4885_v46 = vmul.f32 0.015625, %v4867_v31 }
0x1060   :  { %v7783_v5 = vsub.f32 %v4854_v63, %v4886_v4 }
0x1061   :  { %v7785_v50 = vsub.f32 %v4853_v6, %v4885_v46  ;;  %v4876_v11 = vpop.xlane.xlu1 %4875 }
0x1062   :  { %v4888_v30 = vmul.f32 0.015625, %v4876_v11  ;;  %v4873_v7 = vpop.xlane.xlu0 %4872  ;;  %v4902_v56 = vmul.f32 %v7783_v5, %v7783_v5 }
0x1063   :  { %v4887_v16 = vmul.f32 0.015625, %v4873_v7  ;;  %v4901_v26 = vmul.f32 %v7785_v50, %v7785_v50 }
0x1064   :  { %v7791_v54 = vsub.f32 %v4856_v15, %v4888_v30  ;;  %v4916_v48 = vsel %vm224_vm0, %v4902_v56, 0.0 }
0x1065   :  { %v7794_v19 = vsub.f32 %v4855_v49, %v4887_v16  ;;  %4917 = vadd.xlane.f32.xlu1 %v4916_v48  ;;  %v4882_v27 = vpop.xlane.xlu1 %4881  ;;  %v4913_v34 = vsel %vm224_vm0, %v4901_v26, 0.0 }
0x1066   :  { %v4890_v37 = vmul.f32 0.015625, %v4882_v27  ;;  %4914 = vadd.xlane.f32.xlu0 %v4913_v34  ;;  %v4879_v38 = vpop.xlane.xlu0 %4878  ;;  %v4904_v41 = vmul.f32 %v7791_v54, %v7791_v54 }
0x1067   :  { %v4889_v43 = vmul.f32 0.015625, %v4879_v38  ;;  %v4903_v45 = vmul.f32 %v7794_v19, %v7794_v19 }
0x1068   :  { %v7801_v47 = vsub.f32 %v4858_v35, %v4890_v37  ;;  %v4922_v2 = vsel %vm224_vm0, %v4904_v41, 0.0 }
0x1069   :  { %v7804_v32 = vsub.f32 %v4857_v33, %v4889_v43  ;;  %4923 = vadd.xlane.f32.xlu1 %v4922_v2  ;;  %v4919_v59 = vsel %vm224_vm0, %v4903_v45, 0.0  ;;  %v5199_v33 = vld [vmem:[%s7891_s24] ss:$0 sm:$0xff] }
0x106a   :  { %4920 = vadd.xlane.f32.xlu0 %v4919_v59  ;;  %v4906_v25 = vmul.f32 %v7801_v47, %v7801_v47 }
0x106b   :  { %v4905_v3 = vmul.f32 %v7804_v32, %v7804_v32 }
0x106c   :  { %v4928_v55 = vsel %vm224_vm0, %v4906_v25, 0.0 }
0x106d   :  { %4929 = vadd.xlane.f32.xlu1 %v4928_v55  ;;  %v4925_v58 = vsel %vm224_vm0, %v4905_v3, 0.0 }
0x106e   :  { %4926 = vadd.xlane.f32.xlu0 %v4925_v58 }
0x10e9   :  { %v4912_v24 = vpop.xlane.xlu1 %4911 }
0x10ea   :  { %v4932_v29 = vmul.f32 0.015625, %v4912_v24  ;;  %v4909_v8 = vpop.xlane.xlu0 %4908 }
0x10eb   :  { %v4931_v1 = vmul.f32 0.015625, %v4909_v8 }
0x10ec   :  { %v4940_v63 = vadd.f32 1e-05, %v4932_v29 }
0x10ed   :  { %v4939_v6 = vadd.f32 1e-05, %v4931_v1 }
0x10ee   :  { %6435 = vrsqrt.f32 %v4940_v63 }
0x10ef   :  { %6437 = vrsqrt.f32 %v4939_v6 }
0x10f2   :  { %v4918_v51 = vpop.xlane.xlu1 %4917 }
0x10f3   :  { %v4934_v10 = vmul.f32 0.015625, %v4918_v51  ;;  %v4915_v53 = vpop.xlane.xlu0 %4914 }
0x10f4   :  { %v4933_v0 = vmul.f32 0.015625, %v4915_v53 }
0x10f5   :  { %v4942_v61 = vadd.f32 1e-05, %v4934_v10 }
0x10f6   :  { %v4941_v9 = vadd.f32 1e-05, %v4933_v0  ;;  %v4924_v15 = vpop.xlane.xlu1 %4923 }
0x10f7   :  { %6439 = vrsqrt.f32 %v4942_v61  ;;  %v4936_v49 = vmul.f32 0.015625, %v4924_v15  ;;  %v4921_v22 = vpop.xlane.xlu0 %4920 }
0x10f8   :  { %v6436_v23 = vpop.eup %6435  ;;  %6441 = vrsqrt.f32 %v4941_v9  ;;  %v4935_v12 = vmul.f32 0.015625, %v4921_v22 }
0x10f9   :  { %v6438_v17 = vpop.eup %6437  ;;  %v4956_v36 = vmul.f32 %v6436_v23, %v7773_v62  ;;  %v4944_v35 = vadd.f32 1e-05, %v4936_v49 }
0x10fa   :  { %v4955_v14 = vmul.f32 %v6438_v17, %v7775_v21  ;;  %v4943_v39 = vadd.f32 1e-05, %v4935_v12  ;;  %v4930_v42 = vpop.xlane.xlu1 %4929 }
0x10fb   :  { %v4971_v57 = vmul.f32 %v5198_v52, %v4956_v36  ;;  %6443 = vrsqrt.f32 %v4944_v35  ;;  %v4938_v60 = vmul.f32 0.015625, %v4930_v42  ;;  %v4927_v44 = vpop.xlane.xlu0 %4926 }
0x10fc   :  { %v4970_v40 = vmul.f32 %v5198_v52, %v4955_v14  ;;  %6445 = vrsqrt.f32 %v4943_v39  ;;  %v4937_v20 = vmul.f32 0.015625, %v4927_v44 }
0x10fd   :  { %v4986_v18 = vadd.f32 %v5199_v33, %v4971_v57  ;;  %v4946_v13 = vadd.f32 1e-05, %v4938_v60 }
0x10fe   :  { %v4985_v28 = vadd.f32 %v5199_v33, %v4970_v40  ;;  %v4945_v62 = vadd.f32 1e-05, %v4937_v20 }
0x10ff   :  { %4994 = vst.msk [vmem:[#allocation17 + $0x8] sm:$0xff] %vm224_vm0, %v4986_v18  ;;  %6447 = vrsqrt.f32 %v4946_v13 }
0x1100   :  { %4993 = vst.msk [vmem:[#allocation17] sm:$0xff] %vm224_vm0, %v4985_v28  ;;  %6449 = vrsqrt.f32 %v4945_v62 }
0x1101   :  { %v6440_v21 = vpop.eup %6439 }
0x1102   :  { %v6442_v4 = vpop.eup %6441  ;;  %v4958_v31 = vmul.f32 %v6440_v21, %v7783_v5 }
0x1103   :  { %v4957_v46 = vmul.f32 %v6442_v4, %v7785_v50 }
0x1104   :  { %v4973_v11 = vmul.f32 %v5198_v52, %v4958_v31 }
0x1105   :  { %v6444_v30 = vpop.eup %6443  ;;  %v4972_v7 = vmul.f32 %v5198_v52, %v4957_v46 }
0x1106   :  { %v6446_v56 = vpop.eup %6445  ;;  %v4988_v16 = vadd.f32 %v5199_v33, %v4973_v11  ;;  %v4960_v26 = vmul.f32 %v6444_v30, %v7791_v54 }
0x1107   :  { %v4987_v48 = vadd.f32 %v5199_v33, %v4972_v7  ;;  %v4959_v27 = vmul.f32 %v6446_v56, %v7794_v19 }
0x1108   :  { %4996 = vst.msk [vmem:[#allocation17 + $0x18] sm:$0xff] %vm224_vm0, %v4988_v16  ;;  %v4975_v34 = vmul.f32 %v5198_v52, %v4960_v26 }
0x1109   :  { %v6448_v37 = vpop.eup %6447  ;;  %4995 = vst.msk [vmem:[#allocation17 + $0x10] sm:$0xff] %vm224_vm0, %v4987_v48  ;;  %v4974_v38 = vmul.f32 %v5198_v52, %v4959_v27 }
0x110a   :  { %v6450_v5 = vpop.eup %6449  ;;  %v4990_v41 = vadd.f32 %v5199_v33, %v4975_v34  ;;  %v4962_v50 = vmul.f32 %v6448_v37, %v7801_v47 }
0x110b   :  { %v4989_v43 = vadd.f32 %v5199_v33, %v4974_v38  ;;  %v4961_v45 = vmul.f32 %v6450_v5, %v7804_v32 }
0x110c   :  { %4998 = vst.msk [vmem:[#allocation17 + $0x28] sm:$0xff] %vm224_vm0, %v4990_v41  ;;  %v4977_v54 = vmul.f32 %v5198_v52, %v4962_v50 }
0x110d   :  { %4997 = vst.msk [vmem:[#allocation17 + $0x20] sm:$0xff] %vm224_vm0, %v4989_v43  ;;  %v4976_v19 = vmul.f32 %v5198_v52, %v4961_v45 }
0x110e   :  { %v4992_v2 = vadd.f32 %v5199_v33, %v4977_v54 }
0x110f   :  { %v4991_v59 = vadd.f32 %v5199_v33, %v4976_v19 }
0x1110   :  { %5000 = vst.msk [vmem:[#allocation17 + $0x38] sm:$0xff] %vm224_vm0, %v4992_v2 }
0x1111   :  { %4999 = vst.msk [vmem:[#allocation17 + $0x30] sm:$0xff] %vm224_vm0, %v4991_v59 }
0x1112   :  { %6668 = shalt.err (!%p6665_p6)
}
0x1113   :  { %s7892_s15 = sld [smem:[#allocation29_spill]] }
0x1119   :  { %s6669_s19 = scalar_lea.hbm %s7892_s15, 1024 }
0x111a   :  { %p6670_p7 = scmp.ne.s32.totalorder %s7892_s15, %s6669_s19  ;;  %p6673_p8 = scmp.lt.u32.totalorder %s6669_s19, %s7892_s15 }
0x111c   :  { %p6675_p9 = pnand %p6673_p8, %p6670_p7 }
0x111e   :  { %6678 = shalt.err (!%p6675_p9)
}
0x111f   :  { %5012 = dma.vmem_to_hbm [thread:$0]  %s5007_s27, 1024, %s7892_s15, [#allocation4], %s6693_s28, %s6693_s28, %s6694_s29  }
0x1120   :  { %6689 = dma.done.wait [#allocation4], 1024  }
0x1121   :  { %6690 = vsyncadd [#allocation4], 4294966272 }
0x1122   :  { %5016 = vsyncpa [#allocation3], 1 }
0x1123   :  { %5017 = vsyncpa [#allocation6], 1 }
0x1124   :  { %5018 = vsyncpa [#allocation9], 1 }
0x1125   :  { %5019 = vsyncpa [#allocation12], 1 }
0x1126   :  { %5020 = vsyncpa [#allocation15], 1 }
0x1127   :  { %5021 = vsyncpa [#allocation4], 1 }

</bundles_post_ra>
